<compile_context>
chip_gen: v7x
topology: tpu7x:2x2x1
jax: 0.10.0
libtpu: 0.0.40
codegen_flags: <defaults>
</compile_context>

<pallas_src>
import functools

import jax
import jax.numpy as jnp
from jax.experimental import pallas as pl
from jax.experimental.pallas import tpu as pltpu


_VMEM_LIMIT = 48 * 1024 * 1024


# --------------------------------------------------------------------------
# Kernels
# --------------------------------------------------------------------------
def _conv1_kernel(x_ref, w_ref, b_ref, o_ref):
    """conv1 (kernel (40,1)) + ReLU.  BN is already folded into w/b.

    x_ref: (1, T, n_mels) f32, w_ref: (n_mels, C1) bf16, b_ref: (1, C1) f32.
    """
    x = x_ref[0].astype(jnp.bfloat16)                                # (T, n_mels)
    y = jnp.dot(x, w_ref[...], preferred_element_type=jnp.float32)   # (T, C1)
    o_ref[0] = jnp.maximum(y + b_ref[...], 0.0)


def _conv_relu_wmax_kernel(x_ref, w_ref, b_ref, o_ref, *, K, P):
    """1-D-over-time conv (kernel K, 'same' pad P) + ReLU + 3-wide window max.

    x_ref: (1, Tin, Cin) f32, w_ref: (K*Cin, tc) bf16, b_ref: (1, tc) f32,
    o_ref: (1, Tin, tc) f32  (full-rate window max; decimated by the wrapper).
    """
    x = x_ref[0]                                                     # (Tin, Cin) f32
    tin, cin = x.shape
    xb = x.astype(jnp.bfloat16)
    xpad = jnp.concatenate(
        [jnp.zeros((P, cin), jnp.bfloat16), xb,
         jnp.zeros((K - 1 - P, cin), jnp.bfloat16)], axis=0)         # (Tin+K-1, Cin)

    # Shifted-tap stack: stack[t, k*Cin + c] = x[t + k - P, c]  ->  one deep matmul.
    stack = jnp.concatenate([xpad[k:k + tin, :] for k in range(K)], axis=1)
    y = jnp.dot(stack, w_ref[...], preferred_element_type=jnp.float32)   # (Tin, tc)
    y = jnp.maximum(y + b_ref[...], 0.0)                                 # ReLU

    # MaxPool window of 3 (zero padding == -inf padding because y >= 0 post-ReLU).
    zrow = jnp.zeros((1, y.shape[1]), jnp.float32)
    left = jnp.concatenate([zrow, y[:tin - 1, :]], axis=0)           # y[t-1]
    right = jnp.concatenate([y[1:, :], zrow], axis=0)                # y[t+1]
    o_ref[0] = jnp.maximum(jnp.maximum(left, y), right)


# --------------------------------------------------------------------------
# pallas_call wrappers
# --------------------------------------------------------------------------
def _conv1(x, w, b):
    B, T, n_mels = x.shape
    c1 = w.shape[1]
    return pl.pallas_call(
        _conv1_kernel,
        out_shape=jax.ShapeDtypeStruct((B, T, c1), jnp.float32),
        grid_spec=pltpu.PrefetchScalarGridSpec(
            num_scalar_prefetch=0,
            grid=(B,),
            in_specs=[
                pl.BlockSpec((1, T, n_mels), lambda bi: (bi, 0, 0)),
                pl.BlockSpec((n_mels, c1), lambda bi: (0, 0)),
                pl.BlockSpec((1, c1), lambda bi: (0, 0)),
            ],
            out_specs=pl.BlockSpec((1, T, c1), lambda bi: (bi, 0, 0)),
        ),
        compiler_params=pltpu.CompilerParams(
            dimension_semantics=("parallel",),
            vmem_limit_bytes=_VMEM_LIMIT),
    )(x, w, b)


def _cout_tile(cout):
    if cout % 256 == 0:
        return 256
    if cout % 128 == 0:
        return 128
    return cout


def _conv_relu_wmax(x, w, b, K):
    B, tin, cin = x.shape
    kc, cout = w.shape
    assert kc == K * cin
    tc = _cout_tile(cout)
    n_ct = cout // tc
    kern = functools.partial(_conv_relu_wmax_kernel, K=K, P=K // 2)
    return pl.pallas_call(
        kern,
        out_shape=jax.ShapeDtypeStruct((B, tin, cout), jnp.float32),
        grid_spec=pltpu.PrefetchScalarGridSpec(
            num_scalar_prefetch=0,
            grid=(B, n_ct),
            in_specs=[
                pl.BlockSpec((1, tin, cin), lambda bi, j: (bi, 0, 0)),
                pl.BlockSpec((kc, tc), lambda bi, j: (0, j)),
                pl.BlockSpec((1, tc), lambda bi, j: (0, j)),
            ],
            out_specs=pl.BlockSpec((1, tin, tc), lambda bi, j: (bi, 0, j)),
        ),
        compiler_params=pltpu.CompilerParams(
            dimension_semantics=("parallel", "parallel"),
            vmem_limit_bytes=_VMEM_LIMIT),
    )(x, w, b)


# --------------------------------------------------------------------------
# Forward pass
# --------------------------------------------------------------------------
def davenet_forward(x, params):
    """x: (B, 40, T) float32 — PyTorch (B, 1, 40, T) with the channel dim squeezed."""
    B, n_mels, T = x.shape
    assert T % 16 == 0, "input length must be divisible by 16 (4 stride-2 pools)"

    # BatchNorm2d(1), training-mode batch statistics over (N, H, W); exact fold
    # into conv1 (single BN channel => scalar scale/shift).
    # TODO(synk): for inference parity with a trained model use running stats here.
    eps = 1e-5
    mean = jnp.mean(x)
    var = jnp.mean((x - mean) ** 2)
    scale = params["bn_gamma"] / jnp.sqrt(var + eps)
    shift = params["bn_beta"] - mean * scale
    w1 = params["w1"]                                             # (n_mels, C1) f32
    w1_folded = (w1 * scale).astype(jnp.bfloat16)
    b1_folded = params["b1"] + shift * jnp.sum(w1, axis=0, keepdims=True)

    xt = jnp.transpose(x, (0, 2, 1))                              # (B, T, n_mels)

    y = _conv1(xt, w1_folded, b1_folded)                          # (B, T, C1)

    for name, K in (("2", 11), ("3", 17), ("4", 17), ("5", 17)):
        m = _conv_relu_wmax(y, params["w" + name], params["b" + name], K)
        # TODO(synk): the stride-2 time subsample of the pool is XLA glue; an
        # in-kernel strided sublane load would avoid the full-rate writeback.
        y = m[:, ::2, :]                                          # (B, T_l/2, Cout)

    # PyTorch: x.squeeze(2) -> (B, emb, T/16); transpose back from (B, T/16, emb).
    return jnp.transpose(y, (0, 2, 1))


# --------------------------------------------------------------------------
# Parameters (deterministic synthetic, laid out for the kernels)
# --------------------------------------------------------------------------
def init_params(key, cfg):
    c1, c2, c3, c4, emb = cfg["c1"], cfg["c2"], cfg["c3"], cfg["c4"], cfg["emb"]
    n_mels = cfg["n_mels"]
    ks = jax.random.split(key, 10)
    s = 0.05

    def rnd(k, shape):
        return s * jax.random.normal(k, shape, jnp.float32)

    def conv_w(k, cout, cin, kw):
        # Draw in PyTorch layout (Cout, Cin, 1, K), re-lay-out to (K*Cin, Cout)
        # so that flat[k*Cin + ci, co] == w[co, ci, 0, k]; store bf16 for the MXU.
        wt = rnd(k, (cout, cin, 1, kw))
        flat = jnp.transpose(wt[:, :, 0, :], (2, 1, 0)).reshape(kw * cin, cout)
        return flat.astype(jnp.bfloat16)

    w1_t = rnd(ks[0], (c1, 1, n_mels, 1))                         # PyTorch (C1,1,40,1)
    return {
        "bn_gamma": jnp.float32(1.0),   # nn.BatchNorm2d default affine init
        "bn_beta": jnp.float32(0.0),
        "w1": jnp.transpose(w1_t[:, 0, :, 0]),                    # (n_mels, C1) f32
        "b1": rnd(ks[5], (1, c1)),
        "w2": conv_w(ks[1], c2, c1, 11),
        "b2": rnd(ks[6], (1, c2)),
        "w3": conv_w(ks[2], c3, c2, 17),
        "b3": rnd(ks[7], (1, c3)),
        "w4": conv_w(ks[3], c4, c3, 17),
        "b4": rnd(ks[8], (1, c4)),
        "w5": conv_w(ks[4], emb, c4, 17),
        "b5": rnd(ks[9], (1, emb)),
    }


if __name__ == "__main__":
    # Small demo config consistent with the module structure
    # (real defaults: channels 128/256/512/512, embedding_dim=1024, T=2048).
    cfg = dict(B=2, n_mels=40, T=64, c1=32, c2=32, c3=64, c4=64, emb=32)

    key = jax.random.PRNGKey(0)
    kx, kp = jax.random.split(key)
    x = jax.random.normal(kx, (cfg["B"], cfg["n_mels"], cfg["T"]), jnp.float32)
    params = init_params(kp, cfg)

    fwd = jax.jit(davenet_forward)
    out = jax.block_until_ready(fwd(x, params))
    assert out.shape == (cfg["B"], cfg["emb"], cfg["T"] // 16), out.shape
    assert bool(jnp.all(jnp.isfinite(out)))
    print("KERNEL_OK")
</pallas_src>

<mosaic_0001>
module attributes {stable_mosaic.version = 11 : i64} {
  func.func @_conv1_kernel(%arg0: i32, %arg1: memref<1x64x40xf32, #tpu.memory_space<vmem>>, %arg2: memref<40x32xbf16, #tpu.memory_space<vmem>>, %arg3: memref<1x32xf32, #tpu.memory_space<vmem>>, %arg4: memref<1x64x32xf32, #tpu.memory_space<vmem>>) attributes {dimension_semantics = [#tpu.dimension_semantics<parallel>], iteration_bounds = array<i64: 2>, scalar_prefetch = 0 : i64, scratch_operands = 0 : i64, tpu.core_type = #tpu.core_type<tc>, window_params = [{transform_indices = @transform_0, window_bounds = array<i64: 1, 64, 40>}, {pipeline_mode = #tpu.pipeline_mode<synchronous>, transform_indices = @transform_1, window_bounds = array<i64: 40, 32>}, {pipeline_mode = #tpu.pipeline_mode<synchronous>, transform_indices = @transform_2, window_bounds = array<i64: 1, 32>}, {transform_indices = @transform_3, window_bounds = array<i64: 1, 64, 32>}]} {
    %c0 = arith.constant 0 : index
    %c0_0 = arith.constant 0 : index
    %c0_1 = arith.constant 0 : index
    %0 = vector.load %arg1[%c0, %c0_0, %c0_1] : memref<1x64x40xf32, #tpu.memory_space<vmem>>, vector<1x64x40xf32>
    %1 = vector.shape_cast %0 : vector<1x64x40xf32> to vector<64x40xf32>
    %2 = arith.truncf %1 : vector<64x40xf32> to vector<64x40xbf16>
    %c0_2 = arith.constant 0 : index
    %c0_3 = arith.constant 0 : index
    %3 = vector.load %arg2[%c0_2, %c0_3] : memref<40x32xbf16, #tpu.memory_space<vmem>>, vector<40x32xbf16>
    %cst = arith.constant dense<0.000000e+00> : vector<64x32xf32>
    %4 = tpu.matmul %2, %3, %cst {dimension_numbers = #tpu.dot_dimension_numbers<[1], [0], [0], [1], [0, 0, 1, 1], [], []>} : vector<64x40xbf16>, vector<40x32xbf16>, vector<64x32xf32> -> vector<64x32xf32>
    %c0_4 = arith.constant 0 : index
    %c0_5 = arith.constant 0 : index
    %5 = vector.load %arg3[%c0_4, %c0_5] : memref<1x32xf32, #tpu.memory_space<vmem>>, vector<1x32xf32>
    %6 = vector.broadcast %5 : vector<1x32xf32> to vector<64x32xf32>
    %7 = arith.addf %4, %6 : vector<64x32xf32>
    %cst_6 = arith.constant 0.000000e+00 : f32
    %8 = vector.broadcast %cst_6 : f32 to vector<64x32xf32>
    %9 = arith.maximumf %7, %8 : vector<64x32xf32>
    %c0_7 = arith.constant 0 : index
    %c0_8 = arith.constant 0 : index
    %c0_9 = arith.constant 0 : index
    %10 = vector.load %arg4[%c0_7, %c0_8, %c0_9] : memref<1x64x32xf32, #tpu.memory_space<vmem>>, vector<1x64x32xf32>
    %11 = vector.shape_cast %10 : vector<1x64x32xf32> to vector<64x32xf32>
    %12 = vector.shape_cast %9 : vector<64x32xf32> to vector<1x64x32xf32>
    tpu.vector_store %arg4[%c0_7, %c0_8, %c0_9], %12 {strides = array<i32>} : memref<1x64x32xf32, #tpu.memory_space<vmem>>, vector<1x64x32xf32>,
    return
  }
  func.func @transform_0(%arg0: i32) -> (i32, i32, i32) {
    %c0_i32 = arith.constant 0 : i32
    %c0_i32_0 = arith.constant 0 : i32
    %c0_i32_1 = arith.constant 0 : i32
    return %arg0, %c0_i32, %c0_i32_0 : i32, i32, i32
  }
  func.func @transform_1(%arg0: i32) -> (i32, i32) {
    %c0_i32 = arith.constant 0 : i32
    %c0_i32_0 = arith.constant 0 : i32
    %c0_i32_1 = arith.constant 0 : i32
    return %c0_i32, %c0_i32_0 : i32, i32
  }
  func.func @transform_2(%arg0: i32) -> (i32, i32) {
    %c0_i32 = arith.constant 0 : i32
    %c0_i32_0 = arith.constant 0 : i32
    %c0_i32_1 = arith.constant 0 : i32
    return %c0_i32, %c0_i32_0 : i32, i32
  }
  func.func @transform_3(%arg0: i32) -> (i32, i32, i32) {
    %c0_i32 = arith.constant 0 : i32
    %c0_i32_0 = arith.constant 0 : i32
    %c0_i32_1 = arith.constant 0 : i32
    return %arg0, %c0_i32, %c0_i32_0 : i32, i32, i32
  }
}

module attributes {stable_mosaic.version = 11 : i64} {
  func.func @_conv_relu_wmax_kernel(%arg0: i32, %arg1: i32, %arg2: memref<1x64x32xf32, #tpu.memory_space<vmem>>, %arg3: memref<352x32xbf16, #tpu.memory_space<vmem>>, %arg4: memref<1x32xf32, #tpu.memory_space<vmem>>, %arg5: memref<1x64x32xf32, #tpu.memory_space<vmem>>) attributes {dimension_semantics = [#tpu.dimension_semantics<parallel>, #tpu.dimension_semantics<parallel>], iteration_bounds = array<i64: 2, 1>, scalar_prefetch = 0 : i64, scratch_operands = 0 : i64, tpu.core_type = #tpu.core_type<tc>, window_params = [{transform_indices = @transform_0, window_bounds = array<i64: 1, 64, 32>}, {transform_indices = @transform_1, window_bounds = array<i64: 352, 32>}, {transform_indices = @transform_2, window_bounds = array<i64: 1, 32>}, {transform_indices = @transform_3, window_bounds = array<i64: 1, 64, 32>}]} {
    %c0 = arith.constant 0 : index
    %c0_0 = arith.constant 0 : index
    %c0_1 = arith.constant 0 : index
    %0 = vector.load %arg2[%c0, %c0_0, %c0_1] : memref<1x64x32xf32, #tpu.memory_space<vmem>>, vector<1x64x32xf32>
    %1 = vector.shape_cast %0 : vector<1x64x32xf32> to vector<64x32xf32>
    %2 = arith.truncf %1 : vector<64x32xf32> to vector<64x32xbf16>
    %cst = arith.constant 0.000000e+00 : bf16
    %3 = vector.broadcast %cst : bf16 to vector<5x32xbf16>
    %cst_2 = arith.constant 0.000000e+00 : bf16
    %4 = vector.broadcast %cst_2 : bf16 to vector<5x32xbf16>
    %5 = tpu.concatenate %3, %2, %4 in 0 : vector<5x32xbf16>, vector<64x32xbf16>, vector<5x32xbf16> -> vector<74x32xbf16>
    %6 = vector.extract_strided_slice %5 {offsets = [0, 0], sizes = [64, 32], strides = [1, 1]} : vector<74x32xbf16> to vector<64x32xbf16>
    %7 = vector.extract_strided_slice %5 {offsets = [1, 0], sizes = [64, 32], strides = [1, 1]} : vector<74x32xbf16> to vector<64x32xbf16>
    %8 = vector.extract_strided_slice %5 {offsets = [2, 0], sizes = [64, 32], strides = [1, 1]} : vector<74x32xbf16> to vector<64x32xbf16>
    %9 = vector.extract_strided_slice %5 {offsets = [3, 0], sizes = [64, 32], strides = [1, 1]} : vector<74x32xbf16> to vector<64x32xbf16>
    %10 = vector.extract_strided_slice %5 {offsets = [4, 0], sizes = [64, 32], strides = [1, 1]} : vector<74x32xbf16> to vector<64x32xbf16>
    %11 = vector.extract_strided_slice %5 {offsets = [5, 0], sizes = [64, 32], strides = [1, 1]} : vector<74x32xbf16> to vector<64x32xbf16>
    %12 = vector.extract_strided_slice %5 {offsets = [6, 0], sizes = [64, 32], strides = [1, 1]} : vector<74x32xbf16> to vector<64x32xbf16>
    %13 = vector.extract_strided_slice %5 {offsets = [7, 0], sizes = [64, 32], strides = [1, 1]} : vector<74x32xbf16> to vector<64x32xbf16>
    %14 = vector.extract_strided_slice %5 {offsets = [8, 0], sizes = [64, 32], strides = [1, 1]} : vector<74x32xbf16> to vector<64x32xbf16>
    %15 = vector.extract_strided_slice %5 {offsets = [9, 0], sizes = [64, 32], strides = [1, 1]} : vector<74x32xbf16> to vector<64x32xbf16>
    %16 = vector.extract_strided_slice %5 {offsets = [10, 0], sizes = [64, 32], strides = [1, 1]} : vector<74x32xbf16> to vector<64x32xbf16>
    %17 = tpu.concatenate %6, %7, %8, %9, %10, %11, %12, %13, %14, %15, %16 in 1 : vector<64x32xbf16>, vector<64x32xbf16>, vector<64x32xbf16>, vector<64x32xbf16>, vector<64x32xbf16>, vector<64x32xbf16>, vector<64x32xbf16>, vector<64x32xbf16>, vector<64x32xbf16>, vector<64x32xbf16>, vector<64x32xbf16> -> vector<64x352xbf16>
    %c0_3 = arith.constant 0 : index
    %c0_4 = arith.constant 0 : index
    %18 = vector.load %arg3[%c0_3, %c0_4] : memref<352x32xbf16, #tpu.memory_space<vmem>>, vector<352x32xbf16>
    %cst_5 = arith.constant dense<0.000000e+00> : vector<64x32xf32>
    %19 = tpu.matmul %17, %18, %cst_5 {dimension_numbers = #tpu.dot_dimension_numbers<[1], [0], [0], [1], [0, 0, 1, 1], [], []>} : vector<64x352xbf16>, vector<352x32xbf16>, vector<64x32xf32> -> vector<64x32xf32>
    %c0_6 = arith.constant 0 : index
    %c0_7 = arith.constant 0 : index
    %20 = vector.load %arg4[%c0_6, %c0_7] : memref<1x32xf32, #tpu.memory_space<vmem>>, vector<1x32xf32>
    %21 = vector.broadcast %20 : vector<1x32xf32> to vector<64x32xf32>
    %22 = arith.addf %19, %21 : vector<64x32xf32>
    %cst_8 = arith.constant 0.000000e+00 : f32
    %23 = vector.broadcast %cst_8 : f32 to vector<64x32xf32>
    %24 = arith.maximumf %22, %23 : vector<64x32xf32>
    %cst_9 = arith.constant 0.000000e+00 : f32
    %25 = vector.broadcast %cst_9 : f32 to vector<1x32xf32>
    %26 = vector.extract_strided_slice %24 {offsets = [0, 0], sizes = [63, 32], strides = [1, 1]} : vector<64x32xf32> to vector<63x32xf32>
    %27 = tpu.concatenate %25, %26 in 0 : vector<1x32xf32>, vector<63x32xf32> -> vector<64x32xf32>
    %28 = vector.extract_strided_slice %24 {offsets = [1, 0], sizes = [63, 32], strides = [1, 1]} : vector<64x32xf32> to vector<63x32xf32>
    %29 = tpu.concatenate %28, %25 in 0 : vector<63x32xf32>, vector<1x32xf32> -> vector<64x32xf32>
    %30 = arith.maximumf %27, %24 : vector<64x32xf32>
    %31 = arith.maximumf %30, %29 : vector<64x32xf32>
    %c0_10 = arith.constant 0 : index
    %c0_11 = arith.constant 0 : index
    %c0_12 = arith.constant 0 : index
    %32 = vector.load %arg5[%c0_10, %c0_11, %c0_12] : memref<1x64x32xf32, #tpu.memory_space<vmem>>, vector<1x64x32xf32>
    %33 = vector.shape_cast %32 : vector<1x64x32xf32> to vector<64x32xf32>
    %34 = vector.shape_cast %31 : vector<64x32xf32> to vector<1x64x32xf32>
    tpu.vector_store %arg5[%c0_10, %c0_11, %c0_12], %34 {strides = array<i32>} : memref<1x64x32xf32, #tpu.memory_space<vmem>>, vector<1x64x32xf32>,
    return
  }
  func.func @transform_0(%arg0: i32, %arg1: i32) -> (i32, i32, i32) {
    %c0_i32 = arith.constant 0 : i32
    %c0_i32_0 = arith.constant 0 : i32
    %c0_i32_1 = arith.constant 0 : i32
    return %arg0, %c0_i32, %c0_i32_0 : i32, i32, i32
  }
  func.func @transform_1(%arg0: i32, %arg1: i32) -> (i32, i32) {
    %c0_i32 = arith.constant 0 : i32
    %c0_i32_0 = arith.constant 0 : i32
    return %c0_i32, %arg1 : i32, i32
  }
  func.func @transform_2(%arg0: i32, %arg1: i32) -> (i32, i32) {
    %c0_i32 = arith.constant 0 : i32
    %c0_i32_0 = arith.constant 0 : i32
    return %c0_i32, %arg1 : i32, i32
  }
  func.func @transform_3(%arg0: i32, %arg1: i32) -> (i32, i32, i32) {
    %c0_i32 = arith.constant 0 : i32
    %c0_i32_0 = arith.constant 0 : i32
    return %arg0, %c0_i32, %arg1 : i32, i32, i32
  }
}

module attributes {stable_mosaic.version = 11 : i64} {
  func.func @_conv_relu_wmax_kernel(%arg0: i32, %arg1: i32, %arg2: memref<1x32x32xf32, #tpu.memory_space<vmem>>, %arg3: memref<544x64xbf16, #tpu.memory_space<vmem>>, %arg4: memref<1x64xf32, #tpu.memory_space<vmem>>, %arg5: memref<1x32x64xf32, #tpu.memory_space<vmem>>) attributes {dimension_semantics = [#tpu.dimension_semantics<parallel>, #tpu.dimension_semantics<parallel>], iteration_bounds = array<i64: 2, 1>, scalar_prefetch = 0 : i64, scratch_operands = 0 : i64, tpu.core_type = #tpu.core_type<tc>, window_params = [{transform_indices = @transform_0, window_bounds = array<i64: 1, 32, 32>}, {transform_indices = @transform_1, window_bounds = array<i64: 544, 64>}, {transform_indices = @transform_2, window_bounds = array<i64: 1, 64>}, {transform_indices = @transform_3, window_bounds = array<i64: 1, 32, 64>}]} {
    %c0 = arith.constant 0 : index
    %c0_0 = arith.constant 0 : index
    %c0_1 = arith.constant 0 : index
    %0 = vector.load %arg2[%c0, %c0_0, %c0_1] : memref<1x32x32xf32, #tpu.memory_space<vmem>>, vector<1x32x32xf32>
    %1 = vector.shape_cast %0 : vector<1x32x32xf32> to vector<32x32xf32>
    %2 = arith.truncf %1 : vector<32x32xf32> to vector<32x32xbf16>
    %cst = arith.constant 0.000000e+00 : bf16
    %3 = vector.broadcast %cst : bf16 to vector<8x32xbf16>
    %cst_2 = arith.constant 0.000000e+00 : bf16
    %4 = vector.broadcast %cst_2 : bf16 to vector<8x32xbf16>
    %5 = tpu.concatenate %3, %2, %4 in 0 : vector<8x32xbf16>, vector<32x32xbf16>, vector<8x32xbf16> -> vector<48x32xbf16>
    %6 = vector.extract_strided_slice %5 {offsets = [0, 0], sizes = [32, 32], strides = [1, 1]} : vector<48x32xbf16> to vector<32x32xbf16>
    %7 = vector.extract_strided_slice %5 {offsets = [1, 0], sizes = [32, 32], strides = [1, 1]} : vector<48x32xbf16> to vector<32x32xbf16>
    %8 = vector.extract_strided_slice %5 {offsets = [2, 0], sizes = [32, 32], strides = [1, 1]} : vector<48x32xbf16> to vector<32x32xbf16>
    %9 = vector.extract_strided_slice %5 {offsets = [3, 0], sizes = [32, 32], strides = [1, 1]} : vector<48x32xbf16> to vector<32x32xbf16>
    %10 = vector.extract_strided_slice %5 {offsets = [4, 0], sizes = [32, 32], strides = [1, 1]} : vector<48x32xbf16> to vector<32x32xbf16>
    %11 = vector.extract_strided_slice %5 {offsets = [5, 0], sizes = [32, 32], strides = [1, 1]} : vector<48x32xbf16> to vector<32x32xbf16>
    %12 = vector.extract_strided_slice %5 {offsets = [6, 0], sizes = [32, 32], strides = [1, 1]} : vector<48x32xbf16> to vector<32x32xbf16>
    %13 = vector.extract_strided_slice %5 {offsets = [7, 0], sizes = [32, 32], strides = [1, 1]} : vector<48x32xbf16> to vector<32x32xbf16>
    %14 = vector.extract_strided_slice %5 {offsets = [8, 0], sizes = [32, 32], strides = [1, 1]} : vector<48x32xbf16> to vector<32x32xbf16>
    %15 = vector.extract_strided_slice %5 {offsets = [9, 0], sizes = [32, 32], strides = [1, 1]} : vector<48x32xbf16> to vector<32x32xbf16>
    %16 = vector.extract_strided_slice %5 {offsets = [10, 0], sizes = [32, 32], strides = [1, 1]} : vector<48x32xbf16> to vector<32x32xbf16>
    %17 = vector.extract_strided_slice %5 {offsets = [11, 0], sizes = [32, 32], strides = [1, 1]} : vector<48x32xbf16> to vector<32x32xbf16>
    %18 = vector.extract_strided_slice %5 {offsets = [12, 0], sizes = [32, 32], strides = [1, 1]} : vector<48x32xbf16> to vector<32x32xbf16>
    %19 = vector.extract_strided_slice %5 {offsets = [13, 0], sizes = [32, 32], strides = [1, 1]} : vector<48x32xbf16> to vector<32x32xbf16>
    %20 = vector.extract_strided_slice %5 {offsets = [14, 0], sizes = [32, 32], strides = [1, 1]} : vector<48x32xbf16> to vector<32x32xbf16>
    %21 = vector.extract_strided_slice %5 {offsets = [15, 0], sizes = [32, 32], strides = [1, 1]} : vector<48x32xbf16> to vector<32x32xbf16>
    %22 = vector.extract_strided_slice %5 {offsets = [16, 0], sizes = [32, 32], strides = [1, 1]} : vector<48x32xbf16> to vector<32x32xbf16>
    %23 = tpu.concatenate %6, %7, %8, %9, %10, %11, %12, %13, %14, %15, %16, %17, %18, %19, %20, %21 in 1 : vector<32x32xbf16>, vector<32x32xbf16>, vector<32x32xbf16>, vector<32x32xbf16>, vector<32x32xbf16>, vector<32x32xbf16>, vector<32x32xbf16>, vector<32x32xbf16>, vector<32x32xbf16>, vector<32x32xbf16>, vector<32x32xbf16>, vector<32x32xbf16>, vector<32x32xbf16>, vector<32x32xbf16>, vector<32x32xbf16>, vector<32x32xbf16> -> vector<32x512xbf16>
    %24 = tpu.concatenate %23, %22 in 1 : vector<32x512xbf16>, vector<32x32xbf16> -> vector<32x544xbf16>
    %c0_3 = arith.constant 0 : index
    %c0_4 = arith.constant 0 : index
    %25 = vector.load %arg3[%c0_3, %c0_4] : memref<544x64xbf16, #tpu.memory_space<vmem>>, vector<544x64xbf16>
    %cst_5 = arith.constant dense<0.000000e+00> : vector<32x64xf32>
    %26 = tpu.matmul %24, %25, %cst_5 {dimension_numbers = #tpu.dot_dimension_numbers<[1], [0], [0], [1], [0, 0, 1, 1], [], []>} : vector<32x544xbf16>, vector<544x64xbf16>, vector<32x64xf32> -> vector<32x64xf32>
    %c0_6 = arith.constant 0 : index
    %c0_7 = arith.constant 0 : index
    %27 = vector.load %arg4[%c0_6, %c0_7] : memref<1x64xf32, #tpu.memory_space<vmem>>, vector<1x64xf32>
    %28 = vector.broadcast %27 : vector<1x64xf32> to vector<32x64xf32>
    %29 = arith.addf %26, %28 : vector<32x64xf32>
    %cst_8 = arith.constant 0.000000e+00 : f32
    %30 = vector.broadcast %cst_8 : f32 to vector<32x64xf32>
    %31 = arith.maximumf %29, %30 : vector<32x64xf32>
    %cst_9 = arith.constant 0.000000e+00 : f32
    %32 = vector.broadcast %cst_9 : f32 to vector<1x64xf32>
    %33 = vector.extract_strided_slice %31 {offsets = [0, 0], sizes = [31, 64], strides = [1, 1]} : vector<32x64xf32> to vector<31x64xf32>
    %34 = tpu.concatenate %32, %33 in 0 : vector<1x64xf32>, vector<31x64xf32> -> vector<32x64xf32>
    %35 = vector.extract_strided_slice %31 {offsets = [1, 0], sizes = [31, 64], strides = [1, 1]} : vector<32x64xf32> to vector<31x64xf32>
    %36 = tpu.concatenate %35, %32 in 0 : vector<31x64xf32>, vector<1x64xf32> -> vector<32x64xf32>
    %37 = arith.maximumf %34, %31 : vector<32x64xf32>
    %38 = arith.maximumf %37, %36 : vector<32x64xf32>
    %c0_10 = arith.constant 0 : index
    %c0_11 = arith.constant 0 : index
    %c0_12 = arith.constant 0 : index
    %39 = vector.load %arg5[%c0_10, %c0_11, %c0_12] : memref<1x32x64xf32, #tpu.memory_space<vmem>>, vector<1x32x64xf32>
    %40 = vector.shape_cast %39 : vector<1x32x64xf32> to vector<32x64xf32>
    %41 = vector.shape_cast %38 : vector<32x64xf32> to vector<1x32x64xf32>
    tpu.vector_store %arg5[%c0_10, %c0_11, %c0_12], %41 {strides = array<i32>} : memref<1x32x64xf32, #tpu.memory_space<vmem>>, vector<1x32x64xf32>,
    return
  }
  func.func @transform_0(%arg0: i32, %arg1: i32) -> (i32, i32, i32) {
    %c0_i32 = arith.constant 0 : i32
    %c0_i32_0 = arith.constant 0 : i32
    %c0_i32_1 = arith.constant 0 : i32
    return %arg0, %c0_i32, %c0_i32_0 : i32, i32, i32
  }
  func.func @transform_1(%arg0: i32, %arg1: i32) -> (i32, i32) {
    %c0_i32 = arith.constant 0 : i32
    %c0_i32_0 = arith.constant 0 : i32
    return %c0_i32, %arg1 : i32, i32
  }
  func.func @transform_2(%arg0: i32, %arg1: i32) -> (i32, i32) {
    %c0_i32 = arith.constant 0 : i32
    %c0_i32_0 = arith.constant 0 : i32
    return %c0_i32, %arg1 : i32, i32
  }
  func.func @transform_3(%arg0: i32, %arg1: i32) -> (i32, i32, i32) {
    %c0_i32 = arith.constant 0 : i32
    %c0_i32_0 = arith.constant 0 : i32
    return %arg0, %c0_i32, %arg1 : i32, i32, i32
  }
}

module attributes {stable_mosaic.version = 11 : i64} {
  func.func @_conv_relu_wmax_kernel(%arg0: i32, %arg1: i32, %arg2: memref<1x16x64xf32, #tpu.memory_space<vmem>>, %arg3: memref<1088x64xbf16, #tpu.memory_space<vmem>>, %arg4: memref<1x64xf32, #tpu.memory_space<vmem>>, %arg5: memref<1x16x64xf32, #tpu.memory_space<vmem>>) attributes {dimension_semantics = [#tpu.dimension_semantics<parallel>, #tpu.dimension_semantics<parallel>], iteration_bounds = array<i64: 2, 1>, scalar_prefetch = 0 : i64, scratch_operands = 0 : i64, tpu.core_type = #tpu.core_type<tc>, window_params = [{transform_indices = @transform_0, window_bounds = array<i64: 1, 16, 64>}, {transform_indices = @transform_1, window_bounds = array<i64: 1088, 64>}, {transform_indices = @transform_2, window_bounds = array<i64: 1, 64>}, {transform_indices = @transform_3, window_bounds = array<i64: 1, 16, 64>}]} {
    %c0 = arith.constant 0 : index
    %c0_0 = arith.constant 0 : index
    %c0_1 = arith.constant 0 : index
    %0 = vector.load %arg2[%c0, %c0_0, %c0_1] : memref<1x16x64xf32, #tpu.memory_space<vmem>>, vector<1x16x64xf32>
    %1 = vector.shape_cast %0 : vector<1x16x64xf32> to vector<16x64xf32>
    %2 = arith.truncf %1 : vector<16x64xf32> to vector<16x64xbf16>
    %cst = arith.constant 0.000000e+00 : bf16
    %3 = vector.broadcast %cst : bf16 to vector<8x64xbf16>
    %cst_2 = arith.constant 0.000000e+00 : bf16
    %4 = vector.broadcast %cst_2 : bf16 to vector<8x64xbf16>
    %5 = tpu.concatenate %3, %2, %4 in 0 : vector<8x64xbf16>, vector<16x64xbf16>, vector<8x64xbf16> -> vector<32x64xbf16>
    %6 = vector.extract_strided_slice %5 {offsets = [0, 0], sizes = [16, 64], strides = [1, 1]} : vector<32x64xbf16> to vector<16x64xbf16>
    %7 = vector.extract_strided_slice %5 {offsets = [1, 0], sizes = [16, 64], strides = [1, 1]} : vector<32x64xbf16> to vector<16x64xbf16>
    %8 = vector.extract_strided_slice %5 {offsets = [2, 0], sizes = [16, 64], strides = [1, 1]} : vector<32x64xbf16> to vector<16x64xbf16>
    %9 = vector.extract_strided_slice %5 {offsets = [3, 0], sizes = [16, 64], strides = [1, 1]} : vector<32x64xbf16> to vector<16x64xbf16>
    %10 = vector.extract_strided_slice %5 {offsets = [4, 0], sizes = [16, 64], strides = [1, 1]} : vector<32x64xbf16> to vector<16x64xbf16>
    %11 = vector.extract_strided_slice %5 {offsets = [5, 0], sizes = [16, 64], strides = [1, 1]} : vector<32x64xbf16> to vector<16x64xbf16>
    %12 = vector.extract_strided_slice %5 {offsets = [6, 0], sizes = [16, 64], strides = [1, 1]} : vector<32x64xbf16> to vector<16x64xbf16>
    %13 = vector.extract_strided_slice %5 {offsets = [7, 0], sizes = [16, 64], strides = [1, 1]} : vector<32x64xbf16> to vector<16x64xbf16>
    %14 = vector.extract_strided_slice %5 {offsets = [8, 0], sizes = [16, 64], strides = [1, 1]} : vector<32x64xbf16> to vector<16x64xbf16>
    %15 = vector.extract_strided_slice %5 {offsets = [9, 0], sizes = [16, 64], strides = [1, 1]} : vector<32x64xbf16> to vector<16x64xbf16>
    %16 = vector.extract_strided_slice %5 {offsets = [10, 0], sizes = [16, 64], strides = [1, 1]} : vector<32x64xbf16> to vector<16x64xbf16>
    %17 = vector.extract_strided_slice %5 {offsets = [11, 0], sizes = [16, 64], strides = [1, 1]} : vector<32x64xbf16> to vector<16x64xbf16>
    %18 = vector.extract_strided_slice %5 {offsets = [12, 0], sizes = [16, 64], strides = [1, 1]} : vector<32x64xbf16> to vector<16x64xbf16>
    %19 = vector.extract_strided_slice %5 {offsets = [13, 0], sizes = [16, 64], strides = [1, 1]} : vector<32x64xbf16> to vector<16x64xbf16>
    %20 = vector.extract_strided_slice %5 {offsets = [14, 0], sizes = [16, 64], strides = [1, 1]} : vector<32x64xbf16> to vector<16x64xbf16>
    %21 = vector.extract_strided_slice %5 {offsets = [15, 0], sizes = [16, 64], strides = [1, 1]} : vector<32x64xbf16> to vector<16x64xbf16>
    %22 = vector.extract_strided_slice %5 {offsets = [16, 0], sizes = [16, 64], strides = [1, 1]} : vector<32x64xbf16> to vector<16x64xbf16>
    %23 = tpu.concatenate %6, %7, %8, %9, %10, %11, %12, %13, %14, %15, %16, %17, %18, %19, %20, %21 in 1 : vector<16x64xbf16>, vector<16x64xbf16>, vector<16x64xbf16>, vector<16x64xbf16>, vector<16x64xbf16>, vector<16x64xbf16>, vector<16x64xbf16>, vector<16x64xbf16>, vector<16x64xbf16>, vector<16x64xbf16>, vector<16x64xbf16>, vector<16x64xbf16>, vector<16x64xbf16>, vector<16x64xbf16>, vector<16x64xbf16>, vector<16x64xbf16> -> vector<16x1024xbf16>
    %24 = tpu.concatenate %23, %22 in 1 : vector<16x1024xbf16>, vector<16x64xbf16> -> vector<16x1088xbf16>
    %c0_3 = arith.constant 0 : index
    %c0_4 = arith.constant 0 : index
    %25 = vector.load %arg3[%c0_3, %c0_4] : memref<1088x64xbf16, #tpu.memory_space<vmem>>, vector<1088x64xbf16>
    %cst_5 = arith.constant dense<0.000000e+00> : vector<16x64xf32>
    %26 = tpu.matmul %24, %25, %cst_5 {dimension_numbers = #tpu.dot_dimension_numbers<[1], [0], [0], [1], [0, 0, 1, 1], [], []>} : vector<16x1088xbf16>, vector<1088x64xbf16>, vector<16x64xf32> -> vector<16x64xf32>
    %c0_6 = arith.constant 0 : index
    %c0_7 = arith.constant 0 : index
    %27 = vector.load %arg4[%c0_6, %c0_7] : memref<1x64xf32, #tpu.memory_space<vmem>>, vector<1x64xf32>
    %28 = vector.broadcast %27 : vector<1x64xf32> to vector<16x64xf32>
    %29 = arith.addf %26, %28 : vector<16x64xf32>
    %cst_8 = arith.constant 0.000000e+00 : f32
    %30 = vector.broadcast %cst_8 : f32 to vector<16x64xf32>
    %31 = arith.maximumf %29, %30 : vector<16x64xf32>
    %cst_9 = arith.constant 0.000000e+00 : f32
    %32 = vector.broadcast %cst_9 : f32 to vector<1x64xf32>
    %33 = vector.extract_strided_slice %31 {offsets = [0, 0], sizes = [15, 64], strides = [1, 1]} : vector<16x64xf32> to vector<15x64xf32>
    %34 = tpu.concatenate %32, %33 in 0 : vector<1x64xf32>, vector<15x64xf32> -> vector<16x64xf32>
    %35 = vector.extract_strided_slice %31 {offsets = [1, 0], sizes = [15, 64], strides = [1, 1]} : vector<16x64xf32> to vector<15x64xf32>
    %36 = tpu.concatenate %35, %32 in 0 : vector<15x64xf32>, vector<1x64xf32> -> vector<16x64xf32>
    %37 = arith.maximumf %34, %31 : vector<16x64xf32>
    %38 = arith.maximumf %37, %36 : vector<16x64xf32>
    %c0_10 = arith.constant 0 : index
    %c0_11 = arith.constant 0 : index
    %c0_12 = arith.constant 0 : index
    %39 = vector.load %arg5[%c0_10, %c0_11, %c0_12] : memref<1x16x64xf32, #tpu.memory_space<vmem>>, vector<1x16x64xf32>
    %40 = vector.shape_cast %39 : vector<1x16x64xf32> to vector<16x64xf32>
    %41 = vector.shape_cast %38 : vector<16x64xf32> to vector<1x16x64xf32>
    tpu.vector_store %arg5[%c0_10, %c0_11, %c0_12], %41 {strides = array<i32>} : memref<1x16x64xf32, #tpu.memory_space<vmem>>, vector<1x16x64xf32>,
    return
  }
  func.func @transform_0(%arg0: i32, %arg1: i32) -> (i32, i32, i32) {
    %c0_i32 = arith.constant 0 : i32
    %c0_i32_0 = arith.constant 0 : i32
    %c0_i32_1 = arith.constant 0 : i32
    return %arg0, %c0_i32, %c0_i32_0 : i32, i32, i32
  }
  func.func @transform_1(%arg0: i32, %arg1: i32) -> (i32, i32) {
    %c0_i32 = arith.constant 0 : i32
    %c0_i32_0 = arith.constant 0 : i32
    return %c0_i32, %arg1 : i32, i32
  }
  func.func @transform_2(%arg0: i32, %arg1: i32) -> (i32, i32) {
    %c0_i32 = arith.constant 0 : i32
    %c0_i32_0 = arith.constant 0 : i32
    return %c0_i32, %arg1 : i32, i32
  }
  func.func @transform_3(%arg0: i32, %arg1: i32) -> (i32, i32, i32) {
    %c0_i32 = arith.constant 0 : i32
    %c0_i32_0 = arith.constant 0 : i32
    return %arg0, %c0_i32, %arg1 : i32, i32, i32
  }
}

module attributes {stable_mosaic.version = 11 : i64} {
  func.func @_conv_relu_wmax_kernel(%arg0: i32, %arg1: i32, %arg2: memref<1x8x64xf32, #tpu.memory_space<vmem>>, %arg3: memref<1088x32xbf16, #tpu.memory_space<vmem>>, %arg4: memref<1x32xf32, #tpu.memory_space<vmem>>, %arg5: memref<1x8x32xf32, #tpu.memory_space<vmem>>) attributes {dimension_semantics = [#tpu.dimension_semantics<parallel>, #tpu.dimension_semantics<parallel>], iteration_bounds = array<i64: 2, 1>, scalar_prefetch = 0 : i64, scratch_operands = 0 : i64, tpu.core_type = #tpu.core_type<tc>, window_params = [{transform_indices = @transform_0, window_bounds = array<i64: 1, 8, 64>}, {transform_indices = @transform_1, window_bounds = array<i64: 1088, 32>}, {transform_indices = @transform_2, window_bounds = array<i64: 1, 32>}, {transform_indices = @transform_3, window_bounds = array<i64: 1, 8, 32>}]} {
    %c0 = arith.constant 0 : index
    %c0_0 = arith.constant 0 : index
    %c0_1 = arith.constant 0 : index
    %0 = vector.load %arg2[%c0, %c0_0, %c0_1] : memref<1x8x64xf32, #tpu.memory_space<vmem>>, vector<1x8x64xf32>
    %1 = vector.shape_cast %0 : vector<1x8x64xf32> to vector<8x64xf32>
    %2 = arith.truncf %1 : vector<8x64xf32> to vector<8x64xbf16>
    %cst = arith.constant 0.000000e+00 : bf16
    %3 = vector.broadcast %cst : bf16 to vector<8x64xbf16>
    %cst_2 = arith.constant 0.000000e+00 : bf16
    %4 = vector.broadcast %cst_2 : bf16 to vector<8x64xbf16>
    %5 = tpu.concatenate %3, %2, %4 in 0 : vector<8x64xbf16>, vector<8x64xbf16>, vector<8x64xbf16> -> vector<24x64xbf16>
    %6 = vector.extract_strided_slice %5 {offsets = [0, 0], sizes = [8, 64], strides = [1, 1]} : vector<24x64xbf16> to vector<8x64xbf16>
    %7 = vector.extract_strided_slice %5 {offsets = [1, 0], sizes = [8, 64], strides = [1, 1]} : vector<24x64xbf16> to vector<8x64xbf16>
    %8 = vector.extract_strided_slice %5 {offsets = [2, 0], sizes = [8, 64], strides = [1, 1]} : vector<24x64xbf16> to vector<8x64xbf16>
    %9 = vector.extract_strided_slice %5 {offsets = [3, 0], sizes = [8, 64], strides = [1, 1]} : vector<24x64xbf16> to vector<8x64xbf16>
    %10 = vector.extract_strided_slice %5 {offsets = [4, 0], sizes = [8, 64], strides = [1, 1]} : vector<24x64xbf16> to vector<8x64xbf16>
    %11 = vector.extract_strided_slice %5 {offsets = [5, 0], sizes = [8, 64], strides = [1, 1]} : vector<24x64xbf16> to vector<8x64xbf16>
    %12 = vector.extract_strided_slice %5 {offsets = [6, 0], sizes = [8, 64], strides = [1, 1]} : vector<24x64xbf16> to vector<8x64xbf16>
    %13 = vector.extract_strided_slice %5 {offsets = [7, 0], sizes = [8, 64], strides = [1, 1]} : vector<24x64xbf16> to vector<8x64xbf16>
    %14 = vector.extract_strided_slice %5 {offsets = [8, 0], sizes = [8, 64], strides = [1, 1]} : vector<24x64xbf16> to vector<8x64xbf16>
    %15 = vector.extract_strided_slice %5 {offsets = [9, 0], sizes = [8, 64], strides = [1, 1]} : vector<24x64xbf16> to vector<8x64xbf16>
    %16 = vector.extract_strided_slice %5 {offsets = [10, 0], sizes = [8, 64], strides = [1, 1]} : vector<24x64xbf16> to vector<8x64xbf16>
    %17 = vector.extract_strided_slice %5 {offsets = [11, 0], sizes = [8, 64], strides = [1, 1]} : vector<24x64xbf16> to vector<8x64xbf16>
    %18 = vector.extract_strided_slice %5 {offsets = [12, 0], sizes = [8, 64], strides = [1, 1]} : vector<24x64xbf16> to vector<8x64xbf16>
    %19 = vector.extract_strided_slice %5 {offsets = [13, 0], sizes = [8, 64], strides = [1, 1]} : vector<24x64xbf16> to vector<8x64xbf16>
    %20 = vector.extract_strided_slice %5 {offsets = [14, 0], sizes = [8, 64], strides = [1, 1]} : vector<24x64xbf16> to vector<8x64xbf16>
    %21 = vector.extract_strided_slice %5 {offsets = [15, 0], sizes = [8, 64], strides = [1, 1]} : vector<24x64xbf16> to vector<8x64xbf16>
    %22 = vector.extract_strided_slice %5 {offsets = [16, 0], sizes = [8, 64], strides = [1, 1]} : vector<24x64xbf16> to vector<8x64xbf16>
    %23 = tpu.concatenate %6, %7, %8, %9, %10, %11, %12, %13, %14, %15, %16, %17, %18, %19, %20, %21 in 1 : vector<8x64xbf16>, vector<8x64xbf16>, vector<8x64xbf16>, vector<8x64xbf16>, vector<8x64xbf16>, vector<8x64xbf16>, vector<8x64xbf16>, vector<8x64xbf16>, vector<8x64xbf16>, vector<8x64xbf16>, vector<8x64xbf16>, vector<8x64xbf16>, vector<8x64xbf16>, vector<8x64xbf16>, vector<8x64xbf16>, vector<8x64xbf16> -> vector<8x1024xbf16>
    %24 = tpu.concatenate %23, %22 in 1 : vector<8x1024xbf16>, vector<8x64xbf16> -> vector<8x1088xbf16>
    %c0_3 = arith.constant 0 : index
    %c0_4 = arith.constant 0 : index
    %25 = vector.load %arg3[%c0_3, %c0_4] : memref<1088x32xbf16, #tpu.memory_space<vmem>>, vector<1088x32xbf16>
    %cst_5 = arith.constant dense<0.000000e+00> : vector<8x32xf32>
    %26 = tpu.matmul %24, %25, %cst_5 {dimension_numbers = #tpu.dot_dimension_numbers<[1], [0], [0], [1], [0, 0, 1, 1], [], []>} : vector<8x1088xbf16>, vector<1088x32xbf16>, vector<8x32xf32> -> vector<8x32xf32>
    %c0_6 = arith.constant 0 : index
    %c0_7 = arith.constant 0 : index
    %27 = vector.load %arg4[%c0_6, %c0_7] : memref<1x32xf32, #tpu.memory_space<vmem>>, vector<1x32xf32>
    %28 = vector.broadcast %27 : vector<1x32xf32> to vector<8x32xf32>
    %29 = arith.addf %26, %28 : vector<8x32xf32>
    %cst_8 = arith.constant 0.000000e+00 : f32
    %30 = vector.broadcast %cst_8 : f32 to vector<8x32xf32>
    %31 = arith.maximumf %29, %30 : vector<8x32xf32>
    %cst_9 = arith.constant 0.000000e+00 : f32
    %32 = vector.broadcast %cst_9 : f32 to vector<1x32xf32>
    %33 = vector.extract_strided_slice %31 {offsets = [0, 0], sizes = [7, 32], strides = [1, 1]} : vector<8x32xf32> to vector<7x32xf32>
    %34 = tpu.concatenate %32, %33 in 0 : vector<1x32xf32>, vector<7x32xf32> -> vector<8x32xf32>
    %35 = vector.extract_strided_slice %31 {offsets = [1, 0], sizes = [7, 32], strides = [1, 1]} : vector<8x32xf32> to vector<7x32xf32>
    %36 = tpu.concatenate %35, %32 in 0 : vector<7x32xf32>, vector<1x32xf32> -> vector<8x32xf32>
    %37 = arith.maximumf %34, %31 : vector<8x32xf32>
    %38 = arith.maximumf %37, %36 : vector<8x32xf32>
    %c0_10 = arith.constant 0 : index
    %c0_11 = arith.constant 0 : index
    %c0_12 = arith.constant 0 : index
    %39 = vector.load %arg5[%c0_10, %c0_11, %c0_12] : memref<1x8x32xf32, #tpu.memory_space<vmem>>, vector<1x8x32xf32>
    %40 = vector.shape_cast %39 : vector<1x8x32xf32> to vector<8x32xf32>
    %41 = vector.shape_cast %38 : vector<8x32xf32> to vector<1x8x32xf32>
    tpu.vector_store %arg5[%c0_10, %c0_11, %c0_12], %41 {strides = array<i32>} : memref<1x8x32xf32, #tpu.memory_space<vmem>>, vector<1x8x32xf32>,
    return
  }
  func.func @transform_0(%arg0: i32, %arg1: i32) -> (i32, i32, i32) {
    %c0_i32 = arith.constant 0 : i32
    %c0_i32_0 = arith.constant 0 : i32
    %c0_i32_1 = arith.constant 0 : i32
    return %arg0, %c0_i32, %c0_i32_0 : i32, i32, i32
  }
  func.func @transform_1(%arg0: i32, %arg1: i32) -> (i32, i32) {
    %c0_i32 = arith.constant 0 : i32
    %c0_i32_0 = arith.constant 0 : i32
    return %c0_i32, %arg1 : i32, i32
  }
  func.func @transform_2(%arg0: i32, %arg1: i32) -> (i32, i32) {
    %c0_i32 = arith.constant 0 : i32
    %c0_i32_0 = arith.constant 0 : i32
    return %c0_i32, %arg1 : i32, i32
  }
  func.func @transform_3(%arg0: i32, %arg1: i32) -> (i32, i32, i32) {
    %c0_i32 = arith.constant 0 : i32
    %c0_i32_0 = arith.constant 0 : i32
    return %arg0, %c0_i32, %arg1 : i32, i32, i32
  }
}

</mosaic_0001>

<bundles_post_ra>
// kernel: davenet_forward.5
= control target key start
LH: loop header
LB: loop body
LE: loop exit
PB: predicated region body
PF: predicated region fallthrough
CT: control target
= control target key end

     0   :  { %s454_s12 = smov 0   ;;  %s502_s0 = inlined_call_operand.vmem [shape: f32[2,64,40], index: 0, kind: input, shape index: {}]   ;;  %s503_s1 = inlined_call_operand.vmem [shape: bf16[40,32], index: 1, kind: input, shape index: {}]   ;;  %s504_s2 = inlined_call_operand.vmem [shape: f32[1,32], index: 2, kind: input, shape index: {}]   ;;  %s505_s3 = inlined_call_operand.vmem [shape: f32[2,64,32], index: 3, kind: output, shape index: {}]  }
   0x1 LB: > { %s365_s13 = sadd.s32 4294967295, %s432_s12   ;;  %p369_p0 = scmp.ge.s32.totalorder %s432_s12, 1  ;;  %s432_s12 = sphi %s454_s12, %s13_s12  }
   0x2   : > { %p137_p1 = scmp.lt.s32.totalorder %s432_s12, 3 }
   0x4   : > { %p138_p2 = pnand %p369_p0, %p137_p1 }
   0x5   : > { %v423_v0 = vld [vmem:[%s503_s1] sm:$0xff] (!%p138_p2)   ;;  %v424_v1 = vld [vmem:[%s503_s1 + $0x8] sm:$0xff] (!%p138_p2)   ;;  %p161_p3 = scmp.lt.s32.totalorder (!%p138_p2), %s365_s13, 1  ;;  %v425_v2 = vld [vmem:[%s503_s1 + $0x10] ss:$0 sps:$4 sm:$0xff] (!%p138_p2)   ;;  %vm224_vm0 = vcmask (!%p138_p2), 1043456  }
   0x6   : > { %141 = sbr.rel (%p138_p2) target bundleno = 241 (0xf1), region = 32  ;;  %393 = vmatprep.subr.bf16.mxu0 (!%p138_p2), %v423_v0  ;;  %407 = vmatprep.subr.bf16.mxu1 (!%p138_p2), %v423_v0  ;;  %vm211_vm1 = vcmask (!%p138_p2), 326656   ;;  %v226_v6 = vsel (!%p138_p2), %vm224_vm0, %v425_v2, 0  ;;  %v374_v16 = vld [vmem:[%s504_s2] ss:$0 sm:$0xff] (!%p138_p2)  ;;  %vm301_vm2 = vcmask (!%p138_p2), 261120  }
   0x7   : > { %394 = vmatpush3.bf16.msra.mxu0 (!%p138_p2), %v423_v0  ;;  %410 = vmatpush3.bf16.msra.mxu1 (!%p138_p2), %v423_v0 }
   0x8   : > { %395 = vmatprep.subr.bf16.mxu0 (!%p138_p2), %v424_v1  ;;  %408 = vmatprep.subr.bf16.mxu1 (!%p138_p2), %v424_v1 }
   0xb   : > { %396 = vmatpush3.bf16.msra.mxu0 (!%p138_p2), %v424_v1  ;;  %411 = vmatpush3.bf16.msra.mxu1 (!%p138_p2), %v424_v1 }
   0xc   : > { %413 = vmatprep.subr.msk.bf16.mxu0 (!%p138_p2), %vm224_vm0, %v425_v2  ;;  %414 = vmatprep.subr.msk.bf16.mxu1 (!%p138_p2), %vm224_vm0, %v425_v2 }
   0xd   : > { %s507_s13 = smov (!%p161_p3, %s365_s13), 1 }
   0xe   : > { %s384_s20 = sshll.u32 %s507_s13, 6 }
   0xf   : > { %s165_s23 = scalar_lea.vmem %s502_s0, %s384_s20  ;;  %398 = vmatpush3.bf16.msra.mxu0 %v226_v6  ;;  %412 = vmatpush3.bf16.msra.mxu1 %v226_v6  ;;  %s170_s28 = scalar_lea.vmem %s505_s3, %s384_s20 }
  0x10   : > { %v172_v3 = vld [vmem:[%s165_s23] sm:$0xff]  ;;  %v173_v4 = vld [vmem:[%s165_s23 + $0x8] sm:$0xff]  ;;  %v174_v9 = vld [vmem:[%s165_s23 + $0x10] sm:$0xff] }
  0x11   : > { %v176_v5 = vld [vmem:[%s165_s23 + $0x20] sm:$0xff]  ;;  %v180_v7 = vpack.c.bf16 %v173_v4, %v172_v3  ;;  %v177_v8 = vld [vmem:[%s165_s23 + $0x28] sm:$0xff]  ;;  %v175_v10 = vld [vmem:[%s165_s23 + $0x18] sm:$0xff] }
  0x12   : > { %v182_v11 = vpack.c.bf16 %v177_v8, %v176_v5  ;;  %v178_v12 = vld [vmem:[%s165_s23 + $0x30] sm:$0xff]  ;;  %v179_v13 = vld [vmem:[%s165_s23 + $0x38] sm:$0xff]  ;;  %v181_v14 = vpack.c.bf16 %v175_v10, %v174_v9 }
  0x13   : > { %399 = vmatprep.mubr.msk.bf16.mxu0 %vm211_vm1, %v180_v7  ;;  %v183_v15 = vpack.c.bf16 %v179_v13, %v178_v12 }
  0x14   : > { %403 = vmatprep.mubr.msk.bf16.mxu1 %vm211_vm1, %v182_v11  ;;  %400 = vmatmul.mubr.msk.bf16.vlgmr.msra.gmra.mrb[0].mxu0 %vm211_vm1, %v181_v14 }
  0x15   : > { %404 = vmatmul.mubr.msk.bf16.vlgmr.msra.gmra.mrb[0].mxu1 %vm211_vm1, %v183_v15 }
  0xe7   : > { %v401_v17 = vpop.f32.mrb[0].mxu0 }
  0xe8   : > { %v405_v18 = vpop.f32.mrb[0].mxu1  ;;  %v271_v19 = vadd.f32 %v401_v17, %v374_v16  ;;  %v262_v21 = vpop.f32.mrb[1].mxu0 }
  0xe9   : > { %v287_v20 = vadd.f32 %v405_v18, %v374_v16  ;;  %v278_v22 = vpop.f32.mrb[1].mxu1  ;;  %v263_v23 = vadd.f32 %v374_v16, %v262_v21  ;;  %v402_v25 = vpop.f32.mrb[2].mxu0 }
  0xea   : > { %v279_v24 = vadd.f32 %v374_v16, %v278_v22  ;;  %v406_v26 = vpop.f32.mrb[2].mxu1  ;;  %v295_v27 = vmax.f32 %v271_v19, 0.0  ;;  %v274_v29 = vadd.f32 %v402_v25, %v374_v16  ;;  %v265_v31 = vpop.f32.mrb[3].mxu0 }
  0xeb   : > { %v299_v28 = vmax.f32 %v287_v20, 0.0  ;;  %v290_v30 = vadd.f32 %v406_v26, %v374_v16  ;;  %v281_v32 = vpop.f32.mrb[3].mxu1  ;;  %v293_v33 = vmax.f32 %v263_v23, 0.0  ;;  %v266_v35 = vadd.f32 %v374_v16, %v265_v31 }
  0xec   : > { %v297_v34 = vmax.f32 %v279_v24, 0.0  ;;  %v282_v36 = vadd.f32 %v374_v16, %v281_v32  ;;  %304 = vst.msk [vmem:[%s170_s28 + $0x10] sm:$0xff] %vm301_vm2, %v295_v27  ;;  %v296_v37 = vmax.f32 %v274_v29, 0.0 }
  0xed   : > { %308 = vst.msk [vmem:[%s170_s28 + $0x30] sm:$0xff] %vm301_vm2, %v299_v28  ;;  %v300_v38 = vmax.f32 %v290_v30, 0.0  ;;  %302 = vst.msk [vmem:[%s170_s28] sm:$0xff] %vm301_vm2, %v293_v33  ;;  %v294_v39 = vmax.f32 %v266_v35, 0.0 }
  0xee   : > { %306 = vst.msk [vmem:[%s170_s28 + $0x20] sm:$0xff] %vm301_vm2, %v297_v34  ;;  %v298_v40 = vmax.f32 %v282_v36, 0.0  ;;  %305 = vst.msk [vmem:[%s170_s28 + $0x18] sm:$0xff] %vm301_vm2, %v296_v37 }
  0xef   : > { %309 = vst.msk [vmem:[%s170_s28 + $0x38] sm:$0xff] %vm301_vm2, %v300_v38  ;;  %303 = vst.msk [vmem:[%s170_s28 + $0x8] sm:$0xff] %vm301_vm2, %v294_v39 }
  0xf0   : > { %307 = vst.msk [vmem:[%s170_s28 + $0x28] sm:$0xff] %vm301_vm2, %v298_v40 }
  0xf1 PF: > { %s13_s12 = sadd.s32 1, %s432_s12  }
  0xf2   : > { %p10_p4 = scmp.ge.s32.totalorder %s13_s12, 4  }
  0xf4   :  { %12 = sbr.rel (!%p10_p4) target bundleno = 1 (0x1), region = 62 }

// kernel: davenet_forward.6
= control target key start
LH: loop header
LB: loop body
LE: loop exit
PB: predicated region body
PF: predicated region fallthrough
CT: control target
= control target key end

     0   :  { %s1318_s12 = smov 0   ;;  %s1320_s13 = smov 0   ;;  %s1711_s0 = inlined_call_operand.vmem [shape: f32[2,64,32], index: 0, kind: input, shape index: {}]   ;;  %s1712_s1 = inlined_call_operand.vmem [shape: bf16[352,32], index: 1, kind: input, shape index: {}]   ;;  %s1713_s2 = inlined_call_operand.vmem [shape: f32[1,32], index: 2, kind: input, shape index: {}]   ;;  %s1714_s3 = inlined_call_operand.vmem [shape: f32[2,64,32], index: 3, kind: output, shape index: {}]  }
   0x1   :  { %s1322_s14 = smov 0  }
   0x2 LB: > { %s25_s15 = sadd.s32 1, %s1289_s13  ;;  %p1116_p0 = scmp.ge.s32.totalorder %s1293_s14, 1  ;;  %s1293_s14 = sphi %s1322_s14, %s13_s14   ;;  %s1289_s13 = sphi %s1320_s13, %s1718_s13   ;;  %s1285_s12 = sphi %s1318_s12, %s1717_s12  }
   0x3   : > { %p27_p1 = scmp.ge.s32.totalorder %s25_s15, 2  ;;  %p168_p2 = scmp.lt.s32.totalorder %s1293_s14, 3 }
   0x5   : > { %s1720_s15 = smov (%p27_p1, %s25_s15), 0  ;;  %p169_p3 = pnand %p1116_p0, %p168_p2 }
   0x6   : > { %p202_p4 = scmp.lt.s32.totalorder (!%p169_p3), %s1285_s12, 1  ;;  %v1249_v0 = vld [vmem:[%s1712_s1 + $0x40] sm:$0xff] (!%p169_p3)   ;;  %v1251_v2 = vld [vmem:[%s1712_s1 + $0x48] sm:$0xff] (!%p169_p3)   ;;  %vm235_vm0 = vsmask.f32 (!%p169_p3), 2304  ;;  %vm410_vm1 = vcmask (!%p169_p3), 1044480  }
   0x7   : > { %172 = sbr.rel (%p169_p3) target bundleno = 436 (0x1b4), region = 32  ;;  %v1250_v1 = vld [vmem:[%s1712_s1] sm:$0xff] (!%p169_p3)   ;;  %1152 = vmatprep.subr.bf16.mxu0 (!%p169_p3), %v1249_v0  ;;  %vm273_vm2 = vcmask (!%p169_p3), 1042432   ;;  %v1252_v17 = vld [vmem:[%s1712_s1 + $0x8] sm:$0xff] (!%p169_p3)   ;;  %v1253_v18 = vld [vmem:[%s1712_s1 + $0x50] sm:$0xff] (!%p169_p3)   ;;  %vm324_vm3 = vcmask (!%p169_p3), 1046528  }
   0x8   : > { %1153 = vmatpush3.bf16.msra.mxu0 (!%p169_p3), %v1250_v1  ;;  %vm1361_vm4 = vmand (!%p169_p3), %vm273_vm2, %vm235_vm0  ;;  %v1254_v35 = vld [vmem:[%s1712_s1 + $0x10] sm:$0xff] (!%p169_p3)   ;;  %v1255_v36 = vld [vmem:[%s1712_s1 + $0x58] sm:$0xff] (!%p169_p3)   ;;  %vm382_vm5 = vsmask.f32 (!%p169_p3), 5376  ;;  %vm277_vm6 = vsmask.f32 (!%p169_p3), 7424 }
   0x9   : > { %1154 = vmatprep.subr.bf16.mxu0 (!%p169_p3), %v1251_v2  ;;  %v1256_v40 = vld [vmem:[%s1712_s1 + $0x18] sm:$0xff] (!%p169_p3)   ;;  %vm342_vm7 = vsmask.f32 (!%p169_p3), 6400  ;;  %v1257_v47 = vld [vmem:[%s1712_s1 + $0x60] sm:$0xff] (!%p169_p3)   ;;  %v1259_v57 = vld [vmem:[%s1712_s1 + $0x68] sm:$0xff] (!%p169_p3)   ;;  %s1295_s19 = smov (!%p169_p3), 64  }
   0xa   : > { %v1258_v48 = vld [vmem:[%s1712_s1 + $0x20] sm:$0xff] (!%p169_p3)   ;;  %vm428_vm8 = vsmask.f32 (!%p169_p3), 4352  ;;  %s1297_s9 = smov (!%p169_p3), 96   ;;  %vm466_vm9 = vsmask.f32 (!%p169_p3), 3328 }
   0xb   : > { %vm372_vm10 = vcmask (!%p169_p3), 1045504   ;;  %vm511_vm11 = vcmask (!%p169_p3), 261120   ;;  %vm520_vm12 = vcmask (!%p169_p3), 523264   ;;  %vm529_vm13 = vcmask (!%p169_p3), 785408  }
   0xc   : > { %1155 = vmatpush3.bf16.msra.mxu0 (!%p169_p3), %v1252_v17  ;;  %vm456_vm14 = vcmask (!%p169_p3), 1043456   ;;  %vm931_vm15 = vcmask (!%p169_p3), 1040384  }
   0xd   : > { %1156 = vmatprep.subr.bf16.mxu0 (!%p169_p3), %v1253_v18 }
   0xe   : > { %s1722_s12 = smov (!%p202_p4, %s1285_s12), 1 }
   0xf   : > { %s1150_s20 = sshll.u32 %s1722_s12, 6 }
  0x10   : > { %s206_s25 = scalar_lea.vmem %s1711_s0, %s1150_s20  ;;  %1157 = vmatpush3.bf16.msra.mxu0 %v1254_v35  ;;  %s1671_s27 = scalar_lea.vmem %s1714_s3, %s1150_s20 }
  0x11   : > { %v223_v3 = vld [vmem:[%s206_s25] sm:$0xff]  ;;  %v224_v4 = vld [vmem:[%s206_s25 + $0x8] sm:$0xff]  ;;  %v225_v5 = vld [vmem:[%s206_s25 + $0x10] sm:$0xff]  ;;  %1158 = vmatprep.subr.bf16.mxu0 %v1255_v36 }
  0x12   : > { %v226_v6 = vld [vmem:[%s206_s25 + $0x18] sm:$0xff]  ;;  %v227_v7 = vld [vmem:[%s206_s25 + $0x20] sm:$0xff]  ;;  %v228_v8 = vld [vmem:[%s206_s25 + $0x28] sm:$0xff]  ;;  %v231_v9 = vpack.c.bf16 %v224_v4, %v223_v3 }
  0x13   : > { %v232_v10 = vpack.c.bf16 %v226_v6, %v225_v5  ;;  %v233_v11 = vpack.c.bf16 %v228_v8, %v227_v7  ;;  %v229_v12 = vld [vmem:[%s206_s25 + $0x30] sm:$0xff]  ;;  %v230_v13 = vld [vmem:[%s206_s25 + $0x38] sm:$0xff]  ;;  %v1260_v6 = vld [vmem:[%s1712_s1 + $0x28] sm:$0xff]   ;;  %s1296_s25 = smov 32  }
  0x14   : > { %v237_v14 = vshrl.u32 %v231_v9, 16  ;;  %v240_v15 = vshll.u32 %v231_v9, 16  ;;  %v234_v16 = vpack.c.bf16 %v230_v13, %v229_v12  ;;  %1159 = vmatpush3.bf16.msra.mxu0 %v1256_v40  ;;  %v1266_v40 = vld [vmem:[%s1712_s1 + $0x88] sm:$0xff]  }
  0x15   : > { %v245_v19 = vshrl.u32 %v232_v10, 16  ;;  %v248_v20 = vshll.u32 %v232_v10, 16  ;;  %v254_v21 = vshrl.u32 %v233_v11, 16  ;;  %v257_v22 = vshll.u32 %v233_v11, 16  ;;  %1160 = vmatprep.subr.bf16.mxu0 %v1257_v47 }
  0x16   : > { %v239_v23 = vrot.slane %v237_v14, 5  ;;  %v242_v24 = vrot.slane %v240_v15, 6  ;;  %v263_v25 = vshrl.u32 %v234_v16, 16  ;;  %v266_v26 = vshll.u32 %v234_v16, 16  ;;  %v1261_v15 = vld [vmem:[%s1712_s1 + $0x70] sm:$0xff]  }
  0x17   : > { %v247_v27 = vrot.slane %v245_v19, 5  ;;  %v250_v28 = vrot.slane %v248_v20, 6  ;;  %v256_v29 = vrot.slane %v254_v21, 5  ;;  %v259_v30 = vrot.slane %v257_v22, 6  ;;  %v1265_v22 = vld [vmem:[%s1712_s1 + $0x80] sm:$0xff]  }
  0x18   : > { %v243_v32 = vor.u32 %v242_v24, %v239_v23  ;;  %v265_v33 = vrot.slane %v263_v25, 5  ;;  %v268_v34 = vrot.slane %v266_v26, 6  ;;  %1161 = vmatpush3.bf16.msra.mxu0 %v1258_v48  ;;  %v1262_v26 = vld [vmem:[%s1712_s1 + $0x30] sm:$0xff]   ;;  %1202 = vmatprep.subr.bf16.mxu1 %v1265_v22 }
  0x19   : > { %v251_v37 = vor.u32 %v250_v28, %v247_v27  ;;  %v260_v38 = vor.u32 %v259_v30, %v256_v29  ;;  %1162 = vmatprep.subr.bf16.mxu0 %v1259_v57  ;;  %1203 = vmatpush3.bf16.msra.mxu1 %v1265_v22 }
  0x1a   : > { %v1373_v39 = vsel %vm1361_vm4, 0, %v243_v32  ;;  %v1407_v54 = vor.u32 %v268_v34, %v265_v33  ;;  %1204 = vmatprep.subr.bf16.mxu1 %v1266_v40 }
  0x1b   : > { %v1379_v41 = vsel %vm235_vm0, %v243_v32, %v251_v37  ;;  %v1382_v42 = vsel %vm235_vm0, %v251_v37, %v260_v38  ;;  %v411_v43 = vrot.slane %v1373_v39, 3  ;;  %v325_v44 = vrot.slane %v1373_v39, 1  ;;  %v1263_v32 = vld [vmem:[%s1712_s1 + $0x78] sm:$0xff]  }
  0x1c   : > { %v412_v45 = vrot.slane %v1379_v41, 3  ;;  %v414_v46 = vrot.slane %v1382_v42, 3  ;;  %v326_v49 = vrot.slane %v1379_v41, 1  ;;  %v1396_v50 = vshrl.u32 %v1373_v39, 16  ;;  %1163 = vmatpush3.bf16.msra.mxu0 %v1260_v6  ;;  %v1264_v37 = vld [vmem:[%s1712_s1 + $0x38] sm:$0xff]  }
  0x1d   : > { %v1399_v51 = vshll.u32 %v1373_v39, 16  ;;  %v1402_v52 = vshll.u32 %v1379_v41, 16  ;;  %v1411_v56 = vshrl.u32 %v1379_v41, 16  ;;  %v328_v61 = vrot.slane %v1382_v42, 1  ;;  %1164 = vmatprep.subr.bf16.mxu0 %v1261_v15  ;;  %1205 = vmatpush3.bf16.msra.mxu1 %v1266_v40 }
  0x1e   : > { %v415_v53 = vsel %vm410_vm1, %v412_v45, %v414_v46  ;;  %v413_v55 = vsel %vm410_vm1, %v411_v43, %v412_v45  ;;  %v383_v58 = vrot.slane %v1396_v50, 2  ;;  %v327_v62 = vsel %vm324_vm3, %v325_v44, %v326_v49 }
  0x1f   : > { %422 = vrot.lane.b32.xlu0 %v415_v53, %s1295_s19  ;;  %420 = vrot.lane.b32.xlu1 %v413_v55, %s1295_s19  ;;  %v384_v59 = vrot.slane %v1399_v51, 3  ;;  %v387_v60 = vrot.slane %v1402_v52, 3  ;;  %v386_v63 = vrot.slane %v1411_v56, 2  ;;  %v283_v0 = vrot.slane %v1399_v51, 1  ;;  %v1267_v53 = vld [vmem:[%s1712_s1 + $0x90] sm:$0xff]  }
  0x20   : > { %v288_v1 = vrot.slane %v1402_v52, 1  ;;  %v343_v3 = vrot.slane %v1396_v50, 1  ;;  %v344_v4 = vrot.slane %v1399_v51, 2  ;;  %v346_v5 = vrot.slane %v1411_v56, 1  ;;  %1165 = vmatpush3.bf16.msra.mxu0 %v1262_v26  ;;  %1206 = vmatprep.subr.bf16.mxu1 %v1267_v53 }
  0x21   : > { %v385_v2 = vor.u32 %v384_v59, %v383_v58  ;;  %v388_v7 = vor.u32 %v387_v60, %v386_v63  ;;  %v284_v8 = vor.u32 %v283_v0, %v1396_v50  ;;  %v347_v9 = vrot.slane %v1402_v52, 2  ;;  %1166 = vmatprep.subr.bf16.mxu0 %v1263_v32  ;;  %v1268_v0 = vld [vmem:[%s1712_s1 + $0x98] sm:$0xff]   ;;  %1207 = vmatpush3.bf16.msra.mxu1 %v1267_v53 }
  0x22   : > { %v429_v10 = vrot.slane %v1396_v50, 3  ;;  %v345_v11 = vor.u32 %v344_v4, %v343_v3  ;;  %v430_v12 = vrot.slane %v1399_v51, 4  ;;  %v432_v13 = vrot.slane %v1411_v56, 3  ;;  %1208 = vmatprep.subr.bf16.mxu1 %v1268_v0 }
  0x23   : > { %334 = vrot.lane.b32.xlu1 %v327_v62, %s1295_s19  ;;  %v433_v14 = vrot.slane %v1402_v52, 4  ;;  %v389_v16 = vsel %vm382_vm5, %v385_v2, %v388_v7  ;;  %v329_v17 = vsel %vm324_vm3, %v326_v49, %v328_v61  ;;  %v348_v18 = vor.u32 %v347_v9, %v346_v5 }
  0x24   : > { %v1448_v19 = vsel %vm235_vm0, %v260_v38, %v1407_v54  ;;  %402 = vrot.lane.b32.xlu0 %v389_v16, %s1296_s25  ;;  %v1452_v20 = vshll.u32 %v1382_v42, 16  ;;  %v1455_v21 = vshrl.u32 %v1382_v42, 16  ;;  %v289_v23 = vsel %vm277_vm6, %v284_v8, %v288_v1  ;;  %1167 = vmatpush3.bf16.msra.mxu0 %v1264_v37 }
  0x25   : > { %v431_v24 = vor.u32 %v430_v12, %v429_v10  ;;  %v434_v25 = vor.u32 %v433_v14, %v432_v13  ;;  %v349_v27 = vsel %vm342_vm7, %v345_v11, %v348_v18  ;;  %v292_v28 = vor.u32 %v1411_v56, %v288_v1  ;;  %1209 = vmatpush3.bf16.msra.mxu1 %v1268_v0 }
  0x26   : > { %v390_v29 = vrot.slane %v1455_v21, 2  ;;  %v391_v30 = vrot.slane %v1452_v20, 3  ;;  %v296_v33 = vrot.slane %v1452_v20, 1  ;;  %v350_v34 = vrot.slane %v1455_v21, 1 }
  0x27   : > { %336 = vrot.lane.b32.xlu1 %v329_v17, %s1295_s19  ;;  %v351_v35 = vrot.slane %v1452_v20, 2  ;;  %v1476_v36 = vshll.u32 %v1448_v19, 16  ;;  %v1483_v38 = vshrl.u32 %v1448_v19, 16  ;;  %v435_v43 = vsel %vm428_vm8, %v431_v24, %v434_v25 }
  0x28   : > { %314 = vrot.lane.b32.xlu0 %v289_v23, %s1296_s25  ;;  %v392_v44 = vor.u32 %v391_v30, %v390_v29  ;;  %v436_v45 = vrot.slane %v1455_v21, 3  ;;  %v437_v47 = vrot.slane %v1452_v20, 4  ;;  %v297_v48 = vsel %vm277_vm6, %v292_v28, %v296_v33 }
  0x29   : > { %v352_v49 = vor.u32 %v351_v35, %v350_v34  ;;  %v394_v58 = vrot.slane %v1483_v38, 2  ;;  %v395_v59 = vrot.slane %v1476_v36, 3  ;;  %v300_v62 = vor.u32 %v1455_v21, %v296_v33 }
  0x2a   : > { %v393_v55 = vsel %vm382_vm5, %v388_v7, %v392_v44  ;;  %v438_v57 = vor.u32 %v437_v47, %v436_v45  ;;  %v304_v63 = vrot.slane %v1476_v36, 1  ;;  %v330_v3 = vrot.slane %v1448_v19, 1  ;;  %v1269_v7 = vld [vmem:[%s1712_s1 + $0xa0] sm:$0xff]  }
  0x2b   : > { %364 = vrot.lane.b32.xlu1 %v349_v27, %s1297_s9  ;;  %v353_v60 = vsel %vm342_vm7, %v348_v18, %v352_v49  ;;  %v1509_v2 = vor.u32 %v395_v59, %v394_v58  ;;  %v354_v5 = vrot.slane %v1483_v38, 1  ;;  %v355_v6 = vrot.slane %v1476_v36, 2  ;;  %1210 = vmatprep.subr.bf16.mxu1 %v1269_v7  ;;  %v1270_v18 = vld [vmem:[%s1712_s1 + $0xa8] sm:$0xff]  }
  0x2c   : > { %448 = vrot.lane.b32.xlu0 %v435_v43, %s1297_s9  ;;  %v439_v1 = vsel %vm428_vm8, %v434_v25, %v438_v57  ;;  %v305_v4 = vsel %vm277_vm6, %v300_v62, %v304_v63  ;;  %v416_v9 = vrot.slane %v1448_v19, 3  ;;  %v440_v10 = vrot.slane %v1483_v38, 3  ;;  %1211 = vmatpush3.bf16.msra.mxu1 %v1269_v7 }
  0x2d   : > { %v397_v8 = vsel %vm382_vm5, %v392_v44, %v1509_v2  ;;  %v441_v11 = vrot.slane %v1476_v36, 4  ;;  %v331_v12 = vsel %vm324_vm3, %v328_v61, %v330_v3  ;;  %v470_v13 = vrot.slane %v1411_v56, 4  ;;  %1212 = vmatprep.subr.bf16.mxu1 %v1270_v18 }
  0x2e   : > { %v356_v14 = vor.u32 %v355_v6, %v354_v5  ;;  %v471_v15 = vrot.slane %v1402_v52, 5  ;;  %v474_v16 = vrot.slane %v1455_v21, 4  ;;  %v475_v17 = vrot.slane %v1452_v20, 5 }
  0x2f   : > { %316 = vrot.lane.b32.xlu1 %v297_v48, %s1296_s25  ;;  %v417_v56 = vsel %vm410_vm1, %v414_v46, %v416_v9  ;;  %v442_v61 = vor.u32 %v441_v11, %v440_v10  ;;  %v467_v52 = vrot.slane %v1396_v50, 4  ;;  %v468_v21 = vrot.slane %v1399_v51, 5 }
  0x30   : > { %404 = vrot.lane.b32.xlu0 %v393_v55, %s1296_s25  ;;  %v1549_v20 = vsel %vm1361_vm4, %v1407_v54, 0  ;;  %v357_v22 = vsel %vm342_vm7, %v352_v49, %v356_v14  ;;  %v472_v23 = vor.u32 %v471_v15, %v470_v13  ;;  %v476_v24 = vor.u32 %v475_v17, %v474_v16  ;;  %1213 = vmatpush3.bf16.msra.mxu1 %v1270_v18 }
  0x31   : > { %v443_v46 = vsel %vm428_vm8, %v438_v57, %v442_v61  ;;  %v469_v50 = vor.u32 %v468_v21, %v467_v52  ;;  %v310_v51 = vshll.u32 %v1549_v20, 16  ;;  %v358_v25 = vshrl.u32 %v1549_v20, 16 }
  0x32   : > { %v477_v31 = vsel %vm466_vm9, %v472_v23, %v476_v24  ;;  %v495_v54 = vrot.slane %v1379_v41, 5  ;;  %v497_v26 = vrot.slane %v1382_v42, 5  ;;  %v494_v28 = vrot.slane %v1373_v39, 5 }
  0x33   : > { %366 = vrot.lane.b32.xlu1 %v353_v60, %s1297_s9  ;;  %v473_v27 = vsel %vm466_vm9, %v469_v50, %v472_v23  ;;  %v398_v29 = vrot.slane %v358_v25, 2  ;;  %v399_v30 = vrot.slane %v310_v51, 3  ;;  %v308_v33 = vor.u32 %v1483_v38, %v304_v63 }
  0x34   : > { %450 = vrot.lane.b32.xlu0 %v439_v1, %s1297_s9  ;;  %v498_v32 = vsel %vm273_vm2, %v495_v54, %v497_v26  ;;  %v312_v34 = vrot.slane %v310_v51, 1  ;;  %v496_v35 = vsel %vm273_vm2, %v494_v28, %v495_v54  ;;  %v332_v40 = vrot.slane %v1549_v20, 1 }
  0x35   : > { %v400_v37 = vor.u32 %v399_v30, %v398_v29  ;;  %v360_v43 = vrot.slane %v358_v25, 1  ;;  %v361_v44 = vrot.slane %v310_v51, 2  ;;  %v418_v48 = vrot.slane %v1549_v20, 3 }
  0x36   : > { %v313_v45 = vsel %vm277_vm6, %v308_v33, %v312_v34  ;;  %v444_v49 = vrot.slane %v358_v25, 3  ;;  %v445_v53 = vrot.slane %v310_v51, 4  ;;  %v333_v55 = vsel %vm324_vm3, %v330_v3, %v332_v40 }
  0x37   : > { %318 = vrot.lane.b32.xlu1 %v305_v4, %s1296_s25  ;;  %v401_v47 = vsel %vm382_vm5, %v1509_v2, %v400_v37  ;;  %v362_v57 = vor.u32 %v361_v44, %v360_v43  ;;  %v478_v58 = vrot.slane %v1483_v38, 4  ;;  %v479_v59 = vrot.slane %v1476_v36, 5 }
  0x38   : > { %406 = vrot.lane.b32.xlu0 %v397_v8, %s1296_s25  ;;  %v482_v60 = vrot.slane %v358_v25, 4  ;;  %v483_v62 = vrot.slane %v310_v51, 5  ;;  %v419_v63 = vsel %vm410_vm1, %v416_v9, %v418_v48  ;;  %v446_v0 = vor.u32 %v445_v53, %v444_v49 }
  0x39   : > { %v363_v1 = vsel %vm342_vm7, %v356_v14, %v362_v57  ;;  %v480_v2 = vor.u32 %v479_v59, %v478_v58  ;;  %v499_v4 = vrot.slane %v1448_v19, 5  ;;  %v501_v5 = vrot.slane %v1549_v20, 5 }
  0x3a   : > { %v484_v3 = vor.u32 %v483_v62, %v482_v60  ;;  %v447_v38 = vsel %vm428_vm8, %v442_v61, %v446_v0  ;;  %v374_v13 = vrot.slane %v1379_v41, 2  ;;  %v376_v52 = vrot.slane %v1382_v42, 2 }
  0x3b   : > { %338 = vrot.lane.b32.xlu1 %v331_v12, %s1295_s19  ;;  %v481_v6 = vsel %vm466_vm9, %v476_v24, %v480_v2  ;;  %v502_v7 = vsel %vm273_vm2, %v499_v4, %v501_v5  ;;  %v500_v8 = vsel %vm273_vm2, %v497_v26, %v499_v4  ;;  %v373_v12 = vrot.slane %v1373_v39, 2 }
  0x3c   : > { %424 = vrot.lane.b32.xlu0 %v417_v56, %s1295_s19  ;;  %v485_v36 = vsel %vm466_vm9, %v480_v2, %v484_v3  ;;  %v377_v51 = vsel %vm372_vm10, %v374_v13, %v376_v52  ;;  %v378_v34 = vrot.slane %v1448_v19, 2  ;;  %v458_v57 = vrot.slane %v1379_v41, 4 }
  0x3d   : > { %v375_v15 = vsel %vm372_vm10, %v373_v12, %v374_v13  ;;  %v460_v58 = vrot.slane %v1382_v42, 4  ;;  %v457_v60 = vrot.slane %v1373_v39, 4  ;;  %v380_v4 = vrot.slane %v1549_v20, 2 }
  0x3e   : > { %v379_v40 = vsel %vm372_vm10, %v376_v52, %v378_v34 }
  0x3f   : > { %368 = vrot.lane.b32.xlu1 %v357_v22, %s1297_s9 }
  0x40   : > { %452 = vrot.lane.b32.xlu0 %v443_v46, %s1297_s9 }
  0x43   : > { %488 = vrot.lane.b32.xlu1 %v477_v31, %s1296_s25 }
  0x44   : > { %486 = vrot.lane.b32.xlu0 %v473_v27, %s1296_s25 }
  0x47   : > { %505 = vrot.lane.b32.xlu1 %v498_v32, %s1295_s19 }
  0x48   : > { %503 = vrot.lane.b32.xlu0 %v496_v35, %s1295_s19 }
  0x4b   : > { %320 = vrot.lane.b32.xlu1 %v313_v45, %s1296_s25 }
  0x4c   : > { %408 = vrot.lane.b32.xlu0 %v401_v47, %s1296_s25 }
  0x4f   : > { %340 = vrot.lane.b32.xlu1 %v333_v55, %s1295_s19 }
  0x50   : > { %426 = vrot.lane.b32.xlu0 %v419_v63, %s1295_s19  ;;  %v461_v63 = vsel %vm456_vm14, %v458_v57, %v460_v58 }
  0x53   : > { %370 = vrot.lane.b32.xlu1 %v363_v1, %s1297_s9  ;;  %v459_v1 = vsel %vm456_vm14, %v457_v60, %v458_v57 }
  0x54   : > { %454 = vrot.lane.b32.xlu0 %v447_v38, %s1297_s9 }
  0x57   : > { %492 = vrot.lane.b32.xlu1 %v485_v36, %s1296_s25 }
  0x58   : > { %490 = vrot.lane.b32.xlu0 %v481_v6, %s1296_s25 }
  0x5b   : > { %509 = vrot.lane.b32.xlu1 %v502_v7, %s1295_s19  ;;  %v381_v7 = vsel %vm372_vm10, %v378_v34, %v380_v4 }
  0x5c   : > { %507 = vrot.lane.b32.xlu0 %v500_v8, %s1295_s19 }
  0x91   : > { %v423_v9 = vpop.permute.xlu0 %422  ;;  %v421_v10 = vpop.permute.xlu1 %420 }
  0x95   : > { %v335_v11 = vpop.permute.xlu1 %334 }
  0x96   : > { %v403_v14 = vpop.permute.xlu0 %402 }
  0x97   : > { %v544_v18 = vsel %vm511_vm11, %v375_v15, %v403_v14 }
  0x98   : > { %v555_v23 = vsel %vm520_vm12, %v544_v18, %v421_v10 }
  0x99   : > { %v337_v16 = vpop.permute.xlu1 %336 }
  0x9a   : > { %v315_v17 = vpop.permute.xlu0 %314 }
  0x9b   : > { %v513_v56 = vsel %vm511_vm11, %v1373_v39, %v315_v17  ;;  %v464_v17 = vrot.slane %v1549_v20, 4 }
  0x9c   : > { %v522_v21 = vsel %vm520_vm12, %v513_v56, %v335_v11 }
  0x9d   : > { %v365_v61 = vpop.permute.xlu1 %364 }
  0x9e   : > { %v449_v22 = vpop.permute.xlu0 %448  ;;  %v531_v24 = vsel %vm529_vm13, %v522_v21, %v365_v61 }
  0x9f   : > { %v563_v46 = vsel %vm529_vm13, %v555_v23, %v449_v22 }
  0xa0   : > { %817 = vmatprep.mubr.bf16.mxu0 %v563_v46 }
  0xa1   : > { %v317_v50 = vpop.permute.xlu1 %316  ;;  %818 = vmatmul.mubr.bf16.vlgmr.msra.gmra.mrb[0].mxu0 %v531_v24 }
  0xa2   : > { %v515_v25 = vsel %vm511_vm11, %v1379_v41, %v317_v50  ;;  %v405_v31 = vpop.permute.xlu0 %404 }
  0xa3   : > { %v547_v54 = vsel %vm511_vm11, %v377_v51, %v405_v31  ;;  %v524_v27 = vsel %vm520_vm12, %v515_v25, %v337_v16  ;;  %v462_v16 = vrot.slane %v1448_v19, 4 }
  0xa4   : > { %v557_v29 = vsel %vm520_vm12, %v547_v54, %v423_v9 }
  0xa5   : > { %v367_v26 = vpop.permute.xlu1 %366  ;;  %v465_v61 = vsel %vm456_vm14, %v462_v16, %v464_v17  ;;  %v463_v21 = vsel %vm456_vm14, %v460_v58, %v462_v16 }
  0xa6   : > { %v451_v28 = vpop.permute.xlu0 %450  ;;  %v534_v30 = vsel %vm529_vm13, %v524_v27, %v367_v26 }
  0xa7   : > { %v566_v32 = vsel %vm529_vm13, %v557_v29, %v451_v28 }
  0xa8   : > { %825 = vmatprep.mubr.bf16.mxu0 %v566_v32 }
  0xa9   : > { %v319_v33 = vpop.permute.xlu1 %318  ;;  %826 = vmatmul.mubr.bf16.gmra.mrb[4].mxu0 %v534_v30 }
  0xaa   : > { %v407_v35 = vpop.permute.xlu0 %406  ;;  %v517_v44 = vsel %vm511_vm11, %v1382_v42, %v319_v33 }
  0xab   : > { %v550_v47 = vsel %vm511_vm11, %v379_v40, %v407_v35 }
  0xad   : > { %v339_v37 = vpop.permute.xlu1 %338 }
  0xae   : > { %v425_v43 = vpop.permute.xlu0 %424  ;;  %v526_v48 = vsel %vm520_vm12, %v517_v44, %v339_v37 }
  0xaf   : > { %v559_v49 = vsel %vm520_vm12, %v550_v47, %v425_v43 }
  0xb1   : > { %v369_v45 = vpop.permute.xlu1 %368 }
  0xb2   : > { %v453_v53 = vpop.permute.xlu0 %452  ;;  %v537_v55 = vsel %vm529_vm13, %v526_v48, %v369_v45  ;;  %v1121_v45 = vld [vmem:[%s1713_s2] ss:$0 sm:$0xff] }
  0xb3   : > { %v569_v59 = vsel %vm529_vm13, %v559_v49, %v453_v53 }
  0xb4   : > { %833 = vmatprep.mubr.bf16.mxu0 %v569_v59 }
  0xb5   : > { %v489_v62 = vpop.permute.xlu1 %488  ;;  %834 = vmatmul.mubr.bf16.gmra.mrb[8].mxu0 %v537_v55 }
  0xb6   : > { %v487_v0 = vpop.permute.xlu0 %486  ;;  %v579_v3 = vsel %vm511_vm11, %v461_v63, %v489_v62 }
  0xb7   : > { %v576_v41 = vsel %vm511_vm11, %v459_v1, %v487_v0 }
  0xb9   : > { %v506_v2 = vpop.permute.xlu1 %505 }
  0xba   : > { %v589_v42 = vsel %vm520_vm12, %v579_v3, %v506_v2  ;;  %v504_v38 = vpop.permute.xlu0 %503 }
  0xbb   : > { %v587_v36 = vsel %vm520_vm12, %v576_v41, %v504_v38 }
  0xbc   : > { %1214 = vmatprep.mubr.msk.bf16.mxu1 %vm529_vm13, %v587_v36 }
  0xbd   : > { %v321_v39 = vpop.permute.xlu1 %320  ;;  %1215 = vmatmul.mubr.msk.bf16.vlgmr.msra.gmra.mrb[0].mxu1 %vm529_vm13, %v589_v42 }
  0xbe   : > { %v409_v5 = vpop.permute.xlu0 %408  ;;  %v519_v9 = vsel %vm511_vm11, %v1448_v19, %v321_v39 }
  0xbf   : > { %v553_v11 = vsel %vm511_vm11, %v381_v7, %v409_v5 }
  0xc1   : > { %v341_v6 = vpop.permute.xlu1 %340 }
  0xc2   : > { %v427_v8 = vpop.permute.xlu0 %426  ;;  %v528_v12 = vsel %vm520_vm12, %v519_v9, %v341_v6 }
  0xc3   : > { %v561_v13 = vsel %vm520_vm12, %v553_v11, %v427_v8 }
  0xc5   : > { %v371_v10 = vpop.permute.xlu1 %370 }
  0xc6   : > { %v455_v14 = vpop.permute.xlu0 %454  ;;  %v540_v15 = vsel %vm529_vm13, %v528_v12, %v371_v10 }
  0xc7   : > { %v572_v18 = vsel %vm529_vm13, %v561_v13, %v455_v14 }
  0xc8   : > { %841 = vmatprep.mubr.bf16.mxu0 %v572_v18 }
  0xc9   : > { %v493_v56 = vpop.permute.xlu1 %492  ;;  %842 = vmatmul.mubr.bf16.gmra.mrb[12].mxu0 %v540_v15 }
  0xca   : > { %v491_v52 = vpop.permute.xlu0 %490  ;;  %v585_v23 = vsel %vm511_vm11, %v465_v61, %v493_v56 }
  0xcb   : > { %v582_v24 = vsel %vm511_vm11, %v463_v21, %v491_v52 }
  0xcd   : > { %v510_v22 = vpop.permute.xlu1 %509 }
  0xce   : > { %v593_v46 = vsel %vm520_vm12, %v585_v23, %v510_v22  ;;  %v508_v19 = vpop.permute.xlu0 %507 }
  0xcf   : > { %v591_v20 = vsel %vm520_vm12, %v582_v24, %v508_v19 }
  0xd0   : > { %1218 = vmatprep.mubr.msk.bf16.mxu1 %vm529_vm13, %v591_v20 }
  0xd1   : > { %1219 = vmatmul.mubr.msk.bf16.gmra.mrb[4].mxu1 %vm529_vm13, %v593_v46 }
 0x174   : > { %v1168_v50 = vpop.f32.mrb[0].mxu0 }
 0x175   : > { %v1169_v51 = vpop.f32.mrb[1].mxu0 }
 0x176   : > { %v1170_v25 = vadd.f32 %v1169_v51, %v1168_v50  ;;  %v1171_v31 = vpop.f32.mrb[2].mxu0 }
 0x177   : > { %v1172_v54 = vpop.f32.mrb[3].mxu0 }
 0x178   : > { %v1173_v26 = vadd.f32 %v1172_v54, %v1171_v31  ;;  %v820_v49 = vadd.f32 %v1170_v25, %v1121_v45 }
 0x17a   : > { %v823_v60 = vadd.f32 %v1173_v26, %v1121_v45 }
 0x17c   : > { %v1174_v27 = vpop.f32.mrb[4].mxu0 }
 0x17d   : > { %v1175_v28 = vpop.f32.mrb[5].mxu0 }
 0x17e   : > { %v1176_v29 = vadd.f32 %v1175_v28, %v1174_v27  ;;  %v1177_v30 = vpop.f32.mrb[6].mxu0 }
 0x17f   : > { %v1178_v32 = vpop.f32.mrb[7].mxu0 }
 0x180   : > { %v1179_v33 = vadd.f32 %v1178_v32, %v1177_v30  ;;  %v828_v47 = vadd.f32 %v1176_v29, %v1121_v45 }
 0x182   : > { %v831_v57 = vadd.f32 %v1179_v33, %v1121_v45 }
 0x188   : > { %v1180_v34 = vpop.f32.mrb[8].mxu0 }
 0x189   : > { %v1181_v35 = vpop.f32.mrb[9].mxu0 }
 0x18a   : > { %v1182_v37 = vadd.f32 %v1181_v35, %v1180_v34  ;;  %v1183_v40 = vpop.f32.mrb[10].mxu0 }
 0x18b   : > { %v1184_v43 = vpop.f32.mrb[11].mxu0 }
 0x18c   : > { %v1185_v44 = vadd.f32 %v1184_v43, %v1183_v40  ;;  %v836_v51 = vadd.f32 %v1182_v37, %v1121_v45 }
 0x18e   : > { %v839_v28 = vadd.f32 %v1185_v44, %v1121_v45 }
 0x190   : > { %v1216_v48 = vpop.f32.mrb[0].mxu1 }
 0x191   : > { %v893_v53 = vadd.f32 %v1216_v48, %v828_v47  ;;  %v884_v55 = vpop.f32.mrb[1].mxu1 }
 0x192   : > { %v885_v58 = vadd.f32 %v884_v55, %v820_v49  ;;  %v1217_v59 = vpop.f32.mrb[2].mxu1 }
 0x193   : > { %v917_v62 = vmax.f32 %v893_v53, 0.0  ;;  %v896_v63 = vadd.f32 %v1217_v59, %v831_v57  ;;  %v887_v0 = vpop.f32.mrb[3].mxu1 }
 0x194   : > { %v915_v1 = vmax.f32 %v885_v58, 0.0  ;;  %v888_v2 = vadd.f32 %v887_v0, %v823_v60 }
 0x195   : > { %v918_v3 = vmax.f32 %v896_v63, 0.0  ;;  %v935_v38 = vrot.slane %v917_v62, 7  ;;  %v960_v36 = vrot.slane %v917_v62, 1 }
 0x196   : > { %v932_v41 = vrot.slane %v915_v1, 7  ;;  %v916_v42 = vmax.f32 %v888_v2, 0.0  ;;  %v957_v6 = vrot.slane %v915_v1, 1 }
 0x197   : > { %v937_v39 = vrot.slane %v918_v3, 7  ;;  %v962_v4 = vrot.slane %v918_v3, 1 }
 0x198   : > { %v955_v5 = vsel %vm931_vm15, 0.0, %v932_v41  ;;  %v933_v7 = vrot.slane %v916_v42, 7  ;;  %v958_v8 = vrot.slane %v916_v42, 1 }
 0x199   : > { %v981_v9 = vmax.f32 %v955_v5, %v915_v1  ;;  %v938_v10 = vsel %vm931_vm15, %v935_v38, %v937_v39  ;;  %v963_v11 = vsel %vm324_vm3, %v960_v36, %v962_v4 }
 0x19a   : > { %v984_v12 = vmax.f32 %v938_v10, %v918_v3  ;;  %v934_v13 = vsel %vm931_vm15, %v932_v41, %v933_v7  ;;  %v936_v14 = vsel %vm931_vm15, %v933_v7, %v935_v38  ;;  %v959_v15 = vsel %vm324_vm3, %v957_v6, %v958_v8 }
 0x19b   : > { %v961_v16 = vsel %vm324_vm3, %v958_v8, %v960_v36  ;;  %v982_v17 = vmax.f32 %v934_v13, %v916_v42  ;;  %v983_v18 = vmax.f32 %v936_v14, %v917_v62  ;;  %v989_v56 = vmax.f32 %v981_v9, %v959_v15 }
 0x19c   : > { %v1186_v61 = vpop.f32.mrb[12].mxu0 }
 0x19d   : > { %v990_v52 = vmax.f32 %v982_v17, %v961_v16  ;;  %v991_v21 = vmax.f32 %v983_v18, %v963_v11  ;;  %997 = vst.msk [vmem:[%s1671_s27] sm:$0xff] %vm511_vm11, %v989_v56  ;;  %v1187_v22 = vpop.f32.mrb[13].mxu0 }
 0x19e   : > { %v1188_v23 = vadd.f32 %v1187_v22, %v1186_v61  ;;  %v1189_v24 = vpop.f32.mrb[14].mxu0 }
 0x19f   : > { %998 = vst.msk [vmem:[%s1671_s27 + $0x8] sm:$0xff] %vm511_vm11, %v990_v52  ;;  %999 = vst.msk [vmem:[%s1671_s27 + $0x10] sm:$0xff] %vm511_vm11, %v991_v21  ;;  %v1190_v46 = vpop.f32.mrb[15].mxu0 }
 0x1a0   : > { %v1191_v19 = vadd.f32 %v1190_v46, %v1189_v24  ;;  %v844_v20 = vadd.f32 %v1188_v23, %v1121_v45 }
 0x1a2   : > { %v847_v54 = vadd.f32 %v1191_v19, %v1121_v45 }
 0x1a4   : > { %v1220_v50 = vpop.f32.mrb[4].mxu1 }
 0x1a5   : > { %v909_v25 = vadd.f32 %v1220_v50, %v844_v20  ;;  %v900_v31 = vpop.f32.mrb[5].mxu1 }
 0x1a6   : > { %v901_v26 = vadd.f32 %v900_v31, %v836_v51  ;;  %v1221_v27 = vpop.f32.mrb[6].mxu1 }
 0x1a7   : > { %v921_v29 = vmax.f32 %v909_v25, 0.0  ;;  %v912_v30 = vadd.f32 %v1221_v27, %v847_v54  ;;  %v903_v32 = vpop.f32.mrb[7].mxu1 }
 0x1a8   : > { %v919_v33 = vmax.f32 %v901_v26, 0.0  ;;  %v904_v34 = vadd.f32 %v903_v32, %v839_v28 }
 0x1a9   : > { %v922_v35 = vmax.f32 %v912_v30, 0.0  ;;  %v943_v48 = vrot.slane %v921_v29, 7  ;;  %v968_v49 = vrot.slane %v921_v29, 1 }
 0x1aa   : > { %v939_v40 = vrot.slane %v919_v33, 7  ;;  %v964_v43 = vrot.slane %v919_v33, 1  ;;  %v920_v47 = vmax.f32 %v904_v34, 0.0 }
 0x1ab   : > { %v945_v53 = vrot.slane %v922_v35, 7  ;;  %v970_v37 = vrot.slane %v922_v35, 1 }
 0x1ac   : > { %v940_v55 = vsel %vm931_vm15, %v937_v39, %v939_v40  ;;  %v965_v57 = vsel %vm324_vm3, %v962_v4, %v964_v43  ;;  %v941_v58 = vrot.slane %v920_v47, 7  ;;  %v966_v44 = vrot.slane %v920_v47, 1 }
 0x1ad   : > { %v985_v45 = vmax.f32 %v940_v55, %v919_v33  ;;  %v992_v59 = vmax.f32 %v984_v12, %v965_v57  ;;  %v946_v60 = vsel %vm931_vm15, %v943_v48, %v945_v53  ;;  %v971_v62 = vsel %vm324_vm3, %v968_v49, %v970_v37 }
 0x1ae   : > { %v980_v63 = vsel %vm324_vm3, %v970_v37, 0.0  ;;  %v988_v0 = vmax.f32 %v946_v60, %v922_v35  ;;  %v942_v1 = vsel %vm931_vm15, %v939_v40, %v941_v58  ;;  %v944_v2 = vsel %vm931_vm15, %v941_v58, %v943_v48 }
 0x1af   : > { %1000 = vst.msk [vmem:[%s1671_s27 + $0x18] sm:$0xff] %vm511_vm11, %v992_v59  ;;  %v967_v3 = vsel %vm324_vm3, %v964_v43, %v966_v44  ;;  %v969_v41 = vsel %vm324_vm3, %v966_v44, %v968_v49  ;;  %v986_v42 = vmax.f32 %v942_v1, %v920_v47  ;;  %v987_v38 = vmax.f32 %v944_v2, %v921_v29 }
 0x1b0   : > { %v996_v36 = vmax.f32 %v988_v0, %v980_v63  ;;  %v993_v39 = vmax.f32 %v985_v45, %v967_v3 }
 0x1b1   : > { %v994_v4 = vmax.f32 %v986_v42, %v969_v41  ;;  %v995_v5 = vmax.f32 %v987_v38, %v971_v62 }
 0x1b2   : > { %1004 = vst.msk [vmem:[%s1671_s27 + $0x38] sm:$0xff] %vm511_vm11, %v996_v36  ;;  %1001 = vst.msk [vmem:[%s1671_s27 + $0x20] sm:$0xff] %vm511_vm11, %v993_v39 }
 0x1b3   : > { %1002 = vst.msk [vmem:[%s1671_s27 + $0x28] sm:$0xff] %vm511_vm11, %v994_v4  ;;  %1003 = vst.msk [vmem:[%s1671_s27 + $0x30] sm:$0xff] %vm511_vm11, %v995_v5 }
 0x1b4 PF: > { %s13_s14 = sadd.s32 1, %s1293_s14   ;;  %s1717_s12 = smov %s1289_s13 }
 0x1b5   : > { %p10_p5 = scmp.ge.s32.totalorder %s13_s14, 4   ;;  %s1718_s13 = smov %s1720_s15 }
 0x1b7   :  { %12 = sbr.rel (!%p10_p5) target bundleno = 2 (0x2), region = 68 }

// kernel: davenet_forward.7
= control target key start
LH: loop header
LB: loop body
LE: loop exit
PB: predicated region body
PF: predicated region fallthrough
CT: control target
= control target key end

     0   :  { %s1307_s12 = smov 0   ;;  %s1309_s13 = smov 0   ;;  %s1694_s0 = inlined_call_operand.vmem [shape: f32[2,32,32], index: 0, kind: input, shape index: {}]   ;;  %s1695_s1 = inlined_call_operand.vmem [shape: bf16[544,64], index: 1, kind: input, shape index: {}]   ;;  %s1696_s2 = inlined_call_operand.vmem [shape: f32[1,64], index: 2, kind: input, shape index: {}]   ;;  %s1697_s3 = inlined_call_operand.vmem [shape: f32[2,32,64], index: 3, kind: output, shape index: {}]  }
   0x1   :  { %s1311_s14 = smov 0  }
   0x2 LB: > { %s25_s15 = sadd.s32 1, %s1278_s13  ;;  %p1085_p0 = scmp.ge.s32.totalorder %s1282_s14, 1  ;;  %s1282_s14 = sphi %s1311_s14, %s13_s14   ;;  %s1278_s13 = sphi %s1309_s13, %s1699_s13   ;;  %s1274_s12 = sphi %s1307_s12, %s1698_s12  }
   0x3   : > { %p27_p1 = scmp.ge.s32.totalorder %s25_s15, 2  ;;  %p168_p2 = scmp.lt.s32.totalorder %s1282_s14, 3 }
   0x5   : > { %s1701_s15 = smov (%p27_p1, %s25_s15), 0  ;;  %p169_p3 = pnand %p1085_p0, %p168_p2 }
   0x6   : > { %p202_p4 = scmp.lt.s32.totalorder (!%p169_p3), %s1274_s12, 1  ;;  %v1226_v0 = vld [vmem:[%s1695_s1 + $0x40] sm:$0xff] (!%p169_p3)   ;;  %vm231_vm0 = vcmask (!%p169_p3), 1043456   ;;  %vm411_vm1 = vcmask (!%p169_p3), 1040384   ;;  %v1228_v2 = vld [vmem:[%s1695_s1 + $0x48] sm:$0xff] (!%p169_p3)   ;;  %vm316_vm2 = vcmask (!%p169_p3), 1044480  }
   0x7   : > { %172 = sbr.rel (%p169_p3) target bundleno = 421 (0x1a5), region = 32  ;;  %v1227_v1 = vld [vmem:[%s1695_s1] sm:$0xff] (!%p169_p3)   ;;  %1131 = vmatprep.subr.bf16.mxu0 (!%p169_p3), %v1226_v0  ;;  %vm266_vm3 = vcmask (!%p169_p3), 1046528   ;;  %vm363_vm4 = vcmask (!%p169_p3), 1042432   ;;  %vm300_vm5 = vsmask.f32 (!%p169_p3), 5376 }
   0x8   : > { %1132 = vmatpush3.bf16.msra.mxu0 (!%p169_p3), %v1227_v1  ;;  %v1229_v10 = vld [vmem:[%s1695_s1 + $0x8] sm:$0xff] (!%p169_p3)   ;;  %vm241_vm6 = vsmask.f32 (!%p169_p3), 7424  ;;  %v1230_v12 = vld [vmem:[%s1695_s1 + $0x50] sm:$0xff] (!%p169_p3)   ;;  %v1231_v14 = vld [vmem:[%s1695_s1 + $0xc0] sm:$0xff] (!%p169_p3)   ;;  %s1284_s17 = smov (!%p169_p3), 64  }
   0x9   : > { %1133 = vmatprep.subr.bf16.mxu0 (!%p169_p3), %v1228_v2  ;;  %v1232_v19 = vld [vmem:[%s1695_s1 + $0x10] sm:$0xff] (!%p169_p3)   ;;  %vm276_vm7 = vsmask.f32 (!%p169_p3), 6400  ;;  %1159 = vmatprep.subr.bf16.mxu1 (!%p169_p3), %v1231_v14  ;;  %vm326_vm8 = vsmask.f32 (!%p169_p3), 4352  ;;  %v1233_v28 = vld [vmem:[%s1695_s1 + $0x80] sm:$0xff] (!%p169_p3)  }
   0xa   : > { %v1234_v29 = vld [vmem:[%s1695_s1 + $0x58] sm:$0xff] (!%p169_p3)   ;;  %v1235_v34 = vld [vmem:[%s1695_s1 + $0xc8] sm:$0xff] (!%p169_p3)   ;;  %1160 = vmatpush3.bf16.msra.mxu1 (!%p169_p3), %v1233_v28  ;;  %vm347_vm9 = vsmask.f32 (!%p169_p3), 3328  ;;  %vm395_vm10 = vsmask.f32 (!%p169_p3), 1280 }
   0xb   : > { %1161 = vmatprep.subr.bf16.mxu1 (!%p169_p3), %v1235_v34  ;;  %v1236_v51 = vld [vmem:[%s1695_s1 + $0x18] sm:$0xff] (!%p169_p3)   ;;  %v1237_v52 = vld [vmem:[%s1695_s1 + $0x88] sm:$0xff] (!%p169_p3)   ;;  %s1285_s23 = smov (!%p169_p3), 32   ;;  %v1238_v61 = vld [vmem:[%s1695_s1 + $0x60] sm:$0xff] (!%p169_p3)   ;;  %vm373_vm11 = vsmask.f32 (!%p169_p3), 2304 }
   0xc   : > { %1134 = vmatpush3.bf16.msra.mxu0 (!%p169_p3), %v1229_v10  ;;  %v1239_v62 = vld [vmem:[%s1695_s1 + $0xd0] sm:$0xff] (!%p169_p3)   ;;  %vm421_vm12 = vsmask.f32 (!%p169_p3), 256  ;;  %s1286_s7 = smov (!%p169_p3), 96   ;;  %v1244_v34 = vld [vmem:[%s1695_s1 + $0x28] sm:$0xff] (!%p169_p3)   ;;  %vm294_vm13 = vcmask (!%p169_p3), 1045504  }
   0xd   : > { %1135 = vmatprep.subr.bf16.mxu0 (!%p169_p3), %v1230_v12  ;;  %vm433_vm14 = vcmask (!%p169_p3), 261120   ;;  %vm438_vm15 = vcmask (!%p169_p3), 523264  }
   0xe   : > { %s1703_s12 = smov (!%p202_p4, %s1274_s12), 1  ;;  %1162 = vmatpush3.bf16.msra.mxu1 %v1237_v52 }
   0xf   : > { %s1129_s20 = sshll.u32 %s1703_s12, 5  ;;  %1163 = vmatprep.subr.bf16.mxu1 %v1239_v62 }
  0x10   : > { %s206_s25 = scalar_lea.vmem %s1694_s0, %s1129_s20  ;;  %1136 = vmatpush3.bf16.msra.mxu0 %v1232_v19  ;;  %v1242_v19 = vld [vmem:[%s1695_s1 + $0x68] sm:$0xff]   ;;  %s221_s4 = scalar_lea.vmem %s1697_s3, %s1129_s20 }
  0x11   : > { %v223_v3 = vld [vmem:[%s206_s25] sm:$0xff]  ;;  %v224_v4 = vld [vmem:[%s206_s25 + $0x8] sm:$0xff]  ;;  %v225_v5 = vld [vmem:[%s206_s25 + $0x10] sm:$0xff]  ;;  %1137 = vmatprep.subr.bf16.mxu0 %v1234_v29 }
  0x12   : > { %v226_v6 = vld [vmem:[%s206_s25 + $0x18] sm:$0xff]  ;;  %v227_v7 = vpack.c.bf16 %v224_v4, %v223_v3  ;;  %v1240_v3 = vld [vmem:[%s1695_s1 + $0x20] sm:$0xff]  }
  0x13   : > { %v228_v8 = vpack.c.bf16 %v226_v6, %v225_v5 }
  0x14   : > { %v232_v9 = vrot.slane %v227_v7, 4  ;;  %1138 = vmatpush3.bf16.msra.mxu0 %v1236_v51 }
  0x15   : > { %v233_v11 = vrot.slane %v228_v8, 4  ;;  %1139 = vmatprep.subr.bf16.mxu0 %v1238_v61  ;;  %v1251_v61 = vld [vmem:[%s1695_s1 + $0xe8] sm:$0xff]  }
  0x16   : > { %v1349_v13 = vsel %vm231_vm0, 0, %v232_v9 }
  0x17   : > { %v1355_v15 = vsel %vm231_vm0, %v232_v9, %v233_v11  ;;  %v1358_v16 = vsel %vm231_vm0, %v233_v11, 0  ;;  %v412_v17 = vrot.slane %v1349_v13, 7  ;;  %v317_v18 = vrot.slane %v1349_v13, 3 }
  0x18   : > { %v413_v20 = vrot.slane %v1355_v15, 7  ;;  %v318_v21 = vrot.slane %v1355_v15, 3  ;;  %v267_v22 = vrot.slane %v1349_v13, 1  ;;  %v268_v23 = vrot.slane %v1355_v15, 1  ;;  %1140 = vmatpush3.bf16.msra.mxu0 %v1240_v3 }
  0x19   : > { %v1370_v24 = vshrl.u32 %v1349_v13, 16  ;;  %v1373_v25 = vshll.u32 %v1349_v13, 16  ;;  %v1376_v26 = vshll.u32 %v1355_v15, 16  ;;  %v1379_v27 = vshrl.u32 %v1355_v15, 16  ;;  %1141 = vmatprep.subr.bf16.mxu0 %v1242_v19 }
  0x1a   : > { %v414_v30 = vsel %vm411_vm1, %v412_v17, %v413_v20  ;;  %v319_v31 = vsel %vm316_vm2, %v317_v18, %v318_v21  ;;  %v269_v32 = vsel %vm266_vm3, %v267_v22, %v268_v23  ;;  %v364_v33 = vrot.slane %v1349_v13, 5  ;;  %v1241_v18 = vld [vmem:[%s1695_s1 + $0x90] sm:$0xff]  }
  0x1b   : > { %417 = vrot.lane.b32.xlu0 %v414_v30, %s1284_s17  ;;  %322 = vrot.lane.b32.xlu1 %v319_v31, %s1284_s17  ;;  %v301_v35 = vrot.slane %v1370_v24, 2  ;;  %v302_v36 = vrot.slane %v1373_v25, 3  ;;  %v304_v37 = vrot.slane %v1379_v27, 2  ;;  %v305_v38 = vrot.slane %v1376_v26, 3 }
  0x1c   : > { %v365_v39 = vrot.slane %v1355_v15, 5  ;;  %v246_v40 = vrot.slane %v1373_v25, 1  ;;  %v251_v41 = vrot.slane %v1376_v26, 1  ;;  %v277_v42 = vrot.slane %v1370_v24, 1  ;;  %1164 = vmatpush3.bf16.msra.mxu1 %v1241_v18  ;;  %1142 = vmatpush3.bf16.msra.mxu0 %v1244_v34 }
  0x1d   : > { %v303_v43 = vor.u32 %v302_v36, %v301_v35  ;;  %v1410_v44 = vor.u32 %v305_v38, %v304_v37  ;;  %v278_v45 = vrot.slane %v1373_v25, 2  ;;  %v280_v46 = vrot.slane %v1379_v27, 1 }
  0x1e   : > { %v366_v47 = vsel %vm363_vm4, %v364_v33, %v365_v39  ;;  %v247_v48 = vor.u32 %v246_v40, %v1370_v24  ;;  %v281_v49 = vrot.slane %v1376_v26, 2  ;;  %v327_v50 = vrot.slane %v1370_v24, 3  ;;  %v1243_v33 = vld [vmem:[%s1695_s1 + $0xd8] sm:$0xff]  }
  0x1f   : > { %272 = vrot.lane.b32.xlu1 %v269_v32, %s1284_s17  ;;  %v307_v53 = vsel %vm300_vm5, %v303_v43, %v1410_v44  ;;  %v279_v54 = vor.u32 %v278_v45, %v277_v42  ;;  %v328_v55 = vrot.slane %v1373_v25, 4  ;;  %v330_v56 = vrot.slane %v1379_v27, 3  ;;  %v1245_v40 = vld [vmem:[%s1695_s1 + $0x98] sm:$0xff]   ;;  %1165 = vmatprep.subr.bf16.mxu1 %v1243_v33 }
  0x20   : > { %312 = vrot.lane.b32.xlu0 %v307_v53, %s1285_s23  ;;  %v252_v57 = vsel %vm241_vm6, %v247_v48, %v251_v41  ;;  %v1435_v58 = vor.u32 %v281_v49, %v280_v46  ;;  %v331_v59 = vrot.slane %v1376_v26, 4  ;;  %v348_v60 = vrot.slane %v1370_v24, 4  ;;  %1166 = vmatpush3.bf16.msra.mxu1 %v1245_v40  ;;  %v1248_v53 = vld [vmem:[%s1695_s1 + $0x30] sm:$0xff]  }
  0x21   : > { %v329_v63 = vor.u32 %v328_v55, %v327_v50  ;;  %v349_v0 = vrot.slane %v1373_v25, 5  ;;  %v351_v1 = vrot.slane %v1379_v27, 4  ;;  %v352_v2 = vrot.slane %v1376_v26, 5 }
  0x22   : > { %v1451_v4 = vor.u32 %v331_v59, %v330_v56  ;;  %v396_v5 = vrot.slane %v1370_v24, 6  ;;  %v397_v6 = vrot.slane %v1373_v25, 7  ;;  %v283_v7 = vsel %vm276_vm7, %v279_v54, %v1435_v58  ;;  %v1249_v56 = vld [vmem:[%s1695_s1 + $0xa0] sm:$0xff]  }
  0x23   : > { %369 = vrot.lane.b32.xlu1 %v366_v47, %s1284_s17  ;;  %v350_v8 = vor.u32 %v349_v0, %v348_v60  ;;  %v399_v9 = vrot.slane %v1379_v27, 6  ;;  %v400_v10 = vrot.slane %v1376_v26, 7  ;;  %v1463_v12 = vor.u32 %v352_v2, %v351_v1  ;;  %v1247_v47 = vld [vmem:[%s1695_s1 + $0xe0] sm:$0xff]   ;;  %v1252_v0 = vld [vmem:[%s1695_s1 + $0x38] sm:$0xff]   ;;  %v1253_v2 = vld [vmem:[%s1695_s1 + $0xa8] sm:$0xff]  }
  0x24   : > { %260 = vrot.lane.b32.xlu0 %v252_v57, %s1285_s23  ;;  %v333_v11 = vsel %vm326_vm8, %v329_v63, %v1451_v4  ;;  %v374_v14 = vrot.slane %v1370_v24, 5  ;;  %v375_v17 = vrot.slane %v1373_v25, 6  ;;  %v398_v22 = vor.u32 %v397_v6, %v396_v5  ;;  %1167 = vmatprep.subr.bf16.mxu1 %v1247_v47  ;;  %v1250_v57 = vld [vmem:[%s1695_s1 + $0x78] sm:$0xff]   ;;  %v1254_v6 = vld [vmem:[%s1695_s1 + $0xf0] sm:$0xff]  }
  0x25   : > { %v1473_v28 = vor.u32 %v400_v10, %v399_v9  ;;  %v377_v29 = vrot.slane %v1379_v27, 5  ;;  %v378_v30 = vrot.slane %v1376_v26, 6  ;;  %v423_v31 = vrot.slane %v1379_v27, 7  ;;  %1168 = vmatpush3.bf16.msra.mxu1 %v1249_v56  ;;  %v1259_v56 = vld [vmem:[%s1695_s1 + $0x108] sm:$0xff]  }
  0x26   : > { %v1480_v25 = vshll.u32 %v1358_v16, 16  ;;  %v1483_v32 = vshrl.u32 %v1358_v16, 16  ;;  %v354_v35 = vsel %vm347_vm9, %v350_v8, %v1463_v12  ;;  %v376_v36 = vor.u32 %v375_v17, %v374_v14  ;;  %1169 = vmatprep.subr.bf16.mxu1 %v1251_v61 }
  0x27   : > { %290 = vrot.lane.b32.xlu1 %v283_v7, %s1286_s7  ;;  %v1494_v37 = vor.u32 %v378_v30, %v377_v29  ;;  %v422_v38 = vrot.slane %v1370_v24, 7  ;;  %v402_v42 = vsel %vm395_vm10, %v398_v22, %v1473_v28  ;;  %v424_v43 = vor.u32 %v423_v31, %v1376_v26  ;;  %v1246_v24 = vld [vmem:[%s1695_s1 + $0x70] sm:$0xff]   ;;  %v1257_v22 = vld [vmem:[%s1695_s1 + $0xb8] sm:$0xff]  }
  0x28   : > { %338 = vrot.lane.b32.xlu0 %v333_v11, %s1286_s7  ;;  %v308_v45 = vrot.slane %v1483_v32, 2  ;;  %v309_v46 = vrot.slane %v1480_v25, 3  ;;  %1143 = vmatprep.subr.bf16.mxu0 %v1246_v24  ;;  %v255_v49 = vor.u32 %v1379_v27, %v251_v41  ;;  %v258_v50 = vrot.slane %v1480_v25, 1  ;;  %v1256_v11 = vld [vmem:[%s1695_s1 + $0xf8] sm:$0xff]  }
  0x29   : > { %v380_v48 = vsel %vm373_vm11, %v376_v36, %v1494_v37  ;;  %v425_v51 = vsel %vm421_vm12, %v422_v38, %v424_v43  ;;  %v270_v54 = vrot.slane %v1358_v16, 1  ;;  %v320_v55 = vrot.slane %v1358_v16, 3  ;;  %1144 = vmatpush3.bf16.msra.mxu0 %v1248_v53  ;;  %1170 = vmatpush3.bf16.msra.mxu1 %v1253_v2 }
  0x2a   : > { %v310_v52 = vor.u32 %v309_v46, %v308_v45  ;;  %v286_v26 = vrot.slane %v1483_v32, 1  ;;  %v287_v41 = vrot.slane %v1480_v25, 2  ;;  %v259_v59 = vsel %vm241_vm6, %v255_v49, %v258_v50  ;;  %1145 = vmatprep.subr.bf16.mxu0 %v1250_v57  ;;  %1171 = vmatprep.subr.bf16.mxu1 %v1254_v6 }
  0x2b   : > { %359 = vrot.lane.b32.xlu1 %v354_v35, %s1285_s23  ;;  %v334_v60 = vrot.slane %v1483_v32, 3  ;;  %v335_v63 = vrot.slane %v1480_v25, 4  ;;  %v355_v1 = vrot.slane %v1483_v32, 4  ;;  %v356_v5 = vrot.slane %v1480_v25, 5 }
  0x2c   : > { %407 = vrot.lane.b32.xlu0 %v402_v42, %s1285_s23  ;;  %v311_v62 = vsel %vm300_vm5, %v1410_v44, %v310_v52  ;;  %v271_v44 = vsel %vm266_vm3, %v268_v23, %v270_v54  ;;  %v288_v3 = vor.u32 %v287_v41, %v286_v26  ;;  %v321_v7 = vsel %vm316_vm2, %v318_v21, %v320_v55  ;;  %v1255_v23 = vld [vmem:[%s1695_s1 + $0xb0] sm:$0xff]   ;;  %v1576_v21 = vld [vmem:[%s1695_s1 + $0x100] sm:$0xff]  }
  0x2d   : > { %1146 = vmatpush3.bf16.msra.mxu0 %v1252_v0  ;;  %v336_v8 = vor.u32 %v335_v63, %v334_v60  ;;  %v403_v9 = vrot.slane %v1483_v32, 6  ;;  %v404_v10 = vrot.slane %v1480_v25, 7  ;;  %v357_v17 = vor.u32 %v356_v5, %v355_v1  ;;  %1172 = vmatpush3.bf16.msra.mxu1 %v1255_v23 }
  0x2e   : > { %v289_v14 = vsel %vm276_vm7, %v1435_v58, %v288_v3  ;;  %1191 = vmatprep.subr.bf16.mxu0 %v1576_v21  ;;  %1173 = vmatprep.subr.bf16.mxu1 %v1256_v11  ;;  %v367_v29 = vrot.slane %v1358_v16, 5  ;;  %v382_v30 = vrot.slane %v1480_v25, 6  ;;  %v415_v34 = vrot.slane %v1358_v16, 7 }
  0x2f   : > { %385 = vrot.lane.b32.xlu1 %v380_v48, %s1286_s7  ;;  %v337_v18 = vsel %vm326_vm8, %v1451_v4, %v336_v8  ;;  %v405_v19 = vor.u32 %v404_v10, %v403_v9  ;;  %v358_v58 = vsel %vm347_vm9, %v1463_v12, %v357_v17  ;;  %v381_v4 = vrot.slane %v1483_v32, 5 }
  0x30   : > { %429 = vrot.lane.b32.xlu0 %v425_v51, %s1286_s7  ;;  %v426_v35 = vrot.slane %v1483_v32, 7  ;;  %v368_v12 = vsel %vm363_vm4, %v365_v39, %v367_v29  ;;  %v416_v38 = vsel %vm411_vm1, %v413_v20, %v415_v34  ;;  %v295_v20 = vrot.slane %v1349_v13, 2 }
  0x31   : > { %v406_v33 = vsel %vm395_vm10, %v1473_v28, %v405_v19  ;;  %1174 = vmatpush3.bf16.msra.mxu1 %v1257_v22  ;;  %v383_v36 = vor.u32 %v382_v30, %v381_v4  ;;  %vm443_vm2 = vcmask 785408   ;;  %v342_v47 = vrot.slane %v1349_v13, 4 }
  0x32   : > { %v427_v28 = vor.u32 %v426_v35, %v1480_v25  ;;  %v296_v25 = vrot.slane %v1355_v15, 2  ;;  %v343_v48 = vrot.slane %v1355_v15, 4  ;;  %v390_v49 = vrot.slane %v1349_v13, 6 }
  0x33   : > { %262 = vrot.lane.b32.xlu1 %v259_v59, %s1285_s23  ;;  %v384_v32 = vsel %vm373_vm11, %v1494_v37, %v383_v36  ;;  %v391_v50 = vrot.slane %v1355_v15, 6  ;;  %vm389_vm4 = vcmask 1041408   ;;  %v298_v5 = vrot.slane %v1358_v16, 2 }
  0x34   : > { %314 = vrot.lane.b32.xlu0 %v311_v62, %s1285_s23  ;;  %v428_v40 = vsel %vm421_vm12, %v423_v31, %v427_v28  ;;  %v297_v46 = vsel %vm294_vm13, %v295_v20, %v296_v25  ;;  %v344_v41 = vsel %vm231_vm0, %v342_v47, %v343_v48  ;;  %v345_v22 = vrot.slane %v1358_v16, 4 }
  0x35   : > { %v299_v8 = vsel %vm294_vm13, %v296_v25, %v298_v5  ;;  %v393_v29 = vrot.slane %v1358_v16, 6 }
  0x36   : > { %v346_v30 = vsel %vm231_vm0, %v343_v48, %v345_v22 }
  0x37   : > { %274 = vrot.lane.b32.xlu1 %v271_v44, %s1284_s17  ;;  %v394_v34 = vsel %vm389_vm4, %v391_v50, %v393_v29 }
  0x38   : > { %324 = vrot.lane.b32.xlu0 %v321_v7, %s1284_s17 }
  0x3b   : > { %292 = vrot.lane.b32.xlu1 %v289_v14, %s1286_s7 }
  0x3c   : > { %340 = vrot.lane.b32.xlu0 %v337_v18, %s1286_s7 }
  0x3f   : > { %361 = vrot.lane.b32.xlu1 %v358_v58, %s1285_s23 }
  0x40   : > { %409 = vrot.lane.b32.xlu0 %v406_v33, %s1285_s23 }
  0x43   : > { %371 = vrot.lane.b32.xlu1 %v368_v12, %s1284_s17 }
  0x44   : > { %419 = vrot.lane.b32.xlu0 %v416_v38, %s1284_s17 }
  0x47   : > { %387 = vrot.lane.b32.xlu1 %v384_v32, %s1286_s7 }
  0x48   : > { %431 = vrot.lane.b32.xlu0 %v428_v40, %s1286_s7 }
  0x8d   : > { %v418_v39 = vpop.permute.xlu0 %417  ;;  %v323_v42 = vpop.permute.xlu1 %322 }
  0x91   : > { %v273_v43 = vpop.permute.xlu1 %272 }
  0x92   : > { %v313_v45 = vpop.permute.xlu0 %312 }
  0x93   : > { %v452_v31 = vsel %vm433_vm14, %v297_v46, %v313_v45 }
  0x94   : > { %v457_v54 = vsel %vm438_vm15, %v452_v31, %v323_v42 }
  0x95   : > { %v370_v37 = vpop.permute.xlu1 %369 }
  0x96   : > { %v261_v27 = vpop.permute.xlu0 %260 }
  0x97   : > { %v435_v24 = vsel %vm433_vm14, %v1349_v13, %v261_v27  ;;  %v392_v13 = vsel %vm389_vm4, %v390_v49, %v391_v50 }
  0x98   : > { %v440_v52 = vsel %vm438_vm15, %v435_v24, %v273_v43 }
  0x99   : > { %v291_v51 = vpop.permute.xlu1 %290 }
  0x9a   : > { %v339_v53 = vpop.permute.xlu0 %338  ;;  %v445_v55 = vsel %vm443_vm2, %v440_v52, %v291_v51 }
  0x9b   : > { %v461_v26 = vsel %vm443_vm2, %v457_v54, %v339_v53 }
  0x9c   : > { %813 = vmatprep.mubr.bf16.mxu0 %v461_v26 }
  0x9d   : > { %814 = vmatmul.mubr.bf16.vlgmr.msra.gmra.mrb[0].mxu0 %v445_v55  ;;  %v360_v57 = vpop.permute.xlu1 %359 }
  0x9e   : > { %v468_v59 = vsel %vm433_vm14, %v344_v41, %v360_v57  ;;  %v408_v60 = vpop.permute.xlu0 %407  ;;  %1192 = vmatpush3.bf16.msra.mxu0 %v1576_v21 }
  0x9f   : > { %v484_v61 = vsel %vm433_vm14, %v392_v13, %v408_v60  ;;  %1193 = vmatprep.subr.bf16.mxu0 %v1259_v56  ;;  %v473_v63 = vsel %vm438_vm15, %v468_v59, %v370_v37 }
  0xa0   : > { %v489_v1 = vsel %vm438_vm15, %v484_v61, %v418_v39 }
  0xa1   : > { %v386_v62 = vpop.permute.xlu1 %385 }
  0xa2   : > { %v430_v0 = vpop.permute.xlu0 %429  ;;  %v477_v2 = vsel %vm443_vm2, %v473_v63, %v386_v62  ;;  %1194 = vmatpush3.bf16.msra.mxu0 %v1259_v56 }
  0xa3   : > { %v493_v44 = vsel %vm443_vm2, %v489_v1, %v430_v0 }
  0xa4   : > { %862 = vmatprep.mubr.bf16.mxu1 %v493_v44 }
  0xa5   : > { %863 = vmatmul.mubr.bf16.vlgmr.msra.gmra.mrb[0].mxu1 %v477_v2  ;;  %v263_v3 = vpop.permute.xlu1 %262 }
  0xa6   : > { %v315_v6 = vpop.permute.xlu0 %314  ;;  %v437_v10 = vsel %vm433_vm14, %v1355_v15, %v263_v3 }
  0xa7   : > { %v455_v23 = vsel %vm433_vm14, %v299_v8, %v315_v6 }
  0xa9   : > { %v275_v7 = vpop.permute.xlu1 %274 }
  0xaa   : > { %v325_v9 = vpop.permute.xlu0 %324  ;;  %v442_v11 = vsel %vm438_vm15, %v437_v10, %v275_v7 }
  0xab   : > { %v459_v14 = vsel %vm438_vm15, %v455_v23, %v325_v9 }
  0xad   : > { %v293_v21 = vpop.permute.xlu1 %292 }
  0xae   : > { %v341_v17 = vpop.permute.xlu0 %340  ;;  %v448_v18 = vsel %vm443_vm2, %v442_v11, %v293_v21 }
  0xaf   : > { %v464_v19 = vsel %vm443_vm2, %v459_v14, %v341_v17 }
  0xb0   : > { %821 = vmatprep.mubr.bf16.mxu0 %v464_v19 }
  0xb1   : > { %822 = vmatmul.mubr.bf16.gmra.mrb[4].mxu0 %v448_v18  ;;  %v362_v58 = vpop.permute.xlu1 %361 }
  0xb2   : > { %v410_v4 = vpop.permute.xlu0 %409  ;;  %1195 = vmatprep.mubr.msk.bf16.mxu0 %vm433_vm14, %v1355_v15  ;;  %v471_v12 = vsel %vm433_vm14, %v346_v30, %v362_v58 }
  0xb3   : > { %v487_v36 = vsel %vm433_vm14, %v394_v34, %v410_v4 }
  0xb5   : > { %v372_v33 = vpop.permute.xlu1 %371 }
  0xb6   : > { %v420_v35 = vpop.permute.xlu0 %419  ;;  %v475_v38 = vsel %vm438_vm15, %v471_v12, %v372_v33 }
  0xb7   : > { %v491_v32 = vsel %vm438_vm15, %v487_v36, %v420_v35 }
  0xb9   : > { %1196 = vmatmul.mubr.msk.bf16.vlgmr.msra.gmra.mrb[8].mxu0 %vm433_vm14, %v1358_v16  ;;  %v388_v28 = vpop.permute.xlu1 %387  ;;  %v1090_v16 = vld [vmem:[%s1696_s2] ss:$0 sm:$0xff] }
  0xba   : > { %v432_v40 = vpop.permute.xlu0 %431  ;;  %v480_v15 = vsel %vm443_vm2, %v475_v38, %v388_v28 }
  0xbb   : > { %v496_v39 = vsel %vm443_vm2, %v491_v32, %v432_v40 }
  0xbc   : > { %870 = vmatprep.mubr.bf16.mxu1 %v496_v39 }
  0xbd   : > { %871 = vmatmul.mubr.bf16.gmra.mrb[4].mxu1 %v480_v15 }
 0x170   : > { %v1147_v42 = vpop.f32.mrb[0].mxu0 }
 0x171   : > { %v1148_v20 = vpop.f32.mrb[1].mxu0 }
 0x172   : > { %v1149_v25 = vadd.f32 %v1148_v20, %v1147_v42  ;;  %v1150_v43 = vpop.f32.mrb[2].mxu0 }
 0x173   : > { %v1151_v45 = vpop.f32.mrb[3].mxu0 }
 0x174   : > { %v1152_v46 = vadd.f32 %v1151_v45, %v1150_v43  ;;  %v816_v31 = vadd.f32 %v1149_v25, %v1090_v16 }
 0x176   : > { %v819_v49 = vadd.f32 %v1152_v46, %v1090_v16 }
 0x178   : > { %v1175_v37 = vpop.f32.mrb[0].mxu1 }
 0x179   : > { %v1176_v27 = vpop.f32.mrb[1].mxu1 }
 0x17a   : > { %v1177_v24 = vadd.f32 %v1176_v27, %v1175_v37  ;;  %v1178_v47 = vpop.f32.mrb[2].mxu1 }
 0x17b   : > { %v1179_v48 = vpop.f32.mrb[3].mxu1 }
 0x17c   : > { %v1180_v50 = vadd.f32 %v1179_v48, %v1178_v47  ;;  %v865_v51 = vadd.f32 %v1177_v24, %v816_v31 }
 0x17e   : > { %v868_v52 = vadd.f32 %v1180_v50, %v819_v49 }
 0x184   : > { %v1153_v53 = vpop.f32.mrb[4].mxu0 }
 0x185   : > { %v1154_v54 = vpop.f32.mrb[5].mxu0 }
 0x186   : > { %v1155_v55 = vadd.f32 %v1154_v54, %v1153_v53  ;;  %v1156_v26 = vpop.f32.mrb[6].mxu0 }
 0x187   : > { %v1157_v41 = vpop.f32.mrb[7].mxu0 }
 0x188   : > { %v1158_v56 = vadd.f32 %v1157_v41, %v1156_v26  ;;  %v824_v2 = vadd.f32 %v1155_v55, %v1090_v16 }
 0x18a   : > { %v827_v21 = vadd.f32 %v1158_v56, %v1090_v16 }
 0x18c   : > { %v1197_v13 = vpop.f32.mrb[8].mxu0 }
 0x18d   : > { %v913_v57 = vpop.f32.mrb[9].mxu0 }
 0x18e   : > { %v914_v59 = vadd.f32 %v913_v57, %v865_v51  ;;  %v1198_v60 = vpop.f32.mrb[10].mxu0 }
 0x18f   : > { %v916_v61 = vpop.f32.mrb[11].mxu0 }
 0x190   : > { %v928_v62 = vmax.f32 %v914_v59, 0.0  ;;  %v917_v63 = vadd.f32 %v916_v61, %v868_v52  ;;  %v1181_v0 = vpop.f32.mrb[4].mxu1 }
 0x191   : > { %v1182_v1 = vpop.f32.mrb[5].mxu1 }
 0x192   : > { %v937_v44 = vrot.slane %v928_v62, 7  ;;  %v929_v3 = vmax.f32 %v917_v63, 0.0  ;;  %v1183_v5 = vadd.f32 %v1182_v1, %v1181_v0  ;;  %v1184_v6 = vpop.f32.mrb[6].mxu1  ;;  %v950_v7 = vrot.slane %v928_v62, 1 }
 0x193   : > { %v1185_v8 = vpop.f32.mrb[7].mxu1 }
 0x194   : > { %v948_v9 = vsel %vm411_vm1, 0.0, %v937_v44  ;;  %v938_v10 = vrot.slane %v929_v3, 7  ;;  %v951_v23 = vrot.slane %v929_v3, 1  ;;  %v873_v11 = vadd.f32 %v1183_v5, %v824_v2 }
 0x195   : > { %v962_v14 = vmax.f32 %v948_v9, %v928_v62  ;;  %v1186_v17 = vadd.f32 %v1185_v8, %v1184_v6 }
 0x196   : > { %v939_v18 = vsel %vm411_vm1, %v937_v44, %v938_v10  ;;  %v952_v19 = vsel %vm266_vm3, %v950_v7, %v951_v23  ;;  %v922_v22 = vadd.f32 %v1197_v13, %v873_v11 }
 0x197   : > { %v963_v58 = vmax.f32 %v939_v18, %v929_v3  ;;  %v966_v29 = vmax.f32 %v962_v14, %v952_v19  ;;  %v876_v4 = vadd.f32 %v1186_v17, %v827_v21 }
 0x198   : > { %v930_v30 = vmax.f32 %v922_v22, 0.0 }
 0x199   : > { %970 = vst.msk [vmem:[%s221_s4] sm:$0xff] %vm438_vm15, %v966_v29  ;;  %v925_v33 = vadd.f32 %v1198_v60, %v876_v4 }
 0x19a   : > { %v940_v34 = vrot.slane %v930_v30, 7  ;;  %v953_v35 = vrot.slane %v930_v30, 1 }
 0x19b   : > { %v931_v12 = vmax.f32 %v925_v33, 0.0 }
 0x19c   : > { %v941_v36 = vsel %vm411_vm1, %v938_v10, %v940_v34  ;;  %v954_v38 = vsel %vm266_vm3, %v951_v23, %v953_v35 }
 0x19d   : > { %v964_v28 = vmax.f32 %v941_v36, %v930_v30  ;;  %v967_v32 = vmax.f32 %v963_v58, %v954_v38  ;;  %v942_v40 = vrot.slane %v931_v12, 7  ;;  %v955_v15 = vrot.slane %v931_v12, 1 }
 0x19f   : > { %971 = vst.msk [vmem:[%s221_s4 + $0x8] sm:$0xff] %vm438_vm15, %v967_v32  ;;  %v943_v39 = vsel %vm411_vm1, %v940_v34, %v942_v40  ;;  %v956_v42 = vsel %vm266_vm3, %v953_v35, %v955_v15  ;;  %v961_v43 = vsel %vm266_vm3, %v955_v15, 0.0 }
 0x1a0   : > { %v965_v20 = vmax.f32 %v943_v39, %v931_v12  ;;  %v968_v25 = vmax.f32 %v964_v28, %v956_v42 }
 0x1a2   : > { %v969_v45 = vmax.f32 %v965_v20, %v961_v43  ;;  %972 = vst.msk [vmem:[%s221_s4 + $0x10] sm:$0xff] %vm438_vm15, %v968_v25 }
 0x1a4   : > { %973 = vst.msk [vmem:[%s221_s4 + $0x18] sm:$0xff] %vm438_vm15, %v969_v45 }
 0x1a5 PF: > { %s13_s14 = sadd.s32 1, %s1282_s14   ;;  %s1698_s12 = smov %s1278_s13 }
 0x1a6   : > { %p10_p5 = scmp.ge.s32.totalorder %s13_s14, 4   ;;  %s1699_s13 = smov %s1701_s15 }
 0x1a8   :  { %12 = sbr.rel (!%p10_p5) target bundleno = 2 (0x2), region = 68 }

// kernel: davenet_forward.8
= control target key start
LH: loop header
LB: loop body
LE: loop exit
PB: predicated region body
PF: predicated region fallthrough
CT: control target
= control target key end

     0   :  { %s1596_s12 = smov 0   ;;  %s1598_s13 = smov 0   ;;  %s1941_s0 = inlined_call_operand.vmem [shape: f32[2,16,64], index: 0, kind: input, shape index: {}]   ;;  %s1942_s1 = inlined_call_operand.vmem [shape: bf16[1088,64], index: 1, kind: input, shape index: {}]   ;;  %s1943_s2 = inlined_call_operand.vmem [shape: f32[1,64], index: 2, kind: input, shape index: {}]   ;;  %s1944_s3 = inlined_call_operand.vmem [shape: f32[2,16,64], index: 3, kind: output, shape index: {}]  }
   0x1   :  { %s1600_s14 = smov 0  }
   0x2 LB: > { %s25_s15 = sadd.s32 1, %s1567_s13  ;;  %p1270_p0 = scmp.ge.s32.totalorder %s1571_s14, 1  ;;  %s1571_s14 = sphi %s1600_s14, %s13_s14   ;;  %s1567_s13 = sphi %s1598_s13, %s1946_s13   ;;  %s1563_s12 = sphi %s1596_s12, %s1945_s12  }
   0x3   : > { %p27_p1 = scmp.ge.s32.totalorder %s25_s15, 2  ;;  %p168_p2 = scmp.lt.s32.totalorder %s1571_s14, 3 }
   0x5   : > { %s1948_s15 = smov (%p27_p1, %s25_s15), 0  ;;  %p169_p3 = pnand %p1270_p0, %p168_p2 }
   0x6   : > { %p202_p4 = scmp.lt.s32.totalorder (!%p169_p3), %s1563_s12, 1  ;;  %v1481_v0 = vld [vmem:[%s1942_s1 + $0x40] sm:$0xff] (!%p169_p3)   ;;  %vm252_vm0 = vsmask.f32 (!%p169_p3), 6400  ;;  %vm228_vm1 = vcmask (!%p169_p3), 1043456   ;;  %v1485_v7 = vld [vmem:[%s1942_s1 + $0x48] sm:$0xff] (!%p169_p3)  }
   0x7   : > { %172 = sbr.rel (%p169_p3) target bundleno = 424 (0x1a8), region = 32  ;;  %1349 = vmatprep.subr.bf16.mxu0 (!%p169_p3), %v1481_v0  ;;  %v1482_v1 = vld [vmem:[%s1942_s1] sm:$0xff] (!%p169_p3)   ;;  %vm282_vm2 = vsmask.f32 (!%p169_p3), 4352  ;;  %vm233_vm3 = vsmask.f32 (!%p169_p3), 7424 }
   0x8   : > { %1350 = vmatpush3.bf16.msra.mxu0 (!%p169_p3), %v1482_v1  ;;  %v1483_v2 = vld [vmem:[%s1942_s1 + $0xc0] sm:$0xff] (!%p169_p3)   ;;  %v1486_v9 = vld [vmem:[%s1942_s1 + $0x8] sm:$0xff] (!%p169_p3)   ;;  %vm268_vm4 = vsmask.f32 (!%p169_p3), 5376  ;;  %v1489_v14 = vld [vmem:[%s1942_s1 + $0x50] sm:$0xff] (!%p169_p3)   ;;  %s1573_s24 = smov (!%p169_p3), 64  }
   0x9   : > { %1371 = vmatprep.subr.bf16.mxu1 (!%p169_p3), %v1483_v2  ;;  %v1484_v6 = vld [vmem:[%s1942_s1 + $0x80] sm:$0xff] (!%p169_p3)   ;;  %1351 = vmatprep.subr.bf16.mxu0 (!%p169_p3), %v1485_v7  ;;  %v1487_v10 = vld [vmem:[%s1942_s1 + $0xc8] sm:$0xff] (!%p169_p3)   ;;  %vm310_vm5 = vsmask.f32 (!%p169_p3), 2304  ;;  %v1490_v23 = vld [vmem:[%s1942_s1 + $0x10] sm:$0xff] (!%p169_p3)   ;;  %vm248_vm9 = vcmask (!%p169_p3), 1046528  }
   0xa   : > { %1372 = vmatpush3.bf16.msra.mxu1 (!%p169_p3), %v1484_v6  ;;  %v1488_v13 = vld [vmem:[%s1942_s1 + $0x88] sm:$0xff] (!%p169_p3)   ;;  %v1491_v24 = vld [vmem:[%s1942_s1 + $0xd0] sm:$0xff] (!%p169_p3)   ;;  %vm296_vm6 = vsmask.f32 (!%p169_p3), 3328  ;;  %vm338_vm7 = vsmask.f32 (!%p169_p3), 256 }
   0xb   : > { %1373 = vmatprep.subr.bf16.mxu1 (!%p169_p3), %v1487_v10  ;;  %v1492_v37 = vld [vmem:[%s1942_s1 + $0x90] sm:$0xff] (!%p169_p3)   ;;  %v1493_v38 = vld [vmem:[%s1942_s1 + $0x58] sm:$0xff] (!%p169_p3)   ;;  %vm324_vm8 = vsmask.f32 (!%p169_p3), 1280  ;;  %v1497_v2 = vld [vmem:[%s1942_s1 + $0x60] sm:$0xff] (!%p169_p3)   ;;  %vm278_vm10 = vcmask (!%p169_p3), 1044480  }
   0xc   : > { %1352 = vmatpush3.bf16.msra.mxu0 (!%p169_p3), %v1486_v9  ;;  %v1494_v51 = vld [vmem:[%s1942_s1 + $0x18] sm:$0xff] (!%p169_p3)   ;;  %v1498_v9 = vld [vmem:[%s1942_s1 + $0x20] sm:$0xff] (!%p169_p3)   ;;  %vm345_vm11 = vcmask (!%p169_p3), 523264   ;;  %vm264_vm12 = vcmask (!%p169_p3), 1045504   ;;  %vm306_vm13 = vcmask (!%p169_p3), 1042432   ;;  %vm334_vm14 = vcmask (!%p169_p3), 1040384  }
   0xd   : > { %1353 = vmatprep.subr.bf16.mxu0 (!%p169_p3), %v1489_v14  ;;  %v1495_v52 = vld [vmem:[%s1942_s1 + $0xd8] sm:$0xff] (!%p169_p3)   ;;  %v1499_v14 = vld [vmem:[%s1942_s1 + $0xe0] sm:$0xff] (!%p169_p3)   ;;  %vm320_vm15 = vcmask (!%p169_p3), 1041408  }
   0xe   : > { %s1950_s12 = smov (!%p202_p4, %s1563_s12), 1  ;;  %1374 = vmatpush3.bf16.msra.mxu1 %v1488_v13  ;;  %v1496_v57 = vld [vmem:[%s1942_s1 + $0x98] sm:$0xff]  }
   0xf   : > { %s1347_s20 = sshll.u32 %s1950_s12, 4  ;;  %1375 = vmatprep.subr.bf16.mxu1 %v1491_v24  ;;  %v1507_v24 = vld [vmem:[%s1942_s1 + $0xf0] sm:$0xff]  }
  0x10   : > { %s206_s25 = scalar_lea.vmem %s1941_s0, %s1347_s20  ;;  %1354 = vmatpush3.bf16.msra.mxu0 %v1490_v23  ;;  %v1506_v23 = vld [vmem:[%s1942_s1 + $0x30] sm:$0xff]   ;;  %s221_s30 = scalar_lea.vmem %s1944_s3, %s1347_s20 }
  0x11   : > { %v223_v3 = vld [vmem:[%s206_s25] sm:$0xff]  ;;  %v224_v4 = vld [vmem:[%s206_s25 + $0x8] sm:$0xff]  ;;  %1355 = vmatprep.subr.bf16.mxu0 %v1493_v38 }
  0x12   : > { %v225_v5 = vpack.c.bf16 %v224_v4, %v223_v3  ;;  %1376 = vmatpush3.bf16.msra.mxu1 %v1492_v37 }
  0x13   : > { %1377 = vmatprep.subr.bf16.mxu1 %v1495_v52 }
  0x14   : > { %v227_v8 = vrot.slane %v225_v5, 4  ;;  %1356 = vmatpush3.bf16.msra.mxu0 %v1494_v51 }
  0x15   : > { %1357 = vmatprep.subr.bf16.mxu0 %v1497_v2  ;;  %v1524_v2 = vld [vmem:[%s1942_s1 + $0x190] sm:$0xff]  }
  0x16   : > { %v1644_v11 = vsel %vm228_vm1, 0, %v227_v8  ;;  %v1647_v12 = vsel %vm228_vm1, %v227_v8, 0  ;;  %1378 = vmatpush3.bf16.msra.mxu1 %v1496_v57 }
  0x17   : > { %v1656_v15 = vshrl.u32 %v1644_v11, 16  ;;  %v1659_v16 = vshll.u32 %v1644_v11, 16  ;;  %v1662_v17 = vshll.u32 %v1647_v12, 16  ;;  %v1665_v18 = vshrl.u32 %v1647_v12, 16  ;;  %1379 = vmatprep.subr.bf16.mxu1 %v1499_v14  ;;  %v1532_v14 = vld [vmem:[%s1942_s1 + $0x1a0] sm:$0xff]  }
  0x18   : > { %1358 = vmatpush3.bf16.msra.mxu0 %v1498_v9  ;;  %v265_v38 = vrot.slane %v1644_v11, 2  ;;  %v336_v57 = vrot.slane %v1647_v12, 7  ;;  %v1529_v9 = vld [vmem:[%s1942_s1 + $0x160] sm:$0xff]  }
  0x19   : > { %v253_v19 = vrot.slane %v1656_v15, 1  ;;  %v254_v20 = vrot.slane %v1659_v16, 2  ;;  %v258_v21 = vrot.slane %v1665_v18, 1  ;;  %v259_v22 = vrot.slane %v1662_v17, 2 }
  0x1a   : > { %v283_v25 = vrot.slane %v1656_v15, 3  ;;  %v284_v26 = vrot.slane %v1659_v16, 4  ;;  %v286_v27 = vrot.slane %v1665_v18, 3  ;;  %v287_v28 = vrot.slane %v1662_v17, 4 }
  0x1b   : > { %v255_v29 = vor.u32 %v254_v20, %v253_v19  ;;  %v260_v30 = vor.u32 %v259_v22, %v258_v21  ;;  %v238_v31 = vrot.slane %v1659_v16, 1  ;;  %v242_v32 = vrot.slane %v1662_v17, 1  ;;  %v1502_v19 = vld [vmem:[%s1942_s1 + $0x28] sm:$0xff]   ;;  %v1505_v22 = vld [vmem:[%s1942_s1 + $0x70] sm:$0xff]  }
  0x1c   : > { %v285_v33 = vor.u32 %v284_v26, %v283_v25  ;;  %v288_v34 = vor.u32 %v287_v28, %v286_v27  ;;  %v269_v35 = vrot.slane %v1656_v15, 2  ;;  %v270_v36 = vrot.slane %v1659_v16, 3  ;;  %v1503_v20 = vld [vmem:[%s1942_s1 + $0xe8] sm:$0xff]   ;;  %v1508_v25 = vld [vmem:[%s1942_s1 + $0xb0] sm:$0xff]   ;;  %v1509_v26 = vld [vmem:[%s1942_s1 + $0x78] sm:$0xff]  }
  0x1d   : > { %v261_v39 = vsel %vm252_vm0, %v255_v29, %v260_v30  ;;  %v239_v40 = vor.u32 %v238_v31, %v1656_v15  ;;  %v272_v41 = vrot.slane %v1665_v18, 2  ;;  %v273_v42 = vrot.slane %v1662_v17, 3  ;;  %v1504_v21 = vld [vmem:[%s1942_s1 + $0xa8] sm:$0xff]   ;;  %v1510_v27 = vld [vmem:[%s1942_s1 + $0x38] sm:$0xff]   ;;  %v1513_v30 = vld [vmem:[%s1942_s1 + $0x140] sm:$0xff]  }
  0x1e   : > { %262 = vrot.lane.b32.xlu0 %v261_v39, %s1573_s24  ;;  %v289_v43 = vsel %vm282_vm2, %v285_v33, %v288_v34  ;;  %v271_v44 = vor.u32 %v270_v36, %v269_v35  ;;  %v311_v45 = vrot.slane %v1656_v15, 5  ;;  %v312_v46 = vrot.slane %v1659_v16, 6  ;;  %v1511_v28 = vld [vmem:[%s1942_s1 + $0xf8] sm:$0xff]   ;;  %v1515_v31 = vld [vmem:[%s1942_s1 + $0x1c0] sm:$0xff]  }
  0x1f   : > { %290 = vrot.lane.b32.xlu1 %v289_v43, %s1573_s24  ;;  %v243_v47 = vsel %vm233_vm3, %v239_v40, %v242_v32  ;;  %v274_v48 = vor.u32 %v273_v42, %v272_v41  ;;  %v314_v49 = vrot.slane %v1665_v18, 5  ;;  %v315_v50 = vrot.slane %v1662_v17, 6  ;;  %v1512_v29 = vld [vmem:[%s1942_s1 + $0xb8] sm:$0xff]  }
  0x20   : > { %v313_v53 = vor.u32 %v312_v46, %v311_v45  ;;  %v297_v54 = vrot.slane %v1656_v15, 4  ;;  %v298_v55 = vrot.slane %v1659_v16, 5  ;;  %v300_v56 = vrot.slane %v1665_v18, 4  ;;  %v1514_v46 = vld [vmem:[%s1942_s1 + $0x100] sm:$0xff]  }
  0x21   : > { %v275_v58 = vsel %vm268_vm4, %v271_v44, %v274_v48  ;;  %v316_v59 = vor.u32 %v315_v50, %v314_v49  ;;  %v301_v60 = vrot.slane %v1662_v17, 5  ;;  %v339_v61 = vrot.slane %v1656_v15, 7  ;;  %v1516_v49 = vld [vmem:[%s1942_s1 + $0x180] sm:$0xff]   ;;  %v1517_v50 = vld [vmem:[%s1942_s1 + $0x148] sm:$0xff]  }
  0x22   : > { %244 = vrot.lane.b32.xlu0 %v243_v47, %s1573_s24  ;;  %v299_v62 = vor.u32 %v298_v55, %v297_v54  ;;  %v340_v63 = vrot.slane %v1665_v18, 7  ;;  %v325_v0 = vrot.slane %v1656_v15, 6  ;;  %v326_v1 = vrot.slane %v1659_v16, 7  ;;  %v1500_v15 = vld [vmem:[%s1942_s1 + $0xa0] sm:$0xff]  }
  0x23   : > { %276 = vrot.lane.b32.xlu1 %v275_v58, %s1573_s24  ;;  %v317_v3 = vsel %vm310_vm5, %v313_v53, %v316_v59  ;;  %v302_v4 = vor.u32 %v301_v60, %v300_v56  ;;  %v328_v5 = vrot.slane %v1665_v18, 6  ;;  %v329_v6 = vrot.slane %v1662_v17, 7  ;;  %1380 = vmatpush3.bf16.msra.mxu1 %v1500_v15  ;;  %v1519_v53 = vld [vmem:[%s1942_s1 + $0x1c8] sm:$0xff]   ;;  %v1521_v60 = vld [vmem:[%s1942_s1 + $0x150] sm:$0xff]  }
  0x24   : > { %v341_v7 = vor.u32 %v340_v63, %v1662_v17  ;;  %v327_v8 = vor.u32 %v326_v1, %v325_v0  ;;  %v1501_v17 = vld [vmem:[%s1942_s1 + $0x68] sm:$0xff]   ;;  %1381 = vmatprep.subr.bf16.mxu1 %v1503_v20  ;;  %v249_v32 = vrot.slane %v1644_v11, 1  ;;  %v250_v33 = vrot.slane %v1647_v12, 1  ;;  %v1522_v1 = vld [vmem:[%s1942_s1 + $0x110] sm:$0xff]  }
  0x25   : > { %v303_v10 = vsel %vm296_vm6, %v299_v62, %v302_v4  ;;  %v330_v13 = vor.u32 %v329_v6, %v328_v5  ;;  %1359 = vmatprep.subr.bf16.mxu0 %v1501_v17  ;;  %v279_v34 = vrot.slane %v1644_v11, 3  ;;  %v280_v35 = vrot.slane %v1647_v12, 3  ;;  %v1518_v58 = vld [vmem:[%s1942_s1 + $0x108] sm:$0xff]   ;;  %v1523_v62 = vld [vmem:[%s1942_s1 + $0x1d0] sm:$0xff]   ;;  %v1527_v5 = vld [vmem:[%s1942_s1 + $0x1d8] sm:$0xff]  }
  0x26   : > { %318 = vrot.lane.b32.xlu0 %v317_v3, %s1573_s24  ;;  %v342_v16 = vsel %vm338_vm7, %v339_v61, %v341_v7  ;;  %1360 = vmatpush3.bf16.msra.mxu0 %v1502_v19  ;;  %v251_v36 = vsel %vm248_vm9, %v249_v32, %v250_v33  ;;  %v266_v39 = vrot.slane %v1647_v12, 2  ;;  %v307_v44 = vrot.slane %v1644_v11, 5  ;;  %v1520_v59 = vld [vmem:[%s1942_s1 + $0x188] sm:$0xff]   ;;  %v1525_v3 = vld [vmem:[%s1942_s1 + $0x158] sm:$0xff]   ;;  %v1537_v19 = vld [vmem:[%s1942_s1 + $0x170] sm:$0xff]  }
  0x27   : > { %304 = vrot.lane.b32.xlu1 %v303_v10, %s1573_s24  ;;  %v331_v18 = vsel %vm324_vm8, %v327_v8, %v330_v13  ;;  %1382 = vmatpush3.bf16.msra.mxu1 %v1504_v21  ;;  %v281_v37 = vsel %vm278_vm10, %v279_v34, %v280_v35  ;;  %v308_v45 = vrot.slane %v1647_v12, 5  ;;  %v335_v56 = vrot.slane %v1644_v11, 7  ;;  %v1526_v7 = vld [vmem:[%s1942_s1 + $0x118] sm:$0xff]   ;;  %v1531_v10 = vld [vmem:[%s1942_s1 + $0x1e0] sm:$0xff]   ;;  %v1533_v15 = vld [vmem:[%s1942_s1 + $0x168] sm:$0xff]  }
  0x28   : > { %1361 = vmatprep.subr.bf16.mxu0 %v1505_v22  ;;  %1383 = vmatprep.subr.bf16.mxu1 %v1507_v24  ;;  %v267_v47 = vsel %vm264_vm12, %v265_v38, %v266_v39  ;;  %v1528_v8 = vld [vmem:[%s1942_s1 + $0x198] sm:$0xff]   ;;  %v1530_v13 = vld [vmem:[%s1942_s1 + $0x120] sm:$0xff]   ;;  %v1534_v17 = vld [vmem:[%s1942_s1 + $0x128] sm:$0xff]   ;;  %v293_v24 = vrot.slane %v1644_v11, 4  ;;  %vm1575_vm0 = vmmov 0  }
  0x29   : > { %v309_v55 = vsel %vm306_vm13, %v307_v44, %v308_v45  ;;  %v337_v0 = vsel %vm334_vm14, %v335_v56, %v336_v57  ;;  %v1539_v20 = vld [vmem:[%s1942_s1 + $0x1f0] sm:$0xff]   ;;  %v1544_v32 = vld [vmem:[%s1942_s1 + $0x1b8] sm:$0xff]   ;;  %v1545_v35 = vld [vmem:[%s1942_s1 + $0x200] sm:$0xff]  }
  0x2a   : > { %343 = vrot.lane.b32.xlu0 %v342_v16, %s1573_s24  ;;  %1362 = vmatpush3.bf16.msra.mxu0 %v1506_v23  ;;  %v1535_v16 = vld [vmem:[%s1942_s1 + $0x1e8] sm:$0xff]   ;;  %v1538_v21 = vld [vmem:[%s1942_s1 + $0x130] sm:$0xff]  }
  0x2b   : > { %332 = vrot.lane.b32.xlu1 %v331_v18, %s1573_s24  ;;  %1384 = vmatpush3.bf16.msra.mxu1 %v1508_v25  ;;  %v1536_v18 = vld [vmem:[%s1942_s1 + $0x1a8] sm:$0xff]   ;;  %v1540_v23 = vld [vmem:[%s1942_s1 + $0x1b0] sm:$0xff]   ;;  %v294_v25 = vrot.slane %v1647_v12, 4 }
  0x2c   : > { %1363 = vmatprep.subr.bf16.mxu0 %v1509_v26  ;;  %1385 = vmatprep.subr.bf16.mxu1 %v1511_v28  ;;  %v1541_v26 = vld [vmem:[%s1942_s1 + $0x178] sm:$0xff]   ;;  %v321_v28 = vrot.slane %v1644_v11, 6  ;;  %v1546_v38 = vld [vmem:[%s1942_s1 + $0x208] sm:$0xff]   ;;  %v1547_v39 = vld [vmem:[%s1942_s1 + $0x210] sm:$0xff]  }
  0x2e   : > { %1364 = vmatpush3.bf16.msra.mxu0 %v1510_v27  ;;  %v1543_v27 = vld [vmem:[%s1942_s1 + $0x1f8] sm:$0xff]  }
  0x2f   : > { %1386 = vmatpush3.bf16.msra.mxu1 %v1512_v29  ;;  %1393 = vmatprep.subr.bf16.mxu0 %v1513_v30  ;;  %v322_v29 = vrot.slane %v1647_v12, 6  ;;  %v1542_v30 = vld [vmem:[%s1942_s1 + $0x138] sm:$0xff]  }
  0x30   : > { %1415 = vmatprep.subr.bf16.mxu1 %v1515_v31  ;;  %v295_v31 = vsel %vm228_vm1, %v293_v24, %v294_v25 }
  0x31   : > { %v323_v33 = vsel %vm320_vm15, %v321_v28, %v322_v29 }
  0x90   : > { %v263_v40 = vpop.permute.xlu0 %262 }
  0x91   : > { %v291_v41 = vpop.permute.xlu1 %290  ;;  %v351_v42 = vsel %vm345_vm11, %v251_v36, %v263_v40  ;;  %v1548_v40 = vld [vmem:[%s1942_s1 + $0x218] sm:$0xff]  }
  0x92   : > { %962 = vmatprep.mubr.bf16.mxu0 %v351_v42  ;;  %v359_v43 = vsel %vm345_vm11, %v281_v37, %v291_v41  ;;  %v1574_v37 = vmov 0.0   ;;  %v1275_v42 = vld [vmem:[%s1943_s2] ss:$0 sm:$0xff] }
  0x93   : > { %1003 = vmatprep.mubr.bf16.mxu1 %v359_v43 }
  0x94   : > { %v245_v48 = vpop.permute.xlu0 %244 }
  0x95   : > { %v277_v51 = vpop.permute.xlu1 %276  ;;  %v347_v52 = vsel %vm345_vm11, %v1644_v11, %v245_v48 }
  0x96   : > { %963 = vmatmul.mubr.bf16.vlgmr.msra.gmra.mrb[0].mxu0 %v347_v52  ;;  %v355_v54 = vsel %vm345_vm11, %v267_v47, %v277_v51 }
  0x97   : > { %1394 = vmatpush3.bf16.msra.mxu0 %v1514_v46  ;;  %1004 = vmatmul.mubr.bf16.vlgmr.msra.gmra.mrb[0].mxu1 %v355_v54 }
  0x98   : > { %1416 = vmatpush3.bf16.msra.mxu1 %v1516_v49  ;;  %1395 = vmatprep.subr.bf16.mxu0 %v1517_v50  ;;  %v319_v61 = vpop.permute.xlu0 %318 }
  0x99   : > { %1417 = vmatprep.subr.bf16.mxu1 %v1519_v53  ;;  %v367_v63 = vsel %vm345_vm11, %v309_v55, %v319_v61  ;;  %v305_v22 = vpop.permute.xlu1 %304 }
  0x9a   : > { %1044 = vmatprep.mubr.bf16.mxu0 %v367_v63  ;;  %v363_v11 = vsel %vm345_vm11, %v295_v31, %v305_v22 }
  0x9b   : > { %1396 = vmatpush3.bf16.msra.mxu0 %v1518_v58 }
  0x9c   : > { %1418 = vmatpush3.bf16.msra.mxu1 %v1520_v59  ;;  %1397 = vmatprep.subr.bf16.mxu0 %v1521_v60  ;;  %v344_v4 = vpop.permute.xlu0 %343 }
  0x9d   : > { %1419 = vmatprep.subr.bf16.mxu1 %v1523_v62  ;;  %v375_v6 = vsel %vm345_vm11, %v337_v0, %v344_v4  ;;  %v333_v34 = vpop.permute.xlu1 %332 }
  0x9e   : > { %1085 = vmatprep.mubr.bf16.mxu1 %v375_v6  ;;  %v371_v36 = vsel %vm345_vm11, %v323_v33, %v333_v34 }
  0x9f   : > { %1398 = vmatpush3.bf16.msra.mxu0 %v1522_v1 }
  0xa0   : > { %1420 = vmatpush3.bf16.msra.mxu1 %v1524_v2  ;;  %1399 = vmatprep.subr.bf16.mxu0 %v1525_v3 }
  0xa1   : > { %1421 = vmatprep.subr.bf16.mxu1 %v1527_v5 }
  0xa3   : > { %1400 = vmatpush3.bf16.msra.mxu0 %v1526_v7 }
  0xa4   : > { %1422 = vmatpush3.bf16.msra.mxu1 %v1528_v8  ;;  %1401 = vmatprep.subr.bf16.mxu0 %v1529_v9 }
  0xa5   : > { %1423 = vmatprep.subr.bf16.mxu1 %v1531_v10 }
  0xa7   : > { %1402 = vmatpush3.bf16.msra.mxu0 %v1530_v13 }
  0xa8   : > { %1424 = vmatpush3.bf16.msra.mxu1 %v1532_v14  ;;  %1403 = vmatprep.subr.bf16.mxu0 %v1533_v15 }
  0xa9   : > { %1425 = vmatprep.subr.bf16.mxu1 %v1535_v16 }
  0xab   : > { %1404 = vmatpush3.bf16.msra.mxu0 %v1534_v17 }
  0xac   : > { %1426 = vmatpush3.bf16.msra.mxu1 %v1536_v18  ;;  %1405 = vmatprep.subr.bf16.mxu0 %v1537_v19 }
  0xad   : > { %1427 = vmatprep.subr.bf16.mxu1 %v1539_v20 }
  0xaf   : > { %1406 = vmatpush3.bf16.msra.mxu0 %v1538_v21 }
  0xb0   : > { %1428 = vmatpush3.bf16.msra.mxu1 %v1540_v23  ;;  %1407 = vmatprep.subr.bf16.mxu0 %v1541_v26 }
  0xb1   : > { %1429 = vmatprep.subr.bf16.mxu1 %v1543_v27 }
  0xb3   : > { %1408 = vmatpush3.bf16.msra.mxu0 %v1542_v30 }
  0xb4   : > { %1430 = vmatpush3.bf16.msra.mxu1 %v1544_v32  ;;  %1442 = vmatprep.subr.bf16.mxu0 %v1574_v37 }
  0xb6   : > { %1045 = vmatmul.mubr.bf16.vlgmr.msra.gmra.mrb[4].mxu0 %v363_v11 }
  0xb7   : > { %1443 = vmatpush3.bf16.msra.mxu0 %v1545_v35  ;;  %1086 = vmatmul.mubr.bf16.vlgmr.msra.gmra.mrb[4].mxu1 %v371_v36 }
  0xb8   : > { %1444 = vmatprep.subr.bf16.mxu0 %v1574_v37  ;;  %1450 = vmatprep.mubr.msk.bf16.mxu0 %vm1575_vm0, %v1574_v37 }
  0xbb   : > { %1445 = vmatpush3.bf16.msra.mxu0 %v1546_v38 }
  0xbc   : > { %1446 = vmatprep.subr.bf16.mxu0 %v1574_v37 }
  0xbf   : > { %1447 = vmatpush3.bf16.msra.mxu0 %v1547_v39 }
  0xc0   : > { %1448 = vmatprep.subr.bf16.mxu0 %v1574_v37 }
  0xc3   : > { %1449 = vmatpush3.bf16.msra.mxu0 %v1548_v40 }
  0xc6   : > { %1451 = vmatmul.mubr.msk.bf16.vlgmr.msra.gmra.mrb[8].mxu0 %vm345_vm11, %v1647_v12 }
 0x169   : > { %v1365_v41 = vpop.f32.mrb[0].mxu0 }
 0x16a   : > { %v1366_v43 = vpop.f32.mrb[1].mxu0  ;;  %v1387_v44 = vpop.f32.mrb[0].mxu1 }
 0x16b   : > { %v1367_v45 = vadd.f32 %v1366_v43, %v1365_v41  ;;  %v1368_v46 = vpop.f32.mrb[2].mxu0  ;;  %v1388_v47 = vpop.f32.mrb[1].mxu1 }
 0x16c   : > { %v1369_v48 = vpop.f32.mrb[3].mxu0  ;;  %v1389_v49 = vadd.f32 %v1388_v47, %v1387_v44  ;;  %v1390_v50 = vpop.f32.mrb[2].mxu1 }
 0x16d   : > { %v965_v51 = vadd.f32 %v1367_v45, %v1275_v42  ;;  %v1370_v52 = vadd.f32 %v1369_v48, %v1368_v46  ;;  %v1391_v53 = vpop.f32.mrb[3].mxu1 }
 0x16e   : > { %v1392_v54 = vadd.f32 %v1391_v53, %v1390_v50 }
 0x16f   : > { %v968_v55 = vadd.f32 %v1370_v52, %v1275_v42  ;;  %v1006_v56 = vadd.f32 %v1389_v49, %v965_v51 }
 0x171   : > { %v1009_v12 = vadd.f32 %v1392_v54, %v968_v55 }
 0x189   : > { %v1409_v57 = vpop.f32.mrb[4].mxu0 }
 0x18a   : > { %v1410_v58 = vpop.f32.mrb[5].mxu0  ;;  %v1431_v59 = vpop.f32.mrb[4].mxu1 }
 0x18b   : > { %v1411_v60 = vadd.f32 %v1410_v58, %v1409_v57  ;;  %v1412_v61 = vpop.f32.mrb[6].mxu0  ;;  %v1432_v62 = vpop.f32.mrb[5].mxu1 }
 0x18c   : > { %v1413_v63 = vpop.f32.mrb[7].mxu0  ;;  %v1433_v0 = vadd.f32 %v1432_v62, %v1431_v59  ;;  %v1434_v1 = vpop.f32.mrb[6].mxu1 }
 0x18d   : > { %v1047_v2 = vadd.f32 %v1411_v60, %v1006_v56  ;;  %v1414_v3 = vadd.f32 %v1413_v63, %v1412_v61  ;;  %v1435_v4 = vpop.f32.mrb[7].mxu1 }
 0x18e   : > { %v1436_v5 = vadd.f32 %v1435_v4, %v1434_v1 }
 0x18f   : > { %v1050_v6 = vadd.f32 %v1414_v3, %v1009_v12  ;;  %v1088_v7 = vadd.f32 %v1433_v0, %v1047_v2 }
 0x191   : > { %v1091_v8 = vadd.f32 %v1436_v5, %v1050_v6 }
 0x199   : > { %v1128_v9 = vpop.f32.mrb[8].mxu0 }
 0x19a   : > { %v1129_v10 = vadd.f32 %v1128_v9, %v1088_v7  ;;  %v1452_v13 = vpop.f32.mrb[9].mxu0 }
 0x19b   : > { %v1131_v14 = vpop.f32.mrb[10].mxu0 }
 0x19c   : > { %v1135_v15 = vmax.f32 %v1129_v10, 0.0  ;;  %v1132_v16 = vadd.f32 %v1131_v14, %v1091_v8  ;;  %v1453_v17 = vpop.f32.mrb[11].mxu0 }
 0x19e   : > { %v1140_v18 = vrot.slane %v1135_v15, 7  ;;  %v1136_v19 = vmax.f32 %v1132_v16, 0.0  ;;  %v1147_v21 = vrot.slane %v1135_v15, 1 }
 0x1a0   : > { %v1145_v20 = vsel %vm334_vm14, 0.0, %v1140_v18  ;;  %v1141_v22 = vrot.slane %v1136_v19, 7  ;;  %v1148_v23 = vrot.slane %v1136_v19, 1 }
 0x1a1   : > { %v1153_v24 = vmax.f32 %v1145_v20, %v1135_v15 }
 0x1a2   : > { %v1142_v25 = vsel %vm334_vm14, %v1140_v18, %v1141_v22  ;;  %v1149_v26 = vsel %vm248_vm9, %v1147_v21, %v1148_v23  ;;  %v1152_v29 = vsel %vm248_vm9, %v1148_v23, 0.0 }
 0x1a3   : > { %v1154_v27 = vmax.f32 %v1142_v25, %v1136_v19  ;;  %v1155_v28 = vmax.f32 %v1153_v24, %v1149_v26 }
 0x1a5   : > { %v1156_v30 = vmax.f32 %v1154_v27, %v1152_v29  ;;  %1157 = vst.msk [vmem:[%s221_s30] sm:$0xff] %vm345_vm11, %v1155_v28 }
 0x1a7   : > { %1158 = vst.msk [vmem:[%s221_s30 + $0x8] sm:$0xff] %vm345_vm11, %v1156_v30 }
 0x1a8 PF: > { %s13_s14 = sadd.s32 1, %s1571_s14   ;;  %s1945_s12 = smov %s1567_s13 }
 0x1a9   : > { %p10_p5 = scmp.ge.s32.totalorder %s13_s14, 4   ;;  %s1946_s13 = smov %s1948_s15 }
 0x1ab   :  { %12 = sbr.rel (!%p10_p5) target bundleno = 2 (0x2), region = 68 }

// kernel: davenet_forward.9
= control target key start
LH: loop header
LB: loop body
LE: loop exit
PB: predicated region body
PF: predicated region fallthrough
CT: control target
= control target key end

     0   :  { %s1533_s12 = smov 0   ;;  %s1535_s13 = smov 0   ;;  %s1843_s0 = inlined_call_operand.vmem [shape: f32[2,8,64], index: 0, kind: input, shape index: {}]   ;;  %s1844_s1 = inlined_call_operand.vmem [shape: bf16[1088,32], index: 1, kind: input, shape index: {}]   ;;  %s1845_s2 = inlined_call_operand.vmem [shape: f32[1,32], index: 2, kind: input, shape index: {}]   ;;  %s1846_s3 = inlined_call_operand.vmem [shape: f32[2,8,32], index: 3, kind: output, shape index: {}]  }
   0x1   :  { %s1537_s14 = smov 0  }
   0x2 LB: > { %s25_s15 = sadd.s32 1, %s1503_s13  ;;  %p1210_p0 = scmp.ge.s32.totalorder %s1507_s14, 1  ;;  %s1507_s14 = sphi %s1537_s14, %s13_s14   ;;  %s1503_s13 = sphi %s1535_s13, %s1848_s13   ;;  %s1499_s12 = sphi %s1533_s12, %s1847_s12  }
   0x3   : > { %p27_p1 = scmp.ge.s32.totalorder %s25_s15, 2  ;;  %p167_p2 = scmp.lt.s32.totalorder %s1507_s14, 3 }
   0x5   : > { %s1850_s15 = smov (%p27_p1, %s25_s15), 0  ;;  %p168_p3 = pnand %p1210_p0, %p167_p2 }
   0x6   : > { %p199_p4 = scmp.lt.s32.totalorder (!%p168_p3), %s1499_s12, 1  ;;  %v1417_v0 = vld [vmem:[%s1844_s1 + $0x40] sm:$0xff] (!%p168_p3)   ;;  %vm222_vm0 = vcmask (!%p168_p3), 1043456   ;;  %v1421_v6 = vld [vmem:[%s1844_s1 + $0x48] sm:$0xff] (!%p168_p3)   ;;  %v1509_v7 = vmov (!%p168_p3), 0   ;;  %v1425_v15 = vld [vmem:[%s1844_s1 + $0x50] sm:$0xff] (!%p168_p3)  }
   0x7   : > { %171 = sbr.rel (%p168_p3) target bundleno = 421 (0x1a5), region = 32  ;;  %v1418_v1 = vld [vmem:[%s1844_s1] sm:$0xff] (!%p168_p3)   ;;  %1284 = vmatprep.subr.bf16.mxu0 (!%p168_p3), %v1417_v0  ;;  %v1575_v8 = vrot.slane (!%p168_p3), %v1509_v7, 5  ;;  %v1422_v9 = vld [vmem:[%s1844_s1 + $0x8] sm:$0xff] (!%p168_p3)   ;;  %v1584_v12 = vrot.slane (!%p168_p3), %v1509_v7, 6  ;;  %v1426_v18 = vld [vmem:[%s1844_s1 + $0x10] sm:$0xff] (!%p168_p3)  }
   0x8   : > { %1285 = vmatpush3.bf16.msra.mxu0 (!%p168_p3), %v1418_v1  ;;  %v1419_v2 = vld [vmem:[%s1844_s1 + $0xc0] sm:$0xff] (!%p168_p3)   ;;  %v1423_v11 = vld [vmem:[%s1844_s1 + $0xc8] sm:$0xff] (!%p168_p3)   ;;  %vm269_vm1 = vsmask.f32 (!%p168_p3), 2304  ;;  %vm254_vm2 = vsmask.f32 (!%p168_p3), 3328 }
   0x9   : > { %1306 = vmatprep.subr.bf16.mxu1 (!%p168_p3), %v1419_v2  ;;  %v1420_v4 = vld [vmem:[%s1844_s1 + $0x80] sm:$0xff] (!%p168_p3)   ;;  %1286 = vmatprep.subr.bf16.mxu0 (!%p168_p3), %v1421_v6  ;;  %v1424_v13 = vld [vmem:[%s1844_s1 + $0x88] sm:$0xff] (!%p168_p3)   ;;  %v1427_v19 = vld [vmem:[%s1844_s1 + $0xd0] sm:$0xff] (!%p168_p3)   ;;  %v1616_v35 = vrot.slane (!%p168_p3), %v1509_v7, 7  ;;  %s1510_s24 = smov (!%p168_p3), 64   ;;  %v277_v41 = vor.u32 (!%p168_p3), %v1584_v12, %v1575_v8  ;;  %vm306_vm5 = vcmask (!%p168_p3), 523264  }
   0xa   : > { %1307 = vmatpush3.bf16.msra.mxu1 (!%p168_p3), %v1420_v4  ;;  %v1428_v28 = vld [vmem:[%s1844_s1 + $0x90] sm:$0xff] (!%p168_p3)   ;;  %v1429_v29 = vld [vmem:[%s1844_s1 + $0x58] sm:$0xff] (!%p168_p3)   ;;  %vm299_vm3 = vsmask.f32 (!%p168_p3), 256  ;;  %v1433_v46 = vld [vmem:[%s1844_s1 + $0x60] sm:$0xff] (!%p168_p3)   ;;  %vm265_vm6 = vcmask (!%p168_p3), 1042432  }
   0xb   : > { %1308 = vmatprep.subr.bf16.mxu1 (!%p168_p3), %v1423_v11  ;;  %v1430_v39 = vld [vmem:[%s1844_s1 + $0x18] sm:$0xff] (!%p168_p3)   ;;  %vm285_vm4 = vsmask.f32 (!%p168_p3), 1280  ;;  %v291_v47 = vor.u32 (!%p168_p3), %v1616_v35, %v1584_v12  ;;  %v1434_v48 = vld [vmem:[%s1844_s1 + $0x20] sm:$0xff] (!%p168_p3)   ;;  %v1437_v55 = vld [vmem:[%s1844_s1 + $0x68] sm:$0xff] (!%p168_p3)   ;;  %vm295_vm7 = vcmask (!%p168_p3), 1040384  }
   0xc   : > { %1287 = vmatpush3.bf16.msra.mxu0 (!%p168_p3), %v1422_v9  ;;  %v1431_v44 = vld [vmem:[%s1844_s1 + $0xd8] sm:$0xff] (!%p168_p3)   ;;  %v1435_v53 = vld [vmem:[%s1844_s1 + $0xe0] sm:$0xff] (!%p168_p3)   ;;  %v1438_v58 = vld [vmem:[%s1844_s1 + $0x28] sm:$0xff] (!%p168_p3)   ;;  %vm281_vm8 = vcmask (!%p168_p3), 1041408   ;;  %vm1512_vm9 = vmmov (!%p168_p3), 0   ;;  %vm1099_vm10 = vcmask (!%p168_p3), 1046528  }
   0xd   : > { %1288 = vmatprep.subr.bf16.mxu0 (!%p168_p3), %v1425_v15  ;;  %v1432_v45 = vld [vmem:[%s1844_s1 + $0x98] sm:$0xff] (!%p168_p3)   ;;  %v1436_v54 = vld [vmem:[%s1844_s1 + $0xa0] sm:$0xff] (!%p168_p3)   ;;  %v1439_v59 = vld [vmem:[%s1844_s1 + $0xe8] sm:$0xff] (!%p168_p3)   ;;  %vm1103_vm11 = vcmask (!%p168_p3), 261120  }
   0xe   : > { %s1852_s12 = smov (!%p199_p4, %s1499_s12), 1  ;;  %1309 = vmatpush3.bf16.msra.mxu1 %v1424_v13  ;;  %v1440_v60 = vld [vmem:[%s1844_s1 + $0xa8] sm:$0xff]   ;;  %v1441_v61 = vld [vmem:[%s1844_s1 + $0x70] sm:$0xff]   ;;  %v1445_v1 = vld [vmem:[%s1844_s1 + $0x78] sm:$0xff]  }
   0xf   : > { %s1211_s20 = sshll.u32 %s1852_s12, 3  ;;  %1310 = vmatprep.subr.bf16.mxu1 %v1427_v19  ;;  %v1442_v62 = vld [vmem:[%s1844_s1 + $0x30] sm:$0xff]   ;;  %v1446_v2 = vld [vmem:[%s1844_s1 + $0x38] sm:$0xff]   ;;  %v1451_v6 = vld [vmem:[%s1844_s1 + $0x1c0] sm:$0xff]  }
  0x10   : > { %s202_s25 = scalar_lea.vmem %s1843_s0, %s1211_s20  ;;  %1289 = vmatpush3.bf16.msra.mxu0 %v1426_v18  ;;  %v1443_v63 = vld [vmem:[%s1844_s1 + $0xf0] sm:$0xff]   ;;  %v1448_v4 = vld [vmem:[%s1844_s1 + $0xb8] sm:$0xff]   ;;  %v1450_v19 = vld [vmem:[%s1844_s1 + $0x100] sm:$0xff]   ;;  %s216_s30 = scalar_lea.vmem %s1846_s3, %s1211_s20 }
  0x11   : > { %v218_v3 = vld [vmem:[%s202_s25] sm:$0xff]  ;;  %1290 = vmatprep.subr.bf16.mxu0 %v1429_v29  ;;  %v1444_v0 = vld [vmem:[%s1844_s1 + $0xb0] sm:$0xff]   ;;  %v1454_v29 = vld [vmem:[%s1844_s1 + $0x108] sm:$0xff]  }
  0x12   : > { %v219_v5 = vpack.c.bf16 %v218_v3, %v218_v3  ;;  %1311 = vmatpush3.bf16.msra.mxu1 %v1428_v28  ;;  %v1447_v3 = vld [vmem:[%s1844_s1 + $0xf8] sm:$0xff]  }
  0x13   : > { %1312 = vmatprep.subr.bf16.mxu1 %v1431_v44  ;;  %v1467_v44 = vld [vmem:[%s1844_s1 + $0x1e0] sm:$0xff]  }
  0x14   : > { %v221_v10 = vrot.slane %v219_v5, 4  ;;  %1291 = vmatpush3.bf16.msra.mxu0 %v1430_v39  ;;  %v1449_v5 = vld [vmem:[%s1844_s1 + $0x140] sm:$0xff]  }
  0x15   : > { %1292 = vmatprep.subr.bf16.mxu0 %v1433_v46  ;;  %v1468_v46 = vld [vmem:[%s1844_s1 + $0x1a0] sm:$0xff]  }
  0x16   : > { %v1589_v14 = vsel %vm222_vm0, 0, %v221_v10  ;;  %1313 = vmatpush3.bf16.msra.mxu1 %v1432_v45  ;;  %v1466_v45 = vld [vmem:[%s1844_s1 + $0x120] sm:$0xff]  }
  0x17   : > { %v1595_v16 = vshrl.u32 %v1589_v14, 16  ;;  %v228_v17 = vshll.u32 %v1589_v14, 16  ;;  %1314 = vmatprep.subr.bf16.mxu1 %v1435_v53  ;;  %v235_v9 = vrot.slane %v1589_v14, 1  ;;  %v247_v10 = vrot.slane %v1589_v14, 3 }
  0x18   : > { %1293 = vmatpush3.bf16.msra.mxu0 %v1434_v48  ;;  %v266_v18 = vrot.slane %v1589_v14, 5  ;;  %v296_v28 = vrot.slane %v1589_v14, 7  ;;  %v1471_v48 = vld [vmem:[%s1844_s1 + $0x1e8] sm:$0xff]  }
  0x19   : > { %v236_v20 = vrot.slane %v1595_v16, 1  ;;  %v237_v21 = vrot.slane %v228_v17, 2  ;;  %v248_v22 = vrot.slane %v1595_v16, 3  ;;  %v249_v23 = vrot.slane %v228_v17, 4  ;;  %1294 = vmatprep.subr.bf16.mxu0 %v1437_v55  ;;  %v1476_v55 = vld [vmem:[%s1844_s1 + $0x1b0] sm:$0xff]  }
  0x1a   : > { %v230_v24 = vrot.slane %v228_v17, 1  ;;  %v242_v25 = vrot.slane %v1595_v16, 2  ;;  %v243_v26 = vrot.slane %v228_v17, 3  ;;  %v270_v27 = vrot.slane %v1595_v16, 5  ;;  %1315 = vmatpush3.bf16.msra.mxu1 %v1436_v54  ;;  %v1474_v54 = vld [vmem:[%s1844_s1 + $0x130] sm:$0xff]  }
  0x1b   : > { %v238_v30 = vor.u32 %v237_v21, %v236_v20  ;;  %v250_v31 = vor.u32 %v249_v23, %v248_v22  ;;  %v271_v32 = vrot.slane %v228_v17, 6  ;;  %v255_v33 = vrot.slane %v1595_v16, 4  ;;  %1316 = vmatprep.subr.bf16.mxu1 %v1439_v59  ;;  %v1452_v20 = vld [vmem:[%s1844_s1 + $0x180] sm:$0xff]   ;;  %v1453_v23 = vld [vmem:[%s1844_s1 + $0x148] sm:$0xff]  }
  0x1c   : > { %v256_v34 = vrot.slane %v228_v17, 5  ;;  %v231_v36 = vor.u32 %v230_v24, %v1595_v16  ;;  %v244_v37 = vor.u32 %v243_v26, %v242_v25  ;;  %v286_v38 = vrot.slane %v1595_v16, 6  ;;  %1295 = vmatpush3.bf16.msra.mxu0 %v1438_v58  ;;  %v1455_v24 = vld [vmem:[%s1844_s1 + $0x1c8] sm:$0xff]  }
  0x1d   : > { %239 = vrot.lane.b32.xlu0 %v238_v30, %s1510_s24  ;;  %251 = vrot.lane.b32.xlu1 %v250_v31, %s1510_s24  ;;  %v272_v40 = vor.u32 %v271_v32, %v270_v27  ;;  %v287_v43 = vrot.slane %v228_v17, 7  ;;  %v300_v51 = vrot.slane %v1595_v16, 7  ;;  %v241_v17 = vrot.slane %v1589_v14, 2  ;;  %v1456_v30 = vld [vmem:[%s1844_s1 + $0x188] sm:$0xff]   ;;  %v1457_v31 = vld [vmem:[%s1844_s1 + $0x150] sm:$0xff]  }
  0x1e   : > { %v257_v42 = vor.u32 %v256_v34, %v255_v33  ;;  %1317 = vmatpush3.bf16.msra.mxu1 %v1440_v60  ;;  %1296 = vmatprep.subr.bf16.mxu0 %v1441_v61  ;;  %v268_v27 = vsel %vm265_vm6, %v266_v18, %v1575_v8  ;;  %v298_v34 = vsel %vm295_vm7, %v296_v28, %v1616_v35  ;;  %v282_v58 = vrot.slane %v1589_v14, 6  ;;  %v1478_v60 = vld [vmem:[%s1844_s1 + $0x138] sm:$0xff]  }
  0x1f   : > { %v278_v49 = vsel %vm269_vm1, %v272_v40, %v277_v41  ;;  %v288_v52 = vor.u32 %v287_v43, %v286_v38  ;;  %v303_v56 = vsel %vm299_vm3, %v300_v51, %v1616_v35  ;;  %1318 = vmatprep.subr.bf16.mxu1 %v1443_v63  ;;  %v1461_v38 = vld [vmem:[%s1844_s1 + $0x158] sm:$0xff]   ;;  %v1465_v43 = vld [vmem:[%s1844_s1 + $0x160] sm:$0xff]   ;;  %v1473_v51 = vld [vmem:[%s1844_s1 + $0x170] sm:$0xff]   ;;  %v253_v59 = vrot.slane %v1589_v14, 4 }
  0x20   : > { %v261_v50 = vsel %vm254_vm2, %v257_v42, %v1575_v8  ;;  %1297 = vmatpush3.bf16.msra.mxu0 %v1442_v62  ;;  %v1459_v8 = vld [vmem:[%s1844_s1 + $0x1d0] sm:$0xff]   ;;  %v1463_v35 = vld [vmem:[%s1844_s1 + $0x1d8] sm:$0xff]   ;;  %v284_v62 = vsel %vm281_vm8, %v282_v58, %v1584_v12  ;;  %v1482_v12 = vld [vmem:[%s1844_s1 + $0x208] sm:$0xff]  }
  0x21   : > { %232 = vrot.lane.b32.xlu0 %v231_v36, %s1510_s24  ;;  %245 = vrot.lane.b32.xlu1 %v244_v37, %s1510_s24  ;;  %v292_v57 = vsel %vm285_vm4, %v288_v52, %v291_v47  ;;  %v1458_v36 = vld [vmem:[%s1844_s1 + $0x110] sm:$0xff]   ;;  %v1462_v41 = vld [vmem:[%s1844_s1 + $0x118] sm:$0xff]  }
  0x22   : > { %1319 = vmatpush3.bf16.msra.mxu1 %v1444_v0  ;;  %1298 = vmatprep.subr.bf16.mxu0 %v1445_v1  ;;  %v1460_v37 = vld [vmem:[%s1844_s1 + $0x190] sm:$0xff]   ;;  %v1464_v42 = vld [vmem:[%s1844_s1 + $0x198] sm:$0xff]   ;;  %v1469_v47 = vld [vmem:[%s1844_s1 + $0x168] sm:$0xff]  }
  0x23   : > { %1320 = vmatprep.subr.bf16.mxu1 %v1447_v3  ;;  %v1475_v52 = vld [vmem:[%s1844_s1 + $0x1f0] sm:$0xff]   ;;  %v1480_v61 = vld [vmem:[%s1844_s1 + $0x1b8] sm:$0xff]  }
  0x24   : > { %1299 = vmatpush3.bf16.msra.mxu0 %v1446_v2  ;;  %v1511_v2 = vmov 0.0   ;;  %v1483_v3 = vld [vmem:[%s1844_s1 + $0x210] sm:$0xff]  }
  0x25   : > { %279 = vrot.lane.b32.xlu0 %v278_v49, %s1510_s24  ;;  %262 = vrot.lane.b32.xlu1 %v261_v50, %s1510_s24  ;;  %v1470_v49 = vld [vmem:[%s1844_s1 + $0x128] sm:$0xff]  }
  0x26   : > { %1321 = vmatpush3.bf16.msra.mxu1 %v1448_v4  ;;  %1328 = vmatprep.subr.bf16.mxu0 %v1449_v5  ;;  %v1472_v50 = vld [vmem:[%s1844_s1 + $0x1a8] sm:$0xff]   ;;  %v1484_v4 = vld [vmem:[%s1844_s1 + $0x218] sm:$0xff]  }
  0x27   : > { %1350 = vmatprep.subr.bf16.mxu1 %v1451_v6 }
  0x29   : > { %304 = vrot.lane.b32.xlu0 %v303_v56, %s1510_s24  ;;  %293 = vrot.lane.b32.xlu1 %v292_v57, %s1510_s24  ;;  %v1477_v56 = vld [vmem:[%s1844_s1 + $0x178] sm:$0xff]  }
  0x2a   : > { %v1479_v57 = vld [vmem:[%s1844_s1 + $0x1f8] sm:$0xff]  }
  0x8f   : > { %v240_v11 = vpop.permute.xlu0 %239  ;;  %v252_v13 = vpop.permute.xlu1 %251 }
  0x90   : > { %v312_v15 = vsel %vm306_vm5, %v235_v9, %v240_v11  ;;  %v320_v16 = vsel %vm306_vm5, %v247_v10, %v252_v13  ;;  %v1213_v9 = vld [vmem:[%s1845_s2] ss:$0 sm:$0xff] }
  0x91   : > { %923 = vmatprep.mubr.bf16.mxu0 %v312_v15  ;;  %963 = vmatprep.mubr.bf16.mxu1 %v320_v16 }
  0x93   : > { %v233_v21 = vpop.permute.xlu0 %232  ;;  %v246_v22 = vpop.permute.xlu1 %245 }
  0x94   : > { %v308_v25 = vsel %vm306_vm5, %v1589_v14, %v233_v21  ;;  %v316_v26 = vsel %vm306_vm5, %v241_v17, %v246_v22  ;;  %v1481_v14 = vld [vmem:[%s1844_s1 + $0x200] sm:$0xff]  }
  0x95   : > { %924 = vmatmul.mubr.bf16.vlgmr.msra.gmra.mrb[0].mxu0 %v308_v25  ;;  %964 = vmatmul.mubr.bf16.vlgmr.msra.gmra.mrb[0].mxu1 %v316_v26 }
  0x96   : > { %1329 = vmatpush3.bf16.msra.mxu0 %v1450_v19  ;;  %1351 = vmatpush3.bf16.msra.mxu1 %v1452_v20 }
  0x97   : > { %1330 = vmatprep.subr.bf16.mxu0 %v1453_v23  ;;  %1352 = vmatprep.subr.bf16.mxu1 %v1455_v24  ;;  %v280_v32 = vpop.permute.xlu0 %279  ;;  %v263_v53 = vpop.permute.xlu1 %262 }
  0x98   : > { %v328_v33 = vsel %vm306_vm5, %v268_v27, %v280_v32  ;;  %v324_v0 = vsel %vm306_vm5, %v253_v59, %v263_v53 }
  0x99   : > { %1003 = vmatprep.mubr.bf16.mxu0 %v328_v33 }
  0x9a   : > { %1331 = vmatpush3.bf16.msra.mxu0 %v1454_v29  ;;  %1353 = vmatpush3.bf16.msra.mxu1 %v1456_v30 }
  0x9b   : > { %1332 = vmatprep.subr.bf16.mxu0 %v1457_v31  ;;  %1354 = vmatprep.subr.bf16.mxu1 %v1459_v8  ;;  %v305_v39 = vpop.permute.xlu0 %304  ;;  %v294_v63 = vpop.permute.xlu1 %293 }
  0x9c   : > { %v336_v40 = vsel %vm306_vm5, %v298_v34, %v305_v39  ;;  %v332_v1 = vsel %vm306_vm5, %v284_v62, %v294_v63 }
  0x9d   : > { %1043 = vmatprep.mubr.bf16.mxu1 %v336_v40 }
  0x9e   : > { %1333 = vmatpush3.bf16.msra.mxu0 %v1458_v36  ;;  %1355 = vmatpush3.bf16.msra.mxu1 %v1460_v37 }
  0x9f   : > { %1334 = vmatprep.subr.bf16.mxu0 %v1461_v38  ;;  %1356 = vmatprep.subr.bf16.mxu1 %v1463_v35 }
  0xa2   : > { %1335 = vmatpush3.bf16.msra.mxu0 %v1462_v41  ;;  %1357 = vmatpush3.bf16.msra.mxu1 %v1464_v42 }
  0xa3   : > { %1336 = vmatprep.subr.bf16.mxu0 %v1465_v43  ;;  %1358 = vmatprep.subr.bf16.mxu1 %v1467_v44 }
  0xa6   : > { %1337 = vmatpush3.bf16.msra.mxu0 %v1466_v45  ;;  %1359 = vmatpush3.bf16.msra.mxu1 %v1468_v46 }
  0xa7   : > { %1338 = vmatprep.subr.bf16.mxu0 %v1469_v47  ;;  %1360 = vmatprep.subr.bf16.mxu1 %v1471_v48 }
  0xaa   : > { %1339 = vmatpush3.bf16.msra.mxu0 %v1470_v49  ;;  %1361 = vmatpush3.bf16.msra.mxu1 %v1472_v50 }
  0xab   : > { %1340 = vmatprep.subr.bf16.mxu0 %v1473_v51  ;;  %1362 = vmatprep.subr.bf16.mxu1 %v1475_v52 }
  0xae   : > { %1341 = vmatpush3.bf16.msra.mxu0 %v1474_v54  ;;  %1363 = vmatpush3.bf16.msra.mxu1 %v1476_v55 }
  0xaf   : > { %1342 = vmatprep.subr.bf16.mxu0 %v1477_v56  ;;  %1364 = vmatprep.subr.bf16.mxu1 %v1479_v57 }
  0xb2   : > { %1343 = vmatpush3.bf16.msra.mxu0 %v1478_v60  ;;  %1365 = vmatpush3.bf16.msra.mxu1 %v1480_v61 }
  0xb3   : > { %1377 = vmatprep.subr.bf16.mxu0 %v1511_v2 }
  0xb5   : > { %1004 = vmatmul.mubr.bf16.vlgmr.msra.gmra.mrb[4].mxu0 %v324_v0  ;;  %1044 = vmatmul.mubr.bf16.vlgmr.msra.gmra.mrb[4].mxu1 %v332_v1 }
  0xb6   : > { %1378 = vmatpush3.bf16.msra.mxu0 %v1481_v14  ;;  %1385 = vmatprep.mubr.msk.bf16.mxu0 %vm1512_vm9, %v1511_v2 }
  0xb7   : > { %1379 = vmatprep.subr.bf16.mxu0 %v1511_v2 }
  0xba   : > { %1380 = vmatpush3.bf16.msra.mxu0 %v1482_v12 }
  0xbb   : > { %1381 = vmatprep.subr.bf16.mxu0 %v1511_v2 }
  0xbe   : > { %1382 = vmatpush3.bf16.msra.mxu0 %v1483_v3 }
  0xbf   : > { %1383 = vmatprep.subr.bf16.mxu0 %v1511_v2 }
  0xc2   : > { %1384 = vmatpush3.bf16.msra.mxu0 %v1484_v4 }
  0xc5   : > { %1386 = vmatmul.mubr.bf16.vlgmr.msra.gmra.mrb[8].mxu0 %v1509_v7 }
 0x168   : > { %v1300_v5 = vpop.f32.mrb[0].mxu0  ;;  %v1322_v6 = vpop.f32.mrb[0].mxu1 }
 0x169   : > { %v1301_v10 = vpop.f32.mrb[1].mxu0  ;;  %v1323_v11 = vpop.f32.mrb[1].mxu1 }
 0x16a   : > { %v1302_v13 = vadd.f32 %v1301_v10, %v1300_v5  ;;  %v1303_v15 = vpop.f32.mrb[2].mxu0  ;;  %v1324_v16 = vadd.f32 %v1323_v11, %v1322_v6  ;;  %v1325_v17 = vpop.f32.mrb[2].mxu1 }
 0x16b   : > { %v1304_v18 = vpop.f32.mrb[3].mxu0  ;;  %v1326_v19 = vpop.f32.mrb[3].mxu1 }
 0x16c   : > { %v926_v20 = vadd.f32 %v1302_v13, %v1213_v9 }
 0x16e   : > { %v966_v21 = vadd.f32 %v1324_v16, %v926_v20 }
 0x188   : > { %v1344_v22 = vpop.f32.mrb[4].mxu0  ;;  %v1366_v23 = vpop.f32.mrb[4].mxu1 }
 0x189   : > { %v1345_v24 = vpop.f32.mrb[5].mxu0  ;;  %v1367_v7 = vpop.f32.mrb[5].mxu1 }
 0x18a   : > { %v1346_v25 = vadd.f32 %v1345_v24, %v1344_v22  ;;  %v1347_v26 = vpop.f32.mrb[6].mxu0  ;;  %v1368_v27 = vadd.f32 %v1367_v7, %v1366_v23  ;;  %v1369_v28 = vpop.f32.mrb[6].mxu1 }
 0x18b   : > { %v1348_v29 = vpop.f32.mrb[7].mxu0  ;;  %v1370_v30 = vpop.f32.mrb[7].mxu1 }
 0x18c   : > { %v1006_v31 = vadd.f32 %v1346_v25, %v966_v21 }
 0x18e   : > { %v1046_v8 = vadd.f32 %v1368_v27, %v1006_v31 }
 0x198   : > { %v1085_v32 = vpop.f32.mrb[8].mxu0 }
 0x199   : > { %v1086_v33 = vadd.f32 %v1085_v32, %v1046_v8  ;;  %v1387_v34 = vpop.f32.mrb[9].mxu0 }
 0x19a   : > { %v1088_v36 = vpop.f32.mrb[10].mxu0 }
 0x19b   : > { %v1091_v37 = vmax.f32 %v1086_v33, 0.0  ;;  %v1388_v38 = vpop.f32.mrb[11].mxu0 }
 0x19d   : > { %v1093_v35 = vrot.slane %v1091_v37, 7  ;;  %v1097_v39 = vrot.slane %v1091_v37, 1 }
 0x19f   : > { %v1096_v40 = vsel %vm295_vm7, 0.0, %v1093_v35  ;;  %v1100_v42 = vsel %vm1099_vm10, %v1097_v39, 0.0 }
 0x1a0   : > { %v1101_v41 = vmax.f32 %v1096_v40, %v1091_v37 }
 0x1a2   : > { %v1102_v43 = vmax.f32 %v1101_v41, %v1100_v42 }
 0x1a4   : > { %1104 = vst.msk [vmem:[%s216_s30] sm:$0xff] %vm1103_vm11, %v1102_v43 }
 0x1a5 PF: > { %s13_s14 = sadd.s32 1, %s1507_s14   ;;  %s1847_s12 = smov %s1503_s13 }
 0x1a6   : > { %p10_p5 = scmp.ge.s32.totalorder %s13_s14, 4   ;;  %s1848_s13 = smov %s1850_s15 }
 0x1a8   :  { %12 = sbr.rel (!%p10_p5) target bundleno = 2 (0x2), region = 68 }

</bundles_post_ra>
